<compile_context>
chip_gen: v5e
topology: v5e:2x2
jax: 0.10.0
libtpu: 0.0.40
codegen_flags: <defaults>
</compile_context>

<pallas_src>
import functools
import math

import jax
import jax.numpy as jnp
from jax import lax
from jax.experimental import pallas as pl
from jax.experimental.pallas import tpu as pltpu


# ----------------------------------------------------------------------------
# helpers
# ----------------------------------------------------------------------------
def _largest_divisor(total, upper, align=1):
    """Largest divisor of `total` that is <= upper and a multiple of `align`.
    Falls back to `total` itself (full-dim exception of the (8,128) rule)."""
    best = None
    upper = min(upper, total)
    d = align
    while d <= upper:
        if total % d == 0:
            best = d
        d += align
    return best if best is not None else total


# Which 3x3 kernel taps (along one axis) land on the same original pixel for a
# given output parity:  _TAPS[parity][r]  ->  tap indices combined for input
# offset r (r=0 is the "earlier" input row/col, r=1 the "later" one).
_TAPS = (((0,), (1, 2)),      # parity 0: offsets {-1, 0}
         ((0, 1), (2,)))      # parity 1: offsets {0, +1}


def _combine_weights(w_hwio, compute_dtype):
    """w_hwio: (3,3,Cin,Cout) -> (16,Cin,Cout) pre-combined phase weights.

    Index ((py*2+px)*2+r)*2+s holds sum_{ky in TAPS[py][r], kx in TAPS[px][s]} w[ky,kx].
    """
    mats = []
    for py in range(2):
        for px in range(2):
            for r in range(2):
                for s in range(2):
                    m = None
                    for ky in _TAPS[py][r]:
                        for kx in _TAPS[px][s]:
                            m = w_hwio[ky, kx] if m is None else m + w_hwio[ky, kx]
                    mats.append(m)
    return jnp.stack(mats, axis=0).astype(compute_dtype)


# ----------------------------------------------------------------------------
# Kernels
# ----------------------------------------------------------------------------
def _upsample_only_kernel(x_ref, o_ref):
    # x_ref: (BR, W)  rows of the NCHW tensor (W on lanes)
    # o_ref: (BR, 4W) = [row 2i | row 2i+1] of the 2x-upsampled image, lane dense
    x = x_ref[...]
    br, w = x.shape
    wide = jnp.broadcast_to(x[:, :, None], (br, w, 2)).reshape(br, 2 * w)
    o_ref[...] = jnp.concatenate([wide, wide], axis=-1).astype(o_ref.dtype)


def _upsample_conv_kernel(x_ref, top_ref, bot_ref, w_ref, b_ref, o_ref):
    # x_ref:   (1, TH, W, C)     original-resolution row tile
    # top_ref: (1, 1,  W, C)     halo row above the tile (zeros at image top)
    # bot_ref: (1, 1,  W, C)     halo row below the tile (zeros at image bottom)
    # w_ref:   (16, C, C)        pre-combined phase weights
    # b_ref:   (1, 2C)           bias duplicated for the two x-phases
    # o_ref:   (1, TH, 2, W, 2C) output viewed as (N, H, py, W, px*C + c)
    x_mid = x_ref[0]
    th, w, c = x_mid.shape
    cdt = w_ref.dtype

    # Tile plus its one-row halos, cast once to the matmul dtype.
    xe = jnp.concatenate([top_ref[0], x_mid, bot_ref[0]], axis=0).astype(cdt)

    def shift_w(a, off):
        # columns shifted by `off` in {-1, 0, +1}, zero-filled at the image edge
        if off == 0:
            return a
        z = jnp.zeros((a.shape[0], 1, a.shape[2]), a.dtype)
        if off < 0:
            return jnp.concatenate([z, a[:, : w - 1, :]], axis=1)
        return jnp.concatenate([a[:, 1:, :], z], axis=1)

    bias = b_ref[...].astype(jnp.float32)[None]            # (1, 1, 2C)

    for py in range(2):
        planes = []
        for px in range(2):
            acc = jnp.zeros((th, w, c), jnp.float32)
            for r in range(2):
                rows = xe[py + r : py + r + th]            # (TH, W, C)
                for s in range(2):
                    lhs = shift_w(rows, px - 1 + s)
                    wmat = w_ref[((py * 2 + px) * 2 + r) * 2 + s]   # (C, C)
                    acc = acc + lax.dot_general(
                        lhs, wmat,
                        dimension_numbers=(((2,), (0,)), ((), ())),
                        preferred_element_type=jnp.float32)
            planes.append(acc)
        slab = jnp.concatenate(planes, axis=-1) + bias     # (TH, W, 2C), lane concat
        o_ref[0, :, py, :, :] = slab.astype(o_ref.dtype)


# ----------------------------------------------------------------------------
# Wrappers
# ----------------------------------------------------------------------------
def _upsample_nearest_nchw(x_nchw):
    n, c, h, w = x_nchw.shape
    rows = n * c * h
    x2d = x_nchw.reshape(rows, w)                          # free reshape
    itemsize = jnp.dtype(x_nchw.dtype).itemsize
    target = max(8, (512 * 1024) // max(w * itemsize, 1))
    br = _largest_divisor(rows, target, align=8)
    est = 12 * br * w * itemsize
    out2d = pl.pallas_call(
        _upsample_only_kernel,
        out_shape=jax.ShapeDtypeStruct((rows, 4 * w), x_nchw.dtype),
        grid_spec=pltpu.PrefetchScalarGridSpec(
            num_scalar_prefetch=0,
            grid=(rows // br,),
            in_specs=[pl.BlockSpec((br, w), lambda r: (r, 0))],
            out_specs=pl.BlockSpec((br, 4 * w), lambda r: (r, 0))),
        compiler_params=pltpu.CompilerParams(
            dimension_semantics=("parallel",),
            vmem_limit_bytes=int(min(64 << 20, max(32 << 20, 1.5 * est)))),
    )(x2d)
    return out2d.reshape(n, c, 2 * h, 2 * w)               # free reshape


@functools.partial(jax.jit,
                   static_argnames=("with_conv", "compute_dtype", "row_block"))
def upsample_forward(x_nchw, weight_oihw=None, bias=None, *, with_conv=True,
                     compute_dtype=jnp.float32, row_block=None):
    """Pallas implementation of Upsample.forward (PyTorch NCHW convention).

    x_nchw:       (N, C, H, W)
    weight_oihw:  (C, C, 3, 3) if with_conv
    bias:         (C,)         if with_conv
    compute_dtype: dtype of MXU operands (fp32 accumulation either way)
    row_block:    optional forced input-row tile size (must divide H)
    """
    n, c, h, w = x_nchw.shape

    if not with_conv:
        return _upsample_nearest_nchw(x_nchw)

    # ---- conv path: NHWC internally (C on lanes for the MXU) ----
    x = jnp.transpose(x_nchw, (0, 2, 3, 1))                 # (N, H, W, C)
    w_hwio = jnp.transpose(weight_oihw, (2, 3, 1, 0)).astype(jnp.float32)
    wc = _combine_weights(w_hwio, compute_dtype)            # (16, C, C)
    b2c = jnp.concatenate([bias, bias]).reshape(1, 2 * c).astype(jnp.float32)

    itemsize = jnp.dtype(x.dtype).itemsize
    if row_block is None:
        target = max(1, (1 << 20) // max(w * c * itemsize, 1))
        th = _largest_divisor(h, target, align=1)
    else:
        if h % row_block != 0:
            raise ValueError("row_block must divide H")
        th = row_block
    t = h // th

    # One-row halos per tile (zeros outside the image): no overlapping
    # BlockSpecs, no padded copy, no in-kernel edge masking along H.
    zrow = jnp.zeros((n, 1, w, c), x.dtype)
    top_halo = jnp.concatenate([zrow, x[:, th - 1:h - 1:th]], axis=1)   # (N, T, W, C)
    bot_halo = jnp.concatenate([x[:, th:h:th], zrow], axis=1)           # (N, T, W, C)

    cbytes = jnp.dtype(compute_dtype).itemsize
    est = (2 * (th + 2) * w * c * itemsize        # input tile + halos (double buffered)
           + 2 * th * 4 * w * c * itemsize        # output tile (double buffered)
           + 2 * 16 * c * c * cbytes              # combined weights (double buffered)
           + 10 * th * w * c * 4)                 # in-kernel temporaries / f32 accs
    vmem_limit = int(min(64 << 20, max(32 << 20, 1.5 * est)))

    out5 = pl.pallas_call(
        _upsample_conv_kernel,
        out_shape=jax.ShapeDtypeStruct((n, h, 2, w, 2 * c), x.dtype),
        grid_spec=pltpu.PrefetchScalarGridSpec(
            num_scalar_prefetch=0,
            grid=(n, t),
            in_specs=[
                pl.BlockSpec((1, th, w, c), lambda i, j: (i, j, 0, 0)),
                pl.BlockSpec((1, 1, w, c), lambda i, j: (i, j, 0, 0)),
                pl.BlockSpec((1, 1, w, c), lambda i, j: (i, j, 0, 0)),
                pl.BlockSpec((16, c, c), lambda i, j: (0, 0, 0)),
                pl.BlockSpec((1, 2 * c), lambda i, j: (0, 0)),
            ],
            out_specs=pl.BlockSpec((1, th, 2, w, 2 * c),
                                   lambda i, j: (i, j, 0, 0, 0)),
        ),
        compiler_params=pltpu.CompilerParams(
            dimension_semantics=("parallel", "parallel"),
            vmem_limit_bytes=vmem_limit),
    )(x, top_halo, bot_halo, wc, b2c)

    out = out5.reshape(n, 2 * h, 2 * w, c)                  # free reshape
    return jnp.transpose(out, (0, 3, 1, 2))                 # NHWC -> NCHW


# ----------------------------------------------------------------------------
# Reference (pure JAX) for verification
# ----------------------------------------------------------------------------
def upsample_ref(x_nchw, weight_oihw=None, bias=None, *, with_conv=True):
    up = jnp.repeat(jnp.repeat(x_nchw, 2, axis=2), 2, axis=3)
    if not with_conv:
        return up
    out = lax.conv_general_dilated(
        up, weight_oihw, window_strides=(1, 1), padding=((1, 1), (1, 1)),
        dimension_numbers=("NCHW", "OIHW", "NCHW"))
    return out + bias[None, :, None, None]


# ----------------------------------------------------------------------------
if __name__ == "__main__":
    key = jax.random.PRNGKey(0)
    N, C, H, W = 2, 4, 16, 16

    kx, kw, kb = jax.random.split(key, 3)
    x = jax.random.normal(kx, (N, C, H, W), dtype=jnp.float32)

    fan_in = C * 3 * 3
    bound = 1.0 / math.sqrt(fan_in)
    weight = jax.random.uniform(kw, (C, C, 3, 3), jnp.float32, -bound, bound)
    bias = jax.random.uniform(kb, (C,), jnp.float32, -bound, bound)

    ref = upsample_ref(x, weight, bias, with_conv=True)

    # fp32 operands, one row tile per image
    out = jax.block_until_ready(upsample_forward(x, weight, bias, with_conv=True))
    assert out.shape == (N, C, 2 * H, 2 * W), out.shape
    assert jnp.allclose(out, ref, atol=1e-4, rtol=1e-4), "fp32 mismatch"

    # fp32 operands, forced row tiling (4 tiles of 4 rows -> exercises halos)
    out_t = jax.block_until_ready(
        upsample_forward(x, weight, bias, with_conv=True, row_block=4))
    assert jnp.allclose(out_t, ref, atol=1e-4, rtol=1e-4), "tiled mismatch"

    # bf16 MXU operands with fp32 accumulation (v6e/v7x fast path)
    out_bf = jax.block_until_ready(
        upsample_forward(x, weight, bias, with_conv=True,
                         compute_dtype=jnp.bfloat16, row_block=8))
    assert jnp.allclose(out_bf, ref, atol=1e-1, rtol=1e-1), "bf16 mismatch"

    # upsample-only path (pure NCHW, no transposes)
    out_up = jax.block_until_ready(upsample_forward(x, with_conv=False))
    assert jnp.allclose(out_up, upsample_ref(x, with_conv=False)), "upsample mismatch"

    print("KERNEL_OK")
</pallas_src>

<mosaic_0001>
module attributes {stable_mosaic.version = 11 : i64} {
  func.func @_upsample_conv_kernel(%arg0: i32, %arg1: i32, %arg2: memref<1x16x16x4xf32, #tpu.memory_space<vmem>>, %arg3: memref<1x1x16x4xf32, #tpu.memory_space<vmem>>, %arg4: memref<1x1x16x4xf32, #tpu.memory_space<vmem>>, %arg5: memref<16x4x4xf32, #tpu.memory_space<vmem>>, %arg6: memref<1x8xf32, #tpu.memory_space<vmem>>, %arg7: memref<1x16x2x16x8xf32, #tpu.memory_space<vmem>>) attributes {dimension_semantics = [#tpu.dimension_semantics<parallel>, #tpu.dimension_semantics<parallel>], iteration_bounds = array<i64: 2, 1>, scalar_prefetch = 0 : i64, scratch_operands = 0 : i64, tpu.core_type = #tpu.core_type<tc>, window_params = [{transform_indices = @transform_0, window_bounds = array<i64: 1, 16, 16, 4>}, {transform_indices = @transform_1, window_bounds = array<i64: 1, 1, 16, 4>}, {transform_indices = @transform_2, window_bounds = array<i64: 1, 1, 16, 4>}, {pipeline_mode = #tpu.pipeline_mode<synchronous>, transform_indices = @transform_3, window_bounds = array<i64: 16, 4, 4>}, {pipeline_mode = #tpu.pipeline_mode<synchronous>, transform_indices = @transform_4, window_bounds = array<i64: 1, 8>}, {transform_indices = @transform_5, window_bounds = array<i64: 1, 16, 2, 16, 8>}]} {
    %c0 = arith.constant 0 : index
    %c0_0 = arith.constant 0 : index
    %c0_1 = arith.constant 0 : index
    %c0_2 = arith.constant 0 : index
    %0 = vector.load %arg2[%c0, %c0_0, %c0_1, %c0_2] : memref<1x16x16x4xf32, #tpu.memory_space<vmem>>, vector<1x16x16x4xf32>
    %1 = vector.shape_cast %0 : vector<1x16x16x4xf32> to vector<16x16x4xf32>
    %c0_3 = arith.constant 0 : index
    %c0_4 = arith.constant 0 : index
    %c0_5 = arith.constant 0 : index
    %c0_6 = arith.constant 0 : index
    %2 = vector.load %arg3[%c0_3, %c0_4, %c0_5, %c0_6] : memref<1x1x16x4xf32, #tpu.memory_space<vmem>>, vector<1x1x16x4xf32>
    %3 = vector.shape_cast %2 : vector<1x1x16x4xf32> to vector<1x16x4xf32>
    %c0_7 = arith.constant 0 : index
    %c0_8 = arith.constant 0 : index
    %c0_9 = arith.constant 0 : index
    %c0_10 = arith.constant 0 : index
    %4 = vector.load %arg4[%c0_7, %c0_8, %c0_9, %c0_10] : memref<1x1x16x4xf32, #tpu.memory_space<vmem>>, vector<1x1x16x4xf32>
    %5 = vector.shape_cast %4 : vector<1x1x16x4xf32> to vector<1x16x4xf32>
    %6 = tpu.concatenate %3, %1, %5 in 0 : vector<1x16x4xf32>, vector<16x16x4xf32>, vector<1x16x4xf32> -> vector<18x16x4xf32>
    %c0_11 = arith.constant 0 : index
    %c0_12 = arith.constant 0 : index
    %7 = vector.load %arg6[%c0_11, %c0_12] : memref<1x8xf32, #tpu.memory_space<vmem>>, vector<1x8xf32>
    %8 = vector.shape_cast %7 : vector<1x8xf32> to vector<1x1x8xf32>
    %cst = arith.constant 0.000000e+00 : f32
    %9 = vector.broadcast %cst : f32 to vector<16x16x4xf32>
    %10 = vector.extract_strided_slice %6 {offsets = [0, 0, 0], sizes = [16, 16, 4], strides = [1, 1, 1]} : vector<18x16x4xf32> to vector<16x16x4xf32>
    %cst_13 = arith.constant 0.000000e+00 : f32
    %11 = vector.broadcast %cst_13 : f32 to vector<16x1x4xf32>
    %12 = vector.extract_strided_slice %10 {offsets = [0, 0, 0], sizes = [16, 15, 4], strides = [1, 1, 1]} : vector<16x16x4xf32> to vector<16x15x4xf32>
    %13 = tpu.concatenate %11, %12 in 1 : vector<16x1x4xf32>, vector<16x15x4xf32> -> vector<16x16x4xf32>
    %c0_14 = arith.constant 0 : index
    %c0_15 = arith.constant 0 : index
    %c0_16 = arith.constant 0 : index
    %14 = vector.load %arg5[%c0_14, %c0_15, %c0_16] : memref<16x4x4xf32, #tpu.memory_space<vmem>>, vector<1x4x4xf32>
    %15 = vector.shape_cast %14 : vector<1x4x4xf32> to vector<4x4xf32>
    %cst_17 = arith.constant dense<0.000000e+00> : vector<16x16x4xf32>
    %16 = tpu.matmul %13, %15, %cst_17 {dimension_numbers = #tpu.dot_dimension_numbers<[2], [0], [0, 1], [1], [0, 0, 0, 1, 1, 1], [], []>} : vector<16x16x4xf32>, vector<4x4xf32>, vector<16x16x4xf32> -> vector<16x16x4xf32>
    %17 = arith.addf %9, %16 : vector<16x16x4xf32>
    %c1 = arith.constant 1 : index
    %c0_18 = arith.constant 0 : index
    %c0_19 = arith.constant 0 : index
    %18 = vector.load %arg5[%c1, %c0_18, %c0_19] : memref<16x4x4xf32, #tpu.memory_space<vmem>>, vector<1x4x4xf32>
    %19 = vector.shape_cast %18 : vector<1x4x4xf32> to vector<4x4xf32>
    %cst_20 = arith.constant dense<0.000000e+00> : vector<16x16x4xf32>
    %20 = tpu.matmul %10, %19, %cst_20 {dimension_numbers = #tpu.dot_dimension_numbers<[2], [0], [0, 1], [1], [0, 0, 0, 1, 1, 1], [], []>} : vector<16x16x4xf32>, vector<4x4xf32>, vector<16x16x4xf32> -> vector<16x16x4xf32>
    %21 = arith.addf %17, %20 : vector<16x16x4xf32>
    %22 = vector.extract_strided_slice %6 {offsets = [1, 0, 0], sizes = [16, 16, 4], strides = [1, 1, 1]} : vector<18x16x4xf32> to vector<16x16x4xf32>
    %cst_21 = arith.constant 0.000000e+00 : f32
    %23 = vector.broadcast %cst_21 : f32 to vector<16x1x4xf32>
    %24 = vector.extract_strided_slice %22 {offsets = [0, 0, 0], sizes = [16, 15, 4], strides = [1, 1, 1]} : vector<16x16x4xf32> to vector<16x15x4xf32>
    %25 = tpu.concatenate %23, %24 in 1 : vector<16x1x4xf32>, vector<16x15x4xf32> -> vector<16x16x4xf32>
    %c2 = arith.constant 2 : index
    %c0_22 = arith.constant 0 : index
    %c0_23 = arith.constant 0 : index
    %26 = vector.load %arg5[%c2, %c0_22, %c0_23] : memref<16x4x4xf32, #tpu.memory_space<vmem>>, vector<1x4x4xf32>
    %27 = vector.shape_cast %26 : vector<1x4x4xf32> to vector<4x4xf32>
    %cst_24 = arith.constant dense<0.000000e+00> : vector<16x16x4xf32>
    %28 = tpu.matmul %25, %27, %cst_24 {dimension_numbers = #tpu.dot_dimension_numbers<[2], [0], [0, 1], [1], [0, 0, 0, 1, 1, 1], [], []>} : vector<16x16x4xf32>, vector<4x4xf32>, vector<16x16x4xf32> -> vector<16x16x4xf32>
    %29 = arith.addf %21, %28 : vector<16x16x4xf32>
    %c3 = arith.constant 3 : index
    %c0_25 = arith.constant 0 : index
    %c0_26 = arith.constant 0 : index
    %30 = vector.load %arg5[%c3, %c0_25, %c0_26] : memref<16x4x4xf32, #tpu.memory_space<vmem>>, vector<1x4x4xf32>
    %31 = vector.shape_cast %30 : vector<1x4x4xf32> to vector<4x4xf32>
    %cst_27 = arith.constant dense<0.000000e+00> : vector<16x16x4xf32>
    %32 = tpu.matmul %22, %31, %cst_27 {dimension_numbers = #tpu.dot_dimension_numbers<[2], [0], [0, 1], [1], [0, 0, 0, 1, 1, 1], [], []>} : vector<16x16x4xf32>, vector<4x4xf32>, vector<16x16x4xf32> -> vector<16x16x4xf32>
    %33 = arith.addf %29, %32 : vector<16x16x4xf32>
    %cst_28 = arith.constant 0.000000e+00 : f32
    %34 = vector.broadcast %cst_28 : f32 to vector<16x16x4xf32>
    %35 = vector.extract_strided_slice %6 {offsets = [0, 0, 0], sizes = [16, 16, 4], strides = [1, 1, 1]} : vector<18x16x4xf32> to vector<16x16x4xf32>
    %c4 = arith.constant 4 : index
    %c0_29 = arith.constant 0 : index
    %c0_30 = arith.constant 0 : index
    %36 = vector.load %arg5[%c4, %c0_29, %c0_30] : memref<16x4x4xf32, #tpu.memory_space<vmem>>, vector<1x4x4xf32>
    %37 = vector.shape_cast %36 : vector<1x4x4xf32> to vector<4x4xf32>
    %cst_31 = arith.constant dense<0.000000e+00> : vector<16x16x4xf32>
    %38 = tpu.matmul %35, %37, %cst_31 {dimension_numbers = #tpu.dot_dimension_numbers<[2], [0], [0, 1], [1], [0, 0, 0, 1, 1, 1], [], []>} : vector<16x16x4xf32>, vector<4x4xf32>, vector<16x16x4xf32> -> vector<16x16x4xf32>
    %39 = arith.addf %34, %38 : vector<16x16x4xf32>
    %cst_32 = arith.constant 0.000000e+00 : f32
    %40 = vector.broadcast %cst_32 : f32 to vector<16x1x4xf32>
    %41 = vector.extract_strided_slice %35 {offsets = [0, 1, 0], sizes = [16, 15, 4], strides = [1, 1, 1]} : vector<16x16x4xf32> to vector<16x15x4xf32>
    %42 = tpu.concatenate %41, %40 in 1 : vector<16x15x4xf32>, vector<16x1x4xf32> -> vector<16x16x4xf32>
    %c5 = arith.constant 5 : index
    %c0_33 = arith.constant 0 : index
    %c0_34 = arith.constant 0 : index
    %43 = vector.load %arg5[%c5, %c0_33, %c0_34] : memref<16x4x4xf32, #tpu.memory_space<vmem>>, vector<1x4x4xf32>
    %44 = vector.shape_cast %43 : vector<1x4x4xf32> to vector<4x4xf32>
    %cst_35 = arith.constant dense<0.000000e+00> : vector<16x16x4xf32>
    %45 = tpu.matmul %42, %44, %cst_35 {dimension_numbers = #tpu.dot_dimension_numbers<[2], [0], [0, 1], [1], [0, 0, 0, 1, 1, 1], [], []>} : vector<16x16x4xf32>, vector<4x4xf32>, vector<16x16x4xf32> -> vector<16x16x4xf32>
    %46 = arith.addf %39, %45 : vector<16x16x4xf32>
    %47 = vector.extract_strided_slice %6 {offsets = [1, 0, 0], sizes = [16, 16, 4], strides = [1, 1, 1]} : vector<18x16x4xf32> to vector<16x16x4xf32>
    %c6 = arith.constant 6 : index
    %c0_36 = arith.constant 0 : index
    %c0_37 = arith.constant 0 : index
    %48 = vector.load %arg5[%c6, %c0_36, %c0_37] : memref<16x4x4xf32, #tpu.memory_space<vmem>>, vector<1x4x4xf32>
    %49 = vector.shape_cast %48 : vector<1x4x4xf32> to vector<4x4xf32>
    %cst_38 = arith.constant dense<0.000000e+00> : vector<16x16x4xf32>
    %50 = tpu.matmul %47, %49, %cst_38 {dimension_numbers = #tpu.dot_dimension_numbers<[2], [0], [0, 1], [1], [0, 0, 0, 1, 1, 1], [], []>} : vector<16x16x4xf32>, vector<4x4xf32>, vector<16x16x4xf32> -> vector<16x16x4xf32>
    %51 = arith.addf %46, %50 : vector<16x16x4xf32>
    %cst_39 = arith.constant 0.000000e+00 : f32
    %52 = vector.broadcast %cst_39 : f32 to vector<16x1x4xf32>
    %53 = vector.extract_strided_slice %47 {offsets = [0, 1, 0], sizes = [16, 15, 4], strides = [1, 1, 1]} : vector<16x16x4xf32> to vector<16x15x4xf32>
    %54 = tpu.concatenate %53, %52 in 1 : vector<16x15x4xf32>, vector<16x1x4xf32> -> vector<16x16x4xf32>
    %c7 = arith.constant 7 : index
    %c0_40 = arith.constant 0 : index
    %c0_41 = arith.constant 0 : index
    %55 = vector.load %arg5[%c7, %c0_40, %c0_41] : memref<16x4x4xf32, #tpu.memory_space<vmem>>, vector<1x4x4xf32>
    %56 = vector.shape_cast %55 : vector<1x4x4xf32> to vector<4x4xf32>
    %cst_42 = arith.constant dense<0.000000e+00> : vector<16x16x4xf32>
    %57 = tpu.matmul %54, %56, %cst_42 {dimension_numbers = #tpu.dot_dimension_numbers<[2], [0], [0, 1], [1], [0, 0, 0, 1, 1, 1], [], []>} : vector<16x16x4xf32>, vector<4x4xf32>, vector<16x16x4xf32> -> vector<16x16x4xf32>
    %58 = arith.addf %51, %57 : vector<16x16x4xf32>
    %59 = tpu.concatenate %33, %58 in 2 : vector<16x16x4xf32>, vector<16x16x4xf32> -> vector<16x16x8xf32>
    %60 = vector.broadcast %8 : vector<1x1x8xf32> to vector<16x16x8xf32>
    %61 = arith.addf %59, %60 : vector<16x16x8xf32>
    %c0_43 = arith.constant 0 : index
    %c0_44 = arith.constant 0 : index
    %c0_45 = arith.constant 0 : index
    %c0_46 = arith.constant 0 : index
    %c0_47 = arith.constant 0 : index
    %62 = vector.load %arg7[%c0_43, %c0_44, %c0_45, %c0_46, %c0_47] : memref<1x16x2x16x8xf32, #tpu.memory_space<vmem>>, vector<1x16x1x16x8xf32>
    %63 = vector.shape_cast %62 : vector<1x16x1x16x8xf32> to vector<16x16x8xf32>
    %64 = vector.shape_cast %61 : vector<16x16x8xf32> to vector<1x16x1x16x8xf32>
    tpu.vector_store %arg7[%c0_43, %c0_44, %c0_45, %c0_46, %c0_47], %64 {strides = array<i32>} : memref<1x16x2x16x8xf32, #tpu.memory_space<vmem>>, vector<1x16x1x16x8xf32>,
    %cst_48 = arith.constant 0.000000e+00 : f32
    %65 = vector.broadcast %cst_48 : f32 to vector<16x16x4xf32>
    %66 = vector.extract_strided_slice %6 {offsets = [1, 0, 0], sizes = [16, 16, 4], strides = [1, 1, 1]} : vector<18x16x4xf32> to vector<16x16x4xf32>
    %cst_49 = arith.constant 0.000000e+00 : f32
    %67 = vector.broadcast %cst_49 : f32 to vector<16x1x4xf32>
    %68 = vector.extract_strided_slice %66 {offsets = [0, 0, 0], sizes = [16, 15, 4], strides = [1, 1, 1]} : vector<16x16x4xf32> to vector<16x15x4xf32>
    %69 = tpu.concatenate %67, %68 in 1 : vector<16x1x4xf32>, vector<16x15x4xf32> -> vector<16x16x4xf32>
    %c8 = arith.constant 8 : index
    %c0_50 = arith.constant 0 : index
    %c0_51 = arith.constant 0 : index
    %70 = vector.load %arg5[%c8, %c0_50, %c0_51] : memref<16x4x4xf32, #tpu.memory_space<vmem>>, vector<1x4x4xf32>
    %71 = vector.shape_cast %70 : vector<1x4x4xf32> to vector<4x4xf32>
    %cst_52 = arith.constant dense<0.000000e+00> : vector<16x16x4xf32>
    %72 = tpu.matmul %69, %71, %cst_52 {dimension_numbers = #tpu.dot_dimension_numbers<[2], [0], [0, 1], [1], [0, 0, 0, 1, 1, 1], [], []>} : vector<16x16x4xf32>, vector<4x4xf32>, vector<16x16x4xf32> -> vector<16x16x4xf32>
    %73 = arith.addf %65, %72 : vector<16x16x4xf32>
    %c9 = arith.constant 9 : index
    %c0_53 = arith.constant 0 : index
    %c0_54 = arith.constant 0 : index
    %74 = vector.load %arg5[%c9, %c0_53, %c0_54] : memref<16x4x4xf32, #tpu.memory_space<vmem>>, vector<1x4x4xf32>
    %75 = vector.shape_cast %74 : vector<1x4x4xf32> to vector<4x4xf32>
    %cst_55 = arith.constant dense<0.000000e+00> : vector<16x16x4xf32>
    %76 = tpu.matmul %66, %75, %cst_55 {dimension_numbers = #tpu.dot_dimension_numbers<[2], [0], [0, 1], [1], [0, 0, 0, 1, 1, 1], [], []>} : vector<16x16x4xf32>, vector<4x4xf32>, vector<16x16x4xf32> -> vector<16x16x4xf32>
    %77 = arith.addf %73, %76 : vector<16x16x4xf32>
    %78 = vector.extract_strided_slice %6 {offsets = [2, 0, 0], sizes = [16, 16, 4], strides = [1, 1, 1]} : vector<18x16x4xf32> to vector<16x16x4xf32>
    %cst_56 = arith.constant 0.000000e+00 : f32
    %79 = vector.broadcast %cst_56 : f32 to vector<16x1x4xf32>
    %80 = vector.extract_strided_slice %78 {offsets = [0, 0, 0], sizes = [16, 15, 4], strides = [1, 1, 1]} : vector<16x16x4xf32> to vector<16x15x4xf32>
    %81 = tpu.concatenate %79, %80 in 1 : vector<16x1x4xf32>, vector<16x15x4xf32> -> vector<16x16x4xf32>
    %c10 = arith.constant 10 : index
    %c0_57 = arith.constant 0 : index
    %c0_58 = arith.constant 0 : index
    %82 = vector.load %arg5[%c10, %c0_57, %c0_58] : memref<16x4x4xf32, #tpu.memory_space<vmem>>, vector<1x4x4xf32>
    %83 = vector.shape_cast %82 : vector<1x4x4xf32> to vector<4x4xf32>
    %cst_59 = arith.constant dense<0.000000e+00> : vector<16x16x4xf32>
    %84 = tpu.matmul %81, %83, %cst_59 {dimension_numbers = #tpu.dot_dimension_numbers<[2], [0], [0, 1], [1], [0, 0, 0, 1, 1, 1], [], []>} : vector<16x16x4xf32>, vector<4x4xf32>, vector<16x16x4xf32> -> vector<16x16x4xf32>
    %85 = arith.addf %77, %84 : vector<16x16x4xf32>
    %c11 = arith.constant 11 : index
    %c0_60 = arith.constant 0 : index
    %c0_61 = arith.constant 0 : index
    %86 = vector.load %arg5[%c11, %c0_60, %c0_61] : memref<16x4x4xf32, #tpu.memory_space<vmem>>, vector<1x4x4xf32>
    %87 = vector.shape_cast %86 : vector<1x4x4xf32> to vector<4x4xf32>
    %cst_62 = arith.constant dense<0.000000e+00> : vector<16x16x4xf32>
    %88 = tpu.matmul %78, %87, %cst_62 {dimension_numbers = #tpu.dot_dimension_numbers<[2], [0], [0, 1], [1], [0, 0, 0, 1, 1, 1], [], []>} : vector<16x16x4xf32>, vector<4x4xf32>, vector<16x16x4xf32> -> vector<16x16x4xf32>
    %89 = arith.addf %85, %88 : vector<16x16x4xf32>
    %cst_63 = arith.constant 0.000000e+00 : f32
    %90 = vector.broadcast %cst_63 : f32 to vector<16x16x4xf32>
    %91 = vector.extract_strided_slice %6 {offsets = [1, 0, 0], sizes = [16, 16, 4], strides = [1, 1, 1]} : vector<18x16x4xf32> to vector<16x16x4xf32>
    %c12 = arith.constant 12 : index
    %c0_64 = arith.constant 0 : index
    %c0_65 = arith.constant 0 : index
    %92 = vector.load %arg5[%c12, %c0_64, %c0_65] : memref<16x4x4xf32, #tpu.memory_space<vmem>>, vector<1x4x4xf32>
    %93 = vector.shape_cast %92 : vector<1x4x4xf32> to vector<4x4xf32>
    %cst_66 = arith.constant dense<0.000000e+00> : vector<16x16x4xf32>
    %94 = tpu.matmul %91, %93, %cst_66 {dimension_numbers = #tpu.dot_dimension_numbers<[2], [0], [0, 1], [1], [0, 0, 0, 1, 1, 1], [], []>} : vector<16x16x4xf32>, vector<4x4xf32>, vector<16x16x4xf32> -> vector<16x16x4xf32>
    %95 = arith.addf %90, %94 : vector<16x16x4xf32>
    %cst_67 = arith.constant 0.000000e+00 : f32
    %96 = vector.broadcast %cst_67 : f32 to vector<16x1x4xf32>
    %97 = vector.extract_strided_slice %91 {offsets = [0, 1, 0], sizes = [16, 15, 4], strides = [1, 1, 1]} : vector<16x16x4xf32> to vector<16x15x4xf32>
    %98 = tpu.concatenate %97, %96 in 1 : vector<16x15x4xf32>, vector<16x1x4xf32> -> vector<16x16x4xf32>
    %c13 = arith.constant 13 : index
    %c0_68 = arith.constant 0 : index
    %c0_69 = arith.constant 0 : index
    %99 = vector.load %arg5[%c13, %c0_68, %c0_69] : memref<16x4x4xf32, #tpu.memory_space<vmem>>, vector<1x4x4xf32>
    %100 = vector.shape_cast %99 : vector<1x4x4xf32> to vector<4x4xf32>
    %cst_70 = arith.constant dense<0.000000e+00> : vector<16x16x4xf32>
    %101 = tpu.matmul %98, %100, %cst_70 {dimension_numbers = #tpu.dot_dimension_numbers<[2], [0], [0, 1], [1], [0, 0, 0, 1, 1, 1], [], []>} : vector<16x16x4xf32>, vector<4x4xf32>, vector<16x16x4xf32> -> vector<16x16x4xf32>
    %102 = arith.addf %95, %101 : vector<16x16x4xf32>
    %103 = vector.extract_strided_slice %6 {offsets = [2, 0, 0], sizes = [16, 16, 4], strides = [1, 1, 1]} : vector<18x16x4xf32> to vector<16x16x4xf32>
    %c14 = arith.constant 14 : index
    %c0_71 = arith.constant 0 : index
    %c0_72 = arith.constant 0 : index
    %104 = vector.load %arg5[%c14, %c0_71, %c0_72] : memref<16x4x4xf32, #tpu.memory_space<vmem>>, vector<1x4x4xf32>
    %105 = vector.shape_cast %104 : vector<1x4x4xf32> to vector<4x4xf32>
    %cst_73 = arith.constant dense<0.000000e+00> : vector<16x16x4xf32>
    %106 = tpu.matmul %103, %105, %cst_73 {dimension_numbers = #tpu.dot_dimension_numbers<[2], [0], [0, 1], [1], [0, 0, 0, 1, 1, 1], [], []>} : vector<16x16x4xf32>, vector<4x4xf32>, vector<16x16x4xf32> -> vector<16x16x4xf32>
    %107 = arith.addf %102, %106 : vector<16x16x4xf32>
    %cst_74 = arith.constant 0.000000e+00 : f32
    %108 = vector.broadcast %cst_74 : f32 to vector<16x1x4xf32>
    %109 = vector.extract_strided_slice %103 {offsets = [0, 1, 0], sizes = [16, 15, 4], strides = [1, 1, 1]} : vector<16x16x4xf32> to vector<16x15x4xf32>
    %110 = tpu.concatenate %109, %108 in 1 : vector<16x15x4xf32>, vector<16x1x4xf32> -> vector<16x16x4xf32>
    %c15 = arith.constant 15 : index
    %c0_75 = arith.constant 0 : index
    %c0_76 = arith.constant 0 : index
    %111 = vector.load %arg5[%c15, %c0_75, %c0_76] : memref<16x4x4xf32, #tpu.memory_space<vmem>>, vector<1x4x4xf32>
    %112 = vector.shape_cast %111 : vector<1x4x4xf32> to vector<4x4xf32>
    %cst_77 = arith.constant dense<0.000000e+00> : vector<16x16x4xf32>
    %113 = tpu.matmul %110, %112, %cst_77 {dimension_numbers = #tpu.dot_dimension_numbers<[2], [0], [0, 1], [1], [0, 0, 0, 1, 1, 1], [], []>} : vector<16x16x4xf32>, vector<4x4xf32>, vector<16x16x4xf32> -> vector<16x16x4xf32>
    %114 = arith.addf %107, %113 : vector<16x16x4xf32>
    %115 = tpu.concatenate %89, %114 in 2 : vector<16x16x4xf32>, vector<16x16x4xf32> -> vector<16x16x8xf32>
    %116 = vector.broadcast %8 : vector<1x1x8xf32> to vector<16x16x8xf32>
    %117 = arith.addf %115, %116 : vector<16x16x8xf32>
    %c0_78 = arith.constant 0 : index
    %c0_79 = arith.constant 0 : index
    %c1_80 = arith.constant 1 : index
    %c0_81 = arith.constant 0 : index
    %c0_82 = arith.constant 0 : index
    %118 = vector.load %arg7[%c0_78, %c0_79, %c1_80, %c0_81, %c0_82] : memref<1x16x2x16x8xf32, #tpu.memory_space<vmem>>, vector<1x16x1x16x8xf32>
    %119 = vector.shape_cast %118 : vector<1x16x1x16x8xf32> to vector<16x16x8xf32>
    %120 = vector.shape_cast %117 : vector<16x16x8xf32> to vector<1x16x1x16x8xf32>
    tpu.vector_store %arg7[%c0_78, %c0_79, %c1_80, %c0_81, %c0_82], %120 {strides = array<i32>} : memref<1x16x2x16x8xf32, #tpu.memory_space<vmem>>, vector<1x16x1x16x8xf32>,
    return
  }
  func.func @transform_0(%arg0: i32, %arg1: i32) -> (i32, i32, i32, i32) {
    %c0_i32 = arith.constant 0 : i32
    %c0_i32_0 = arith.constant 0 : i32
    %c0_i32_1 = arith.constant 0 : i32
    return %arg0, %arg1, %c0_i32, %c0_i32_0 : i32, i32, i32, i32
  }
  func.func @transform_1(%arg0: i32, %arg1: i32) -> (i32, i32, i32, i32) {
    %c0_i32 = arith.constant 0 : i32
    %c0_i32_0 = arith.constant 0 : i32
    %c0_i32_1 = arith.constant 0 : i32
    return %arg0, %arg1, %c0_i32, %c0_i32_0 : i32, i32, i32, i32
  }
  func.func @transform_2(%arg0: i32, %arg1: i32) -> (i32, i32, i32, i32) {
    %c0_i32 = arith.constant 0 : i32
    %c0_i32_0 = arith.constant 0 : i32
    %c0_i32_1 = arith.constant 0 : i32
    return %arg0, %arg1, %c0_i32, %c0_i32_0 : i32, i32, i32, i32
  }
  func.func @transform_3(%arg0: i32, %arg1: i32) -> (i32, i32, i32) {
    %c0_i32 = arith.constant 0 : i32
    %c0_i32_0 = arith.constant 0 : i32
    %c0_i32_1 = arith.constant 0 : i32
    %c0_i32_2 = arith.constant 0 : i32
    return %c0_i32, %c0_i32_0, %c0_i32_1 : i32, i32, i32
  }
  func.func @transform_4(%arg0: i32, %arg1: i32) -> (i32, i32) {
    %c0_i32 = arith.constant 0 : i32
    %c0_i32_0 = arith.constant 0 : i32
    %c0_i32_1 = arith.constant 0 : i32
    return %c0_i32, %c0_i32_0 : i32, i32
  }
  func.func @transform_5(%arg0: i32, %arg1: i32) -> (i32, i32, i32, i32, i32) {
    %c0_i32 = arith.constant 0 : i32
    %c0_i32_0 = arith.constant 0 : i32
    %c0_i32_1 = arith.constant 0 : i32
    %c0_i32_2 = arith.constant 0 : i32
    return %arg0, %arg1, %c0_i32, %c0_i32_0, %c0_i32_1 : i32, i32, i32, i32, i32
  }
}

</mosaic_0001>

<bundles_post_ra>
// kernel: upsample_forward.1
= control target key start
LH: loop header
LB: loop body
LE: loop exit
PB: predicated region body
PF: predicated region fallthrough
CT: control target
= control target key end

     0   :  { %s4291_s18 = smov 0   ;;  %s4293_s19 = smov 0   ;;  %s6417_s0 = inlined_call_operand.vmem [shape: f32[2,16,16,4], index: 0, kind: input, shape index: {}]   ;;  %s6418_s1 = inlined_call_operand.vmem [shape: f32[2,1,16,4], index: 1, kind: input, shape index: {}, may-alias: {1,2}]   ;;  %s6419_s2 = inlined_call_operand.vmem [shape: f32[2,1,16,4], index: 2, kind: input, shape index: {}, may-alias: {1,2}]   ;;  %s6420_s3 = inlined_call_operand.vmem [shape: f32[16,4,4], index: 3, kind: input, shape index: {}]   ;;  %s6421_s4 = inlined_call_operand.vmem [shape: f32[1,8], index: 4, kind: input, shape index: {}]   ;;  %s6422_s5 = inlined_call_operand.vmem [shape: f32[2,16,2,16,8], index: 5, kind: output, shape index: {}]  }
   0x1   :  { %s4295_s20 = smov 0  }
   0x2 LB: > { %s27_s21 = sadd.s32 1, %s4254_s19  ;;  %p3584_p0 = scmp.ge.s32.totalorder %s4258_s20, 1  ;;  %s4258_s20 = sphi %s4295_s20, %s15_s20   ;;  %s4254_s19 = sphi %s4293_s19, %s6642_s19   ;;  %s4250_s18 = sphi %s4291_s18, %s6641_s18  }
   0x3   : > { %p29_p1 = scmp.ge.s32.totalorder %s27_s21, 2  ;;  %p241_p2 = scmp.lt.s32.totalorder %s4258_s20, 3 }
   0x5   : > { %s6644_s21 = smov (%p29_p1, %s27_s21), 0  ;;  %p242_p3 = pnand %p3584_p0, %p241_p2 }
   0x7   : > { %245 = sbr.rel (%p242_p3) target bundleno = 1292 (0x50c), region = 40 }
   0xc   : > { %vm555_vm0 = vcmask 1043456   ;;  %v3660_v0 = vld [vmem:[%s6420_s3 + $0x8] sm:$0xf]  ;;  %p298_p4 = scmp.lt.s32.totalorder %s4250_s18, 1  ;;  %v3796_v1 = vld [vmem:[%s6420_s3 + $0x18] sm:$0xf] }
   0xd   : > { %3661 = vmatpush.msk.msra.mxu2 %vm555_vm0, %v3660_v0  ;;  %v3694_v2 = vld [vmem:[%s6420_s3 + $0xc] sm:$0xf]  ;;  %v3830_v3 = vld [vmem:[%s6420_s3 + $0x1c] sm:$0xf]  ;;  %v3593_v4 = vld [vmem:[%s6420_s3 + $0x4] sm:$0xf] }
   0xe   : > { %s6646_s18 = smov (!%p298_p4, %s4250_s18), 1  ;;  %3695 = vmatpush.msk.msra.mxu3 %vm555_vm0, %v3694_v2  ;;  %v487_v5 = vld [vmem:[%s6420_s3] sm:$0xf]  ;;  %3594 = vmatpush.msk.msra.mxu0 %vm555_vm0, %v3593_v4  ;;  %v3729_v6 = vld [vmem:[%s6420_s3 + $0x14] sm:$0xf]  ;;  %vm406_vm1 = vcmask 1040384  }
   0xf   : > { %3797 = vmatpush.msk.msrb.mxu2 %vm555_vm0, %v3796_v1  ;;  %v3728_v7 = vld [vmem:[%s6420_s3 + $0x10] sm:$0xf]  ;;  %s4170_s13 = sshll.u32 %s6646_s18, 8  ;;  %3627 = vmatpush.msk.msra.mxu1 %vm555_vm0, %v487_v5  ;;  %vm490_vm2 = vcmask 31744   ;;  %s4171_s17 = sshll.u32 %s6646_s18, 4  ;;  %vm1186_vm3 = vcmask 1046528  }
  0x10   : > { %3831 = vmatpush.msk.msrb.mxu3 %vm555_vm0, %v3830_v3  ;;  %3730 = vmatpush.msk.msrb.mxu0 %vm555_vm0, %v3729_v6  ;;  %s4346_s16 = scalar_lea.vmem %s6417_s0, %s4170_s13  ;;  %s316_s24 = scalar_lea.vmem %s6418_s1, %s4171_s17  ;;  %vm2086_vm4 = vcmask 64512  }
  0x11   : > { %3763 = vmatpush.msk.msrb.mxu1 %vm555_vm0, %v3728_v7  ;;  %v4350_v8 = vld [vmem:[%s4346_s16] sm:$0xff]  ;;  %v4364_v11 = vld [vmem:[%s4346_s16 + $0x8] sm:$0xff]  ;;  %v4386_v19 = vld [vmem:[%s4346_s16 + $0x10] sm:$0xff]  ;;  %s4260_s8 = smov 4   ;;  %s4173_s23 = sshll.u32 %s6646_s18, 9 }
  0x12   : > { %v410_v9 = vrot.slane %v4350_v8, 7  ;;  %3696 = vmatmul.msk.f32.vlgmr.msra.gmra.mxu3 %vm490_vm2, %v4350_v8  ;;  %v4361_v10 = vld [vmem:[%s316_s24] sm:$0xff]  ;;  %v4374_v14 = vld [vmem:[%s316_s24 + $0x8] sm:$0xff]  ;;  %v411_v16 = vrot.slane %v4364_v11, 7  ;;  %v413_v21 = vrot.slane %v4386_v19, 7  ;;  %v4401_v23 = vld [vmem:[%s4346_s16 + $0x18] sm:$0xff]  ;;  %s5347_s28 = scalar_lea.vmem %s6422_s5, %s4173_s23  ;;  %s325_s6 = scalar_lea.vmem %s6419_s2, %s4171_s17 }
  0x13   : > { %3595 = vmatmul.msk.f32.vlgmr.msra.gmra.mxu0 %vm490_vm2, %v4361_v10  ;;  %v407_v13 = vrot.slane %v4361_v10, 7  ;;  %v408_v17 = vrot.slane %v4374_v14, 7  ;;  %v414_v24 = vrot.slane %v4401_v23, 7  ;;  %v4416_v26 = vld [vmem:[%s4346_s16 + $0x20] sm:$0xff]  ;;  %v4431_v29 = vld [vmem:[%s4346_s16 + $0x28] sm:$0xff]  ;;  %v4446_v32 = vld [vmem:[%s4346_s16 + $0x30] sm:$0xff] }
  0x14   : > { %v4367_v12 = vsel %vm406_vm1, 0.0, %v410_v9  ;;  %v4381_v18 = vsel %vm406_vm1, %v410_v9, %v411_v16  ;;  %v4396_v22 = vsel %vm406_vm1, 0.0, %v413_v21  ;;  %v416_v27 = vrot.slane %v4416_v26, 7  ;;  %v4461_v35 = vld [vmem:[%s4346_s16 + $0x38] sm:$0xff]  ;;  %v4476_v38 = vld [vmem:[%s4346_s16 + $0x40] sm:$0xff]  ;;  %v4491_v41 = vld [vmem:[%s4346_s16 + $0x48] sm:$0xff] }
  0x15   : > { %3662 = vmatmul.msk.f32.vlgmr.msra.gmra.mxu2 %vm490_vm2, %v4367_v12  ;;  %v471_v15 = vsel %vm406_vm1, 0.0, %v407_v13  ;;  %v409_v20 = vsel %vm406_vm1, %v407_v13, %v408_v17  ;;  %v4411_v25 = vsel %vm406_vm1, %v413_v21, %v414_v24  ;;  %v417_v30 = vrot.slane %v4431_v29, 7  ;;  %v4506_v44 = vld [vmem:[%s4346_s16 + $0x50] sm:$0xff]  ;;  %v4521_v47 = vld [vmem:[%s4346_s16 + $0x58] sm:$0xff]  ;;  %v4536_v50 = vld [vmem:[%s4346_s16 + $0x60] sm:$0xff] }
  0x16   : > { %3628 = vmatmul.msk.f32.vlgmr.msra.gmra.mxu1 %vm490_vm2, %v471_v15  ;;  %v4426_v28 = vsel %vm406_vm1, 0.0, %v416_v27  ;;  %v419_v33 = vrot.slane %v4446_v32, 7  ;;  %v420_v36 = vrot.slane %v4461_v35, 7  ;;  %v422_v39 = vrot.slane %v4476_v38, 7  ;;  %v4551_v53 = vld [vmem:[%s4346_s16 + $0x68] sm:$0xff]  ;;  %v4566_v56 = vld [vmem:[%s4346_s16 + $0x70] sm:$0xff] }
  0x17   : > { %v4441_v31 = vsel %vm406_vm1, %v416_v27, %v417_v30  ;;  %v423_v42 = vrot.slane %v4491_v41, 7  ;;  %v425_v45 = vrot.slane %v4506_v44, 7  ;;  %v426_v48 = vrot.slane %v4521_v47, 7  ;;  %v4581_v59 = vld [vmem:[%s4346_s16 + $0x78] sm:$0xff]  ;;  %v4596_v62 = vld [vmem:[%s4346_s16 + $0x80] sm:$0xff]  ;;  %v4611_v2 = vld [vmem:[%s4346_s16 + $0x88] sm:$0xff] }
  0x18   : > { %v4456_v34 = vsel %vm406_vm1, 0.0, %v419_v33  ;;  %v4471_v37 = vsel %vm406_vm1, %v419_v33, %v420_v36  ;;  %v4486_v40 = vsel %vm406_vm1, 0.0, %v422_v39  ;;  %v428_v51 = vrot.slane %v4536_v50, 7  ;;  %v4628_v17 = vld [vmem:[%s4346_s16 + $0x90] sm:$0xff] }
  0x19   : > { %6507 = vst [vmem:[#allocation2_spill] sm:$0xff] %v4471_v37  ;;  %v4501_v43 = vsel %vm406_vm1, %v422_v39, %v423_v42  ;;  %v4516_v46 = vsel %vm406_vm1, 0.0, %v425_v45  ;;  %v4531_v49 = vsel %vm406_vm1, %v425_v45, %v426_v48  ;;  %v429_v54 = vrot.slane %v4551_v53, 7  ;;  %v4645_v45 = vld [vmem:[%s4346_s16 + $0x98] sm:$0xff] }
  0x1a   : > { %3697 = vmatmul.msk.f32.gmra.mxu3 %vm490_vm2, %v4364_v11  ;;  %6508 = vst [vmem:[#allocation3_spill] sm:$0xff] %v4486_v40  ;;  %v4546_v52 = vsel %vm406_vm1, 0.0, %v428_v51  ;;  %v431_v57 = vrot.slane %v4566_v56, 7  ;;  %v432_v60 = vrot.slane %v4581_v59, 7  ;;  %v434_v63 = vrot.slane %v4596_v62, 7 }
  0x1b   : > { %3596 = vmatmul.msk.f32.gmra.mxu0 %vm490_vm2, %v4374_v14  ;;  %6509 = vst [vmem:[#allocation4_spill] sm:$0xff] %v4501_v43  ;;  %v4561_v55 = vsel %vm406_vm1, %v428_v51, %v429_v54  ;;  %v435_v6 = vrot.slane %v4611_v2, 7  ;;  %v437_v27 = vrot.slane %v4628_v17, 7 }
  0x1c   : > { %6510 = vst [vmem:[#allocation5_spill] sm:$0xff] %v4516_v46  ;;  %v4576_v58 = vsel %vm406_vm1, 0.0, %v431_v57  ;;  %v4591_v61 = vsel %vm406_vm1, %v431_v57, %v432_v60  ;;  %v4606_v1 = vsel %vm406_vm1, 0.0, %v434_v63  ;;  %v438_v57 = vrot.slane %v4645_v45, 7 }
  0x1d   : > { %3663 = vmatmul.msk.f32.gmra.mxu2 %vm490_vm2, %v4381_v18  ;;  %6511 = vst [vmem:[#allocation6_spill] sm:$0xff] %v4531_v49  ;;  %v4621_v15 = vsel %vm406_vm1, %v434_v63, %v435_v6  ;;  %v4638_v39 = vsel %vm406_vm1, 0.0, %v437_v27 }
  0x1e   : > { %3629 = vmatmul.msk.f32.gmra.mxu1 %vm490_vm2, %v409_v20  ;;  %6512 = vst [vmem:[#allocation7_spill] sm:$0xff] %v4546_v52 }
  0x1f   : > { %6513 = vst [vmem:[#allocation8_spill] sm:$0xff] %v4561_v55 }
  0x20   : > { %6514 = vst [vmem:[#allocation9_spill] sm:$0xff] %v4576_v58 }
  0x21   : > { %6515 = vst [vmem:[#allocation10_spill] sm:$0xff] %v4591_v61 }
  0x22   : > { %3698 = vmatmul.msk.f32.gmra.mxu3 %vm490_vm2, %v4386_v19  ;;  %6516 = vst [vmem:[#allocation11_spill] sm:$0xff] %v4606_v1 }
  0x23   : > { %3597 = vmatmul.msk.f32.gmra.mxu0 %vm490_vm2, %v4350_v8  ;;  %6517 = vst [vmem:[#allocation12_spill] sm:$0xff] %v4621_v15 }
  0x24   : > { %6518 = vst [vmem:[#allocation13_spill] sm:$0xff] %v4638_v39 }
  0x25   : > { %3664 = vmatmul.msk.f32.gmra.mxu2 %vm490_vm2, %v4396_v22 }
  0x26   : > { %3630 = vmatmul.msk.f32.gmra.mxu1 %vm490_vm2, %v4367_v12 }
  0x2a   : > { %3699 = vmatmul.msk.f32.gmra.mxu3 %vm490_vm2, %v4401_v23 }
  0x2b   : > { %3598 = vmatmul.msk.f32.gmra.mxu0 %vm490_vm2, %v4364_v11 }
  0x2d   : > { %3665 = vmatmul.msk.f32.gmra.mxu2 %vm490_vm2, %v4411_v25 }
  0x2e   : > { %3631 = vmatmul.msk.f32.gmra.mxu1 %vm490_vm2, %v4381_v18 }
  0x32   : > { %3700 = vmatmul.msk.f32.gmra.mxu3 %vm490_vm2, %v4416_v26 }
  0x33   : > { %3599 = vmatmul.msk.f32.gmra.mxu0 %vm490_vm2, %v4386_v19 }
  0x35   : > { %3666 = vmatmul.msk.f32.gmra.mxu2 %vm490_vm2, %v4426_v28 }
  0x36   : > { %3632 = vmatmul.msk.f32.gmra.mxu1 %vm490_vm2, %v4396_v22 }
  0x3a   : > { %3701 = vmatmul.msk.f32.gmra.mxu3 %vm490_vm2, %v4431_v29 }
  0x3b   : > { %3600 = vmatmul.msk.f32.gmra.mxu0 %vm490_vm2, %v4401_v23 }
  0x3d   : > { %3667 = vmatmul.msk.f32.gmra.mxu2 %vm490_vm2, %v4441_v31 }
  0x3e   : > { %3633 = vmatmul.msk.f32.gmra.mxu1 %vm490_vm2, %v4411_v25 }
  0x42   : > { %3702 = vmatmul.msk.f32.gmra.mxu3 %vm490_vm2, %v4446_v32 }
  0x43   : > { %3601 = vmatmul.msk.f32.gmra.mxu0 %vm490_vm2, %v4416_v26 }
  0x45   : > { %3668 = vmatmul.msk.f32.gmra.mxu2 %vm490_vm2, %v4456_v34 }
  0x46   : > { %3634 = vmatmul.msk.f32.gmra.mxu1 %vm490_vm2, %v4426_v28 }
  0x4a   : > { %3703 = vmatmul.msk.f32.gmra.mxu3 %vm490_vm2, %v4461_v35 }
  0x4b   : > { %3602 = vmatmul.msk.f32.gmra.mxu0 %vm490_vm2, %v4431_v29 }
  0x4d   : > { %3669 = vmatmul.msk.f32.gmra.mxu2 %vm490_vm2, %v4471_v37 }
  0x4e   : > { %3635 = vmatmul.msk.f32.gmra.mxu1 %vm490_vm2, %v4441_v31 }
  0x52   : > { %3704 = vmatmul.msk.f32.gmra.mxu3 %vm490_vm2, %v4476_v38 }
  0x53   : > { %3603 = vmatmul.msk.f32.gmra.mxu0 %vm490_vm2, %v4446_v32 }
  0x55   : > { %3670 = vmatmul.msk.f32.gmra.mxu2 %vm490_vm2, %v4486_v40 }
  0x56   : > { %3636 = vmatmul.msk.f32.gmra.mxu1 %vm490_vm2, %v4456_v34 }
  0x5a   : > { %3705 = vmatmul.msk.f32.gmra.mxu3 %vm490_vm2, %v4491_v41 }
  0x5b   : > { %3604 = vmatmul.msk.f32.gmra.mxu0 %vm490_vm2, %v4461_v35 }
  0x5d   : > { %3671 = vmatmul.msk.f32.gmra.mxu2 %vm490_vm2, %v4501_v43 }
  0x5e   : > { %3637 = vmatmul.msk.f32.gmra.mxu1 %vm490_vm2, %v4471_v37 }
  0x62   : > { %3706 = vmatmul.msk.f32.gmra.mxu3 %vm490_vm2, %v4506_v44 }
  0x63   : > { %3605 = vmatmul.msk.f32.gmra.mxu0 %vm490_vm2, %v4476_v38 }
  0x65   : > { %3672 = vmatmul.msk.f32.gmra.mxu2 %vm490_vm2, %v4516_v46 }
  0x66   : > { %3638 = vmatmul.msk.f32.gmra.mxu1 %vm490_vm2, %v4486_v40 }
  0x6a   : > { %3707 = vmatmul.msk.f32.gmra.mxu3 %vm490_vm2, %v4521_v47 }
  0x6b   : > { %3606 = vmatmul.msk.f32.gmra.mxu0 %vm490_vm2, %v4491_v41 }
  0x6d   : > { %3673 = vmatmul.msk.f32.gmra.mxu2 %vm490_vm2, %v4531_v49 }
  0x6e   : > { %3639 = vmatmul.msk.f32.gmra.mxu1 %vm490_vm2, %v4501_v43  ;;  %v3864_v43 = vld [vmem:[%s6420_s3 + $0x20] sm:$0xf] }
  0x6f   : > { %3899 = vmatpush.msk.msra.mxu1 %vm555_vm0, %v3864_v43 }
  0x72   : > { %3708 = vmatmul.msk.f32.gmra.mxu3 %vm490_vm2, %v4536_v50 }
  0x73   : > { %3607 = vmatmul.msk.f32.gmra.mxu0 %vm490_vm2, %v4506_v44 }
  0x75   : > { %3674 = vmatmul.msk.f32.gmra.mxu2 %vm490_vm2, %v4546_v52 }
  0x76   : > { %3640 = vmatmul.msk.f32.gmra.mxu1 %vm490_vm2, %v4516_v46  ;;  %v4798_v46 = vld [vmem:[%s4346_s16 + $0xe0] sm:$0xff] }
  0x7a   : > { %3709 = vmatmul.msk.f32.gmra.mxu3 %vm490_vm2, %v4551_v53 }
  0x7b   : > { %3608 = vmatmul.msk.f32.gmra.mxu0 %vm490_vm2, %v4521_v47 }
  0x7d   : > { %3675 = vmatmul.msk.f32.gmra.mxu2 %vm490_vm2, %v4561_v55 }
  0x7e   : > { %3641 = vmatmul.msk.f32.gmra.mxu1 %vm490_vm2, %v4531_v49 }
  0x82   : > { %3710 = vmatmul.msk.f32.gmra.mxu3 %vm490_vm2, %v4566_v56 }
  0x83   : > { %3609 = vmatmul.msk.f32.gmra.mxu0 %vm490_vm2, %v4536_v50 }
  0x85   : > { %3676 = vmatmul.msk.f32.gmra.mxu2 %vm490_vm2, %v4576_v58 }
  0x86   : > { %3642 = vmatmul.msk.f32.gmra.mxu1 %vm490_vm2, %v4546_v52  ;;  %v4781_v52 = vld [vmem:[%s4346_s16 + $0xd8] sm:$0xff] }
  0x8a   : > { %3711 = vmatmul.msk.f32.gmra.mxu3 %vm490_vm2, %v4581_v59 }
  0x8b   : > { %3610 = vmatmul.msk.f32.gmra.mxu0 %vm490_vm2, %v4551_v53 }
  0x8d   : > { %3677 = vmatmul.msk.f32.gmra.mxu2 %vm490_vm2, %v4591_v61 }
  0x8e   : > { %3643 = vmatmul.msk.f32.gmra.mxu1 %vm490_vm2, %v4561_v55  ;;  %v4764_v55 = vld [vmem:[%s4346_s16 + $0xd0] sm:$0xff] }
  0x90   : > { %v576_v0 = vpop.f32.mrf.mxu0 }
  0x92   : > { %3712 = vmatmul.msk.f32.gmra.mxu3 %vm490_vm2, %v4596_v62 }
  0x93   : > { %v772_v3 = vpop.f32.mrf.mxu1  ;;  %3611 = vmatmul.msk.f32.gmra.mxu0 %vm490_vm2, %v4566_v56 }
  0x94   : > { %v773_v4 = vadd.f32 %v772_v3, %v576_v0  ;;  %v4655_v3 = vsel %vm406_vm1, %v437_v27, %v438_v57 }
  0x95   : > { %3678 = vmatmul.msk.f32.gmra.mxu2 %vm490_vm2, %v4606_v1  ;;  %v1056_v5 = vpop.f32.mrf.mxu3  ;;  %6519 = vst [vmem:[#allocation14_spill] sm:$0xff] %v4655_v3 }
  0x96   : > { %3644 = vmatmul.msk.f32.gmra.mxu1 %vm490_vm2, %v4576_v58 }
  0x98   : > { %v902_v7 = vpop.f32.mrf.mxu2  ;;  %v579_v13 = vpop.f32.mrf.mxu0 }
  0x99   : > { %v998_v9 = vadd.f32 %v902_v7, %v773_v4 }
  0x9a   : > { %3713 = vmatmul.msk.f32.gmra.mxu3 %vm490_vm2, %v4611_v2 }
  0x9b   : > { %v4625_v16 = vadd.f32 %v1056_v5, %v998_v9  ;;  %v775_v20 = vpop.f32.mrf.mxu1  ;;  %3612 = vmatmul.msk.f32.gmra.mxu0 %vm490_vm2, %v4581_v59  ;;  %v4662_v5 = vld [vmem:[%s4346_s16 + $0xa0] sm:$0xff] }
  0x9c   : > { %v776_v21 = vadd.f32 %v775_v20, %v579_v13  ;;  %v440_v13 = vrot.slane %v4662_v5, 7 }
  0x9d   : > { %3679 = vmatmul.msk.f32.gmra.mxu2 %vm490_vm2, %v4621_v15  ;;  %v1059_v24 = vpop.f32.mrf.mxu3 }
  0x9e   : > { %3645 = vmatmul.msk.f32.gmra.mxu1 %vm490_vm2, %v4591_v61  ;;  %v4672_v27 = vsel %vm406_vm1, 0.0, %v440_v13 }
  0x9f   : > { %6520 = vst [vmem:[#allocation15_spill] sm:$0xff] %v4672_v27 }
  0xa0   : > { %v905_v30 = vpop.f32.mrf.mxu2  ;;  %v582_v36 = vpop.f32.mrf.mxu0 }
  0xa1   : > { %v999_v33 = vadd.f32 %v905_v30, %v776_v21 }
  0xa2   : > { %3714 = vmatmul.msk.f32.gmra.mxu3 %vm490_vm2, %v4628_v17 }
  0xa3   : > { %v4642_v42 = vadd.f32 %v1059_v24, %v999_v33  ;;  %v778_v48 = vpop.f32.mrf.mxu1  ;;  %3613 = vmatmul.msk.f32.gmra.mxu0 %vm490_vm2, %v4596_v62  ;;  %v4679_v33 = vld [vmem:[%s4346_s16 + $0xa8] sm:$0xff] }
  0xa4   : > { %v779_v51 = vadd.f32 %v778_v48, %v582_v36 }
  0xa5   : > { %3680 = vmatmul.msk.f32.gmra.mxu2 %vm490_vm2, %v4638_v39  ;;  %v1062_v54 = vpop.f32.mrf.mxu3 }
  0xa6   : > { %3646 = vmatmul.msk.f32.gmra.mxu1 %vm490_vm2, %v4606_v1  ;;  %v4747_v1 = vld [vmem:[%s4346_s16 + $0xc8] sm:$0xff] }
  0xa8   : > { %v908_v60 = vpop.f32.mrf.mxu2  ;;  %v585_v0 = vpop.f32.mrf.mxu0 }
  0xa9   : > { %v1000_v63 = vadd.f32 %v908_v60, %v779_v51 }
  0xaa   : > { %3715 = vmatmul.msk.f32.gmra.mxu3 %vm490_vm2, %v4645_v45 }
  0xab   : > { %v4659_v4 = vadd.f32 %v1062_v54, %v1000_v63  ;;  %v781_v6 = vpop.f32.mrf.mxu1  ;;  %3614 = vmatmul.msk.f32.gmra.mxu0 %vm490_vm2, %v4611_v2  ;;  %v441_v54 = vrot.slane %v4679_v33, 7 }
  0xac   : > { %v782_v7 = vadd.f32 %v781_v6, %v585_v0 }
  0xad   : > { %3681 = vmatmul.msk.f32.gmra.mxu2 %vm490_vm2, %v4655_v3  ;;  %v1065_v9 = vpop.f32.mrf.mxu3  ;;  %v4689_v0 = vsel %vm406_vm1, %v440_v13, %v441_v54 }
  0xae   : > { %3647 = vmatmul.msk.f32.gmra.mxu1 %vm490_vm2, %v4621_v15  ;;  %6521 = vst [vmem:[#allocation16_spill] sm:$0xff] %v4689_v0  ;;  %v4730_v15 = vld [vmem:[%s4346_s16 + $0xc0] sm:$0xff] }
  0xb0   : > { %v911_v20 = vpop.f32.mrf.mxu2  ;;  %v588_v24 = vpop.f32.mrf.mxu0 }
  0xb1   : > { %v1001_v21 = vadd.f32 %v911_v20, %v782_v7  ;;  %v4696_v7 = vld [vmem:[%s4346_s16 + $0xb0] sm:$0xff] }
  0xb2   : > { %3716 = vmatmul.msk.f32.gmra.mxu3 %vm490_vm2, %v4662_v5  ;;  %v443_v13 = vrot.slane %v4696_v7, 7 }
  0xb3   : > { %v4676_v30 = vadd.f32 %v1065_v9, %v1001_v21  ;;  %v784_v36 = vpop.f32.mrf.mxu1  ;;  %3615 = vmatmul.msk.f32.gmra.mxu0 %vm490_vm2, %v4628_v17 }
  0xb4   : > { %v785_v48 = vadd.f32 %v784_v36, %v588_v24 }
  0xb5   : > { %3682 = vmatmul.msk.f32.gmra.mxu2 %vm490_vm2, %v4672_v27  ;;  %v1068_v51 = vpop.f32.mrf.mxu3 }
  0xb6   : > { %3648 = vmatmul.msk.f32.gmra.mxu1 %vm490_vm2, %v4638_v39 }
  0xb8   : > { %v914_v57 = vpop.f32.mrf.mxu2  ;;  %v591_v63 = vpop.f32.mrf.mxu0 }
  0xb9   : > { %v1002_v60 = vadd.f32 %v914_v57, %v785_v48  ;;  %v4713_v57 = vld [vmem:[%s4346_s16 + $0xb8] sm:$0xff] }
  0xba   : > { %3717 = vmatmul.msk.f32.gmra.mxu3 %vm490_vm2, %v4679_v33 }
  0xbb   : > { %v4693_v6 = vadd.f32 %v1068_v51, %v1002_v60  ;;  %v787_v9 = vpop.f32.mrf.mxu1  ;;  %3616 = vmatmul.msk.f32.gmra.mxu0 %vm490_vm2, %v4645_v45  ;;  %v4706_v51 = vsel %vm406_vm1, 0.0, %v443_v13 }
  0xbc   : > { %v788_v20 = vadd.f32 %v787_v9, %v591_v63  ;;  %6522 = vst [vmem:[#allocation17_spill] sm:$0xff] %v4706_v51 }
  0xbd   : > { %3683 = vmatmul.msk.f32.gmra.mxu2 %vm490_vm2, %v4689_v0  ;;  %v1071_v21 = vpop.f32.mrf.mxu3 }
  0xbe   : > { %3649 = vmatmul.msk.f32.gmra.mxu1 %vm490_vm2, %v4655_v3 }
  0xc0   : > { %v917_v24 = vpop.f32.mrf.mxu2  ;;  %v594_v48 = vpop.f32.mrf.mxu0 }
  0xc1   : > { %v1003_v36 = vadd.f32 %v917_v24, %v788_v20  ;;  %v444_v20 = vrot.slane %v4713_v57, 7 }
  0xc2   : > { %3718 = vmatmul.msk.f32.gmra.mxu3 %vm490_vm2, %v4696_v7 }
  0xc3   : > { %v4710_v54 = vadd.f32 %v1071_v21, %v1003_v36  ;;  %v790_v60 = vpop.f32.mrf.mxu1  ;;  %3617 = vmatmul.msk.f32.gmra.mxu0 %vm490_vm2, %v4662_v5  ;;  %v4723_v36 = vsel %vm406_vm1, %v443_v13, %v444_v20  ;;  %v446_v13 = vrot.slane %v4730_v15, 7 }
  0xc4   : > { %v791_v63 = vadd.f32 %v790_v60, %v594_v48  ;;  %6523 = vst [vmem:[#allocation18_spill] sm:$0xff] %v4723_v36 }
  0xc5   : > { %3684 = vmatmul.msk.f32.gmra.mxu2 %vm490_vm2, %v4706_v51  ;;  %v1074_v9 = vpop.f32.mrf.mxu3 }
  0xc6   : > { %3650 = vmatmul.msk.f32.gmra.mxu1 %vm490_vm2, %v4672_v27 }
  0xc8   : > { %v920_v24 = vpop.f32.mrf.mxu2  ;;  %v597_v21 = vpop.f32.mrf.mxu0 }
  0xc9   : > { %v1004_v3 = vadd.f32 %v920_v24, %v791_v63 }
  0xca   : > { %3719 = vmatmul.msk.f32.gmra.mxu3 %vm490_vm2, %v4713_v57 }
  0xcb   : > { %v4727_v39 = vadd.f32 %v1074_v9, %v1004_v3  ;;  %v793_v48 = vpop.f32.mrf.mxu1  ;;  %3618 = vmatmul.msk.f32.gmra.mxu0 %vm490_vm2, %v4679_v33  ;;  %v4740_v9 = vsel %vm406_vm1, 0.0, %v446_v13 }
  0xcc   : > { %v794_v60 = vadd.f32 %v793_v48, %v597_v21  ;;  %6525 = vst [vmem:[#allocation20_spill] sm:$0xff] %v4740_v9 }
  0xcd   : > { %6524 = vst [vmem:[#allocation19_spill] sm:$0xff] %v4727_v39  ;;  %3685 = vmatmul.msk.f32.gmra.mxu2 %vm490_vm2, %v4723_v36  ;;  %v1077_v63 = vpop.f32.mrf.mxu3 }
  0xce   : > { %3651 = vmatmul.msk.f32.gmra.mxu1 %vm490_vm2, %v4689_v0 }
  0xd0   : > { %v923_v20 = vpop.f32.mrf.mxu2  ;;  %v600_v3 = vpop.f32.mrf.mxu0 }
  0xd1   : > { %v1005_v24 = vadd.f32 %v923_v20, %v794_v60  ;;  %v447_v20 = vrot.slane %v4747_v1, 7 }
  0xd2   : > { %3720 = vmatmul.msk.f32.gmra.mxu3 %vm490_vm2, %v4730_v15 }
  0xd3   : > { %v4744_v27 = vadd.f32 %v1077_v63, %v1005_v24  ;;  %v796_v21 = vpop.f32.mrf.mxu1  ;;  %3619 = vmatmul.msk.f32.gmra.mxu0 %vm490_vm2, %v4696_v7  ;;  %v4757_v24 = vsel %vm406_vm1, %v446_v13, %v447_v20  ;;  %v449_v13 = vrot.slane %v4764_v55, 7 }
  0xd4   : > { %v797_v48 = vadd.f32 %v796_v21, %v600_v3  ;;  %6527 = vst [vmem:[#allocation22_spill] sm:$0xff] %v4757_v24 }
  0xd5   : > { %6526 = vst [vmem:[#allocation21_spill] sm:$0xff] %v4744_v27  ;;  %3686 = vmatmul.msk.f32.gmra.mxu2 %vm490_vm2, %v4740_v9  ;;  %v1080_v60 = vpop.f32.mrf.mxu3 }
  0xd6   : > { %3652 = vmatmul.msk.f32.gmra.mxu1 %vm490_vm2, %v4706_v51 }
  0xd8   : > { %v926_v0 = vpop.f32.mrf.mxu2  ;;  %v603_v63 = vpop.f32.mrf.mxu0 }
  0xd9   : > { %v1006_v61 = vadd.f32 %v926_v0, %v797_v48 }
  0xda   : > { %3721 = vmatmul.msk.f32.gmra.mxu3 %vm490_vm2, %v4747_v1 }
  0xdb   : > { %v4761_v58 = vadd.f32 %v1080_v60, %v1006_v61  ;;  %v799_v3 = vpop.f32.mrf.mxu1  ;;  %3620 = vmatmul.msk.f32.gmra.mxu0 %vm490_vm2, %v4713_v57  ;;  %v4774_v60 = vsel %vm406_vm1, 0.0, %v449_v13 }
  0xdc   : > { %v800_v0 = vadd.f32 %v799_v3, %v603_v63  ;;  %6529 = vst [vmem:[#allocation24_spill] sm:$0xff] %v4774_v60 }
  0xdd   : > { %6528 = vst [vmem:[#allocation23_spill] sm:$0xff] %v4761_v58  ;;  %3687 = vmatmul.msk.f32.gmra.mxu2 %vm490_vm2, %v4757_v24  ;;  %v1083_v21 = vpop.f32.mrf.mxu3 }
  0xde   : > { %3653 = vmatmul.msk.f32.gmra.mxu1 %vm490_vm2, %v4723_v36 }
  0xe0   : > { %v929_v48 = vpop.f32.mrf.mxu2  ;;  %v606_v61 = vpop.f32.mrf.mxu0 }
  0xe1   : > { %v1007_v20 = vadd.f32 %v929_v48, %v800_v0  ;;  %v450_v48 = vrot.slane %v4781_v52, 7 }
  0xe2   : > { %3722 = vmatmul.msk.f32.gmra.mxu3 %vm490_vm2, %v4764_v55 }
  0xe3   : > { %v4778_v51 = vadd.f32 %v1083_v21, %v1007_v20  ;;  %v802_v63 = vpop.f32.mrf.mxu1  ;;  %3621 = vmatmul.msk.f32.gmra.mxu0 %vm490_vm2, %v4730_v15  ;;  %v4791_v20 = vsel %vm406_vm1, %v449_v13, %v450_v48  ;;  %v452_v13 = vrot.slane %v4798_v46, 7 }
  0xe4   : > { %v803_v3 = vadd.f32 %v802_v63, %v606_v61  ;;  %6531 = vst [vmem:[#allocation26_spill] sm:$0xff] %v4791_v20 }
  0xe5   : > { %6530 = vst [vmem:[#allocation25_spill] sm:$0xff] %v4778_v51  ;;  %3688 = vmatmul.msk.f32.gmra.mxu2 %vm490_vm2, %v4774_v60  ;;  %v1086_v0 = vpop.f32.mrf.mxu3 }
  0xe6   : > { %3654 = vmatmul.msk.f32.gmra.mxu1 %vm490_vm2, %v4740_v9 }
  0xe8   : > { %v932_v36 = vpop.f32.mrf.mxu2  ;;  %v609_v21 = vpop.f32.mrf.mxu0 }
  0xe9   : > { %v1008_v49 = vadd.f32 %v932_v36, %v803_v3 }
  0xea   : > { %3723 = vmatmul.msk.f32.gmra.mxu3 %vm490_vm2, %v4781_v52 }
  0xeb   : > { %v4795_v51 = vadd.f32 %v1086_v0, %v1008_v49  ;;  %v805_v61 = vpop.f32.mrf.mxu1  ;;  %3622 = vmatmul.msk.f32.gmra.mxu0 %vm490_vm2, %v4747_v1  ;;  %v4808_v0 = vsel %vm406_vm1, 0.0, %v452_v13 }
  0xec   : > { %v806_v36 = vadd.f32 %v805_v61, %v609_v21  ;;  %6533 = vst [vmem:[#allocation28_spill] sm:$0xff] %v4808_v0 }
  0xed   : > { %6532 = vst [vmem:[#allocation27_spill] sm:$0xff] %v4795_v51  ;;  %3689 = vmatmul.msk.f32.gmra.mxu2 %vm490_vm2, %v4791_v20  ;;  %v1089_v63 = vpop.f32.mrf.mxu3  ;;  %v4815_v51 = vld [vmem:[%s4346_s16 + $0xe8] sm:$0xff] }
  0xee   : > { %3655 = vmatmul.msk.f32.gmra.mxu1 %vm490_vm2, %v4757_v24 }
  0xf0   : > { %v935_v3 = vpop.f32.mrf.mxu2  ;;  %v612_v49 = vpop.f32.mrf.mxu0 }
  0xf1   : > { %v1009_v48 = vadd.f32 %v935_v3, %v806_v36  ;;  %v3932_v3 = vld [vmem:[%s6420_s3 + $0x28] sm:$0xf] }
  0xf2   : > { %3724 = vmatmul.msk.f32.gmra.mxu3 %vm490_vm2, %v4798_v46  ;;  %3933 = vmatpush.msk.msra.mxu2 %vm555_vm0, %v3932_v3 }
  0xf3   : > { %v4812_v9 = vadd.f32 %v1089_v63, %v1009_v48  ;;  %v808_v21 = vpop.f32.mrf.mxu1  ;;  %3623 = vmatmul.msk.f32.gmra.mxu0 %vm490_vm2, %v4764_v55  ;;  %v3966_v63 = vld [vmem:[%s6420_s3 + $0x2c] sm:$0xf]  ;;  %v453_v48 = vrot.slane %v4815_v51, 7 }
  0xf4   : > { %v809_v61 = vadd.f32 %v808_v21, %v612_v49  ;;  %3967 = vmatpush.msk.msra.mxu3 %vm555_vm0, %v3966_v63 }
  0xf5   : > { %6534 = vst [vmem:[#allocation29_spill] sm:$0xff] %v4812_v9  ;;  %3690 = vmatmul.msk.f32.gmra.mxu2 %vm490_vm2, %v4808_v0  ;;  %v1092_v36 = vpop.f32.mrf.mxu3  ;;  %v3865_v9 = vld [vmem:[%s6420_s3 + $0x24] sm:$0xf]  ;;  %v4839_v27 = vsel %vm406_vm1, %v452_v13, %v453_v48 }
  0xf6   : > { %3656 = vmatmul.msk.f32.gmra.mxu1 %vm490_vm2, %v4774_v60  ;;  %3866 = vmatpush.msk.msra.mxu0 %vm555_vm0, %v3865_v9 }
  0xf8   : > { %v938_v49 = vpop.f32.mrf.mxu2  ;;  %v615_v24 = vpop.f32.mrf.mxu0 }
  0xf9   : > { %v1010_v21 = vadd.f32 %v938_v49, %v809_v61  ;;  %v4847_v61 = vld [vmem:[%s4346_s16 + $0xf0] sm:$0xff] }
  0xfa   : > { %3725 = vmatmul.msk.f32.gmra.mxu3 %vm490_vm2, %v4815_v51  ;;  %v870_v49 = vrot.slane %v4847_v61, 7 }
  0xfb   : > { %v4844_v3 = vadd.f32 %v1092_v36, %v1010_v21  ;;  %v811_v63 = vpop.f32.mrf.mxu1  ;;  %3624 = vmatmul.msk.f32.gmra.mxu0 %vm490_vm2, %v4781_v52 }
  0xfc   : > { %v812_v13 = vadd.f32 %v811_v63, %v615_v24  ;;  %v4858_v60 = vsel %vm406_vm1, 0.0, %v870_v49 }
  0xfd   : > { %6535 = vst [vmem:[#allocation30_spill] sm:$0xff] %v4844_v3  ;;  %3691 = vmatmul.msk.f32.gmra.mxu2 %vm490_vm2, %v4839_v27  ;;  %v1095_v48 = vpop.f32.mrf.mxu3  ;;  %v4865_v3 = vld [vmem:[%s4346_s16 + $0xf8] sm:$0xff] }
  0xfe   : > { %3657 = vmatmul.msk.f32.gmra.mxu1 %vm490_vm2, %v4791_v20  ;;  %6536 = vst [vmem:[#allocation31_spill] sm:$0xff] %v4858_v60 }
 0x100   : > { %v941_v9 = vpop.f32.mrf.mxu2  ;;  %v618_v21 = vpop.f32.mrf.mxu0 }
 0x101   : > { %v1011_v36 = vadd.f32 %v941_v9, %v812_v13  ;;  %v871_v9 = vrot.slane %v4865_v3, 7 }
 0x102   : > { %3726 = vmatmul.msk.f32.gmra.mxu3 %vm490_vm2, %v4847_v61 }
 0x103   : > { %v4862_v43 = vadd.f32 %v1095_v48, %v1011_v36  ;;  %v814_v24 = vpop.f32.mrf.mxu1  ;;  %3625 = vmatmul.msk.f32.gmra.mxu0 %vm490_vm2, %v4798_v46  ;;  %v4875_v36 = vsel %vm406_vm1, %v870_v49, %v871_v9 }
 0x104   : > { %v815_v63 = vadd.f32 %v814_v24, %v618_v21  ;;  %v1191_v21 = vrot.slane %v4364_v11, 1 }
 0x105   : > { %6537 = vst [vmem:[#allocation32_spill] sm:$0xff] %v4862_v43  ;;  %3692 = vmatmul.msk.f32.gmra.mxu2 %vm490_vm2, %v4858_v60  ;;  %v1098_v13 = vpop.f32.mrf.mxu3  ;;  %v1190_v60 = vrot.slane %v4350_v8, 1 }
 0x106   : > { %3658 = vmatmul.msk.f32.gmra.mxu1 %vm490_vm2, %v4808_v0 }
 0x108   : > { %v944_v20 = vpop.f32.mrf.mxu2  ;;  %v621_v48 = vpop.f32.mrf.mxu0 }
 0x109   : > { %v1012_v40 = vadd.f32 %v944_v20, %v815_v63  ;;  %v1187_v20 = vrot.slane %v4361_v10, 1  ;;  %v1188_v63 = vrot.slane %v4374_v14, 1 }
 0x10a   : > { %3727 = vmatmul.msk.f32.gmra.mxu3 %vm490_vm2, %v4865_v3 }
 0x10b   : > { %v4879_v43 = vadd.f32 %v1098_v13, %v1012_v40  ;;  %v817_v24 = vpop.f32.mrf.mxu1  ;;  %3626 = vmatmul.msk.f32.gmra.mxu0 %vm490_vm2, %v4815_v51  ;;  %v4892_v40 = vsel %vm1186_vm3, %v1190_v60, %v1191_v21  ;;  %v1189_v39 = vsel %vm1186_vm3, %v1187_v20, %v1188_v63  ;;  %v4905_v60 = vsel %vm1186_vm3, %v1191_v21, 0.0 }
 0x10c   : > { %v818_v49 = vadd.f32 %v817_v24, %v621_v48  ;;  %6539 = vst [vmem:[#allocation34_spill] sm:$0xff] %v4892_v40 }
 0x10d   : > { %6538 = vst [vmem:[#allocation33_spill] sm:$0xff] %v4879_v43  ;;  %3693 = vmatmul.msk.f32.gmra.mxu2 %vm490_vm2, %v4875_v36  ;;  %v1101_v9 = vpop.f32.mrf.mxu3 }
 0x10e   : > { %3659 = vmatmul.msk.f32.gmra.mxu1 %vm490_vm2, %v4839_v27  ;;  %6540 = vst [vmem:[#allocation35_spill] sm:$0xff] %v4905_v60 }
 0x110   : > { %v947_v13 = vpop.f32.mrf.mxu2  ;;  %v624_v43 = vpop.f32.mrf.mxu0 }
 0x111   : > { %v1013_v0 = vadd.f32 %v947_v13, %v818_v49 }
 0x112   : > { %3832 = vmatmul.msk.f32.vlgmr.msrb.gmra.mxu3 %vm490_vm2, %v4892_v40 }
 0x113   : > { %v4897_v37 = vadd.f32 %v1101_v9, %v1013_v0  ;;  %v820_v58 = vpop.f32.mrf.mxu1  ;;  %3731 = vmatmul.msk.f32.vlgmr.msrb.gmra.mxu0 %vm490_vm2, %v1189_v39  ;;  %v1251_v0 = vsel %vm1186_vm3, %v1188_v63, 0.0  ;;  %v1193_v9 = vrot.slane %v4386_v19, 1 }
 0x114   : > { %v821_v48 = vadd.f32 %v820_v58, %v624_v43  ;;  %v1194_v58 = vrot.slane %v4401_v23, 1 }
 0x115   : > { %3798 = vmatmul.msk.f32.vlgmr.msrb.gmra.mxu2 %vm490_vm2, %v4350_v8  ;;  %v1104_v24 = vpop.f32.mrf.mxu3 }
 0x116   : > { %3764 = vmatmul.msk.f32.vlgmr.msrb.gmra.mxu1 %vm490_vm2, %v4361_v10  ;;  %v4920_v63 = vsel %vm1186_vm3, %v1193_v9, %v1194_v58  ;;  %v4933_v9 = vsel %vm1186_vm3, %v1194_v58, 0.0 }
 0x117   : > { %6541 = vst [vmem:[#allocation36_spill] sm:$0xff] %v4920_v63 }
 0x118   : > { %v950_v20 = vpop.f32.mrf.mxu2  ;;  %v627_v13 = vpop.f32.mrf.mxu0  ;;  %6542 = vst [vmem:[#allocation37_spill] sm:$0xff] %v4933_v9 }
 0x119   : > { %v1014_v49 = vadd.f32 %v950_v20, %v821_v48 }
 0x11a   : > { %3833 = vmatmul.msk.f32.gmra.mxu3 %vm490_vm2, %v4905_v60 }
 0x11b   : > { %v4910_v39 = vadd.f32 %v1104_v24, %v1014_v49  ;;  %v823_v43 = vpop.f32.mrf.mxu1  ;;  %3732 = vmatmul.msk.f32.gmra.mxu0 %vm490_vm2, %v1251_v0 }
 0x11c   : > { %v824_v10 = vadd.f32 %v823_v43, %v627_v13 }
 0x11d   : > { %3799 = vmatmul.msk.f32.gmra.mxu2 %vm490_vm2, %v4364_v11  ;;  %v1107_v21 = vpop.f32.mrf.mxu3 }
 0x11e   : > { %3765 = vmatmul.msk.f32.gmra.mxu1 %vm490_vm2, %v4374_v14 }
 0x120   : > { %v953_v48 = vpop.f32.mrf.mxu2  ;;  %v630_v20 = vpop.f32.mrf.mxu0 }
 0x121   : > { %v1015_v24 = vadd.f32 %v953_v48, %v824_v10 }
 0x122   : > { %3834 = vmatmul.msk.f32.gmra.mxu3 %vm490_vm2, %v4920_v63 }
 0x123   : > { %v4924_v49 = vadd.f32 %v1107_v21, %v1015_v24  ;;  %v826_v0 = vpop.f32.mrf.mxu1  ;;  %3733 = vmatmul.msk.f32.gmra.mxu0 %vm490_vm2, %v4892_v40  ;;  %v1196_v24 = vrot.slane %v4416_v26, 1  ;;  %v1197_v40 = vrot.slane %v4431_v29, 1 }
 0x124   : > { %v827_v13 = vadd.f32 %v826_v0, %v630_v20 }
 0x125   : > { %3800 = vmatmul.msk.f32.gmra.mxu2 %vm490_vm2, %v4386_v19  ;;  %v1110_v14 = vpop.f32.mrf.mxu3  ;;  %v4948_v0 = vsel %vm1186_vm3, %v1196_v24, %v1197_v40  ;;  %v4961_v24 = vsel %vm1186_vm3, %v1197_v40, 0.0 }
 0x126   : > { %3766 = vmatmul.msk.f32.gmra.mxu1 %vm490_vm2, %v4350_v8  ;;  %6543 = vst [vmem:[#allocation38_spill] sm:$0xff] %v4948_v0 }
 0x127   : > { %6544 = vst [vmem:[#allocation39_spill] sm:$0xff] %v4961_v24 }
 0x128   : > { %v956_v43 = vpop.f32.mrf.mxu2  ;;  %v633_v48 = vpop.f32.mrf.mxu0 }
 0x129   : > { %v1016_v10 = vadd.f32 %v956_v43, %v827_v13 }
 0x12a   : > { %3835 = vmatmul.msk.f32.gmra.mxu3 %vm490_vm2, %v4933_v9 }
 0x12b   : > { %v4937_v21 = vadd.f32 %v1110_v14, %v1016_v10  ;;  %v829_v20 = vpop.f32.mrf.mxu1  ;;  %3734 = vmatmul.msk.f32.gmra.mxu0 %vm490_vm2, %v4905_v60 }
 0x12c   : > { %v830_v8 = vadd.f32 %v829_v20, %v633_v48 }
 0x12d   : > { %3801 = vmatmul.msk.f32.gmra.mxu2 %vm490_vm2, %v4401_v23  ;;  %v1113_v58 = vpop.f32.mrf.mxu3 }
 0x12e   : > { %3767 = vmatmul.msk.f32.gmra.mxu1 %vm490_vm2, %v4364_v11 }
 0x130   : > { %v959_v13 = vpop.f32.mrf.mxu2  ;;  %v636_v43 = vpop.f32.mrf.mxu0 }
 0x131   : > { %v1017_v14 = vadd.f32 %v959_v13, %v830_v8 }
 0x132   : > { %3836 = vmatmul.msk.f32.gmra.mxu3 %vm490_vm2, %v4948_v0 }
 0x133   : > { %v4952_v10 = vadd.f32 %v1113_v58, %v1017_v14  ;;  %v832_v60 = vpop.f32.mrf.mxu1  ;;  %3735 = vmatmul.msk.f32.gmra.mxu0 %vm490_vm2, %v4920_v63  ;;  %v1199_v14 = vrot.slane %v4446_v32, 1  ;;  %v1200_v63 = vrot.slane %v4461_v35, 1 }
 0x134   : > { %v833_v48 = vadd.f32 %v832_v60, %v636_v43 }
 0x135   : > { %3802 = vmatmul.msk.f32.gmra.mxu2 %vm490_vm2, %v4416_v26  ;;  %v1116_v11 = vpop.f32.mrf.mxu3  ;;  %v4976_v43 = vsel %vm1186_vm3, %v1199_v14, %v1200_v63  ;;  %v4989_v14 = vsel %vm1186_vm3, %v1200_v63, 0.0 }
 0x136   : > { %3768 = vmatmul.msk.f32.gmra.mxu1 %vm490_vm2, %v4386_v19  ;;  %6545 = vst [vmem:[#allocation40_spill] sm:$0xff] %v4976_v43 }
 0x137   : > { %6546 = vst [vmem:[#allocation41_spill] sm:$0xff] %v4989_v14 }
 0x138   : > { %v962_v20 = vpop.f32.mrf.mxu2  ;;  %v639_v13 = vpop.f32.mrf.mxu0 }
 0x139   : > { %v1018_v8 = vadd.f32 %v962_v20, %v833_v48 }
 0x13a   : > { %3837 = vmatmul.msk.f32.gmra.mxu3 %vm490_vm2, %v4961_v24 }
 0x13b   : > { %v4965_v58 = vadd.f32 %v1116_v11, %v1018_v8  ;;  %v835_v60 = vpop.f32.mrf.mxu1  ;;  %3736 = vmatmul.msk.f32.gmra.mxu0 %vm490_vm2, %v4933_v9 }
 0x13c   : > { %v836_v19 = vadd.f32 %v835_v60, %v639_v13 }
 0x13d   : > { %3803 = vmatmul.msk.f32.gmra.mxu2 %vm490_vm2, %v4431_v29  ;;  %v1119_v40 = vpop.f32.mrf.mxu3 }
 0x13e   : > { %3769 = vmatmul.msk.f32.gmra.mxu1 %vm490_vm2, %v4401_v23 }
 0x140   : > { %v965_v48 = vpop.f32.mrf.mxu2  ;;  %v642_v20 = vpop.f32.mrf.mxu0 }
 0x141   : > { %v1019_v11 = vadd.f32 %v965_v48, %v836_v19 }
 0x142   : > { %3838 = vmatmul.msk.f32.gmra.mxu3 %vm490_vm2, %v4976_v43 }
 0x143   : > { %v4980_v8 = vadd.f32 %v1119_v40, %v1019_v11  ;;  %v838_v9 = vpop.f32.mrf.mxu1  ;;  %3737 = vmatmul.msk.f32.gmra.mxu0 %vm490_vm2, %v4948_v0  ;;  %v1202_v11 = vrot.slane %v4476_v38, 1  ;;  %v1203_v0 = vrot.slane %v4491_v41, 1 }
 0x144   : > { %v839_v13 = vadd.f32 %v838_v9, %v642_v20 }
 0x145   : > { %3804 = vmatmul.msk.f32.gmra.mxu2 %vm490_vm2, %v4446_v32  ;;  %v1122_v23 = vpop.f32.mrf.mxu3  ;;  %v5004_v20 = vsel %vm1186_vm3, %v1202_v11, %v1203_v0  ;;  %v5017_v11 = vsel %vm1186_vm3, %v1203_v0, 0.0 }
 0x146   : > { %3770 = vmatmul.msk.f32.gmra.mxu1 %vm490_vm2, %v4416_v26  ;;  %6547 = vst [vmem:[#allocation42_spill] sm:$0xff] %v5004_v20 }
 0x147   : > { %6548 = vst [vmem:[#allocation43_spill] sm:$0xff] %v5017_v11 }
 0x148   : > { %v968_v60 = vpop.f32.mrf.mxu2  ;;  %v645_v48 = vpop.f32.mrf.mxu0 }
 0x149   : > { %v1020_v19 = vadd.f32 %v968_v60, %v839_v13 }
 0x14a   : > { %3839 = vmatmul.msk.f32.gmra.mxu3 %vm490_vm2, %v4989_v14 }
 0x14b   : > { %v4993_v40 = vadd.f32 %v1122_v23, %v1020_v19  ;;  %v841_v9 = vpop.f32.mrf.mxu1  ;;  %3738 = vmatmul.msk.f32.gmra.mxu0 %vm490_vm2, %v4961_v24 }
 0x14c   : > { %v842_v26 = vadd.f32 %v841_v9, %v645_v48 }
 0x14d   : > { %3805 = vmatmul.msk.f32.gmra.mxu2 %vm490_vm2, %v4461_v35  ;;  %v1125_v63 = vpop.f32.mrf.mxu3 }
 0x14e   : > { %3771 = vmatmul.msk.f32.gmra.mxu1 %vm490_vm2, %v4431_v29 }
 0x150   : > { %v971_v13 = vpop.f32.mrf.mxu2  ;;  %v648_v60 = vpop.f32.mrf.mxu0 }
 0x151   : > { %v1021_v23 = vadd.f32 %v971_v13, %v842_v26 }
 0x152   : > { %3840 = vmatmul.msk.f32.gmra.mxu3 %vm490_vm2, %v5004_v20 }
 0x153   : > { %v5008_v19 = vadd.f32 %v1125_v63, %v1021_v23  ;;  %v844_v24 = vpop.f32.mrf.mxu1  ;;  %3739 = vmatmul.msk.f32.gmra.mxu0 %vm490_vm2, %v4976_v43  ;;  %v1205_v23 = vrot.slane %v4506_v44, 1  ;;  %v1206_v43 = vrot.slane %v4521_v47, 1 }
 0x154   : > { %v845_v48 = vadd.f32 %v844_v24, %v648_v60 }
 0x155   : > { %3806 = vmatmul.msk.f32.gmra.mxu2 %vm490_vm2, %v4476_v38  ;;  %v1128_v29 = vpop.f32.mrf.mxu3  ;;  %v5032_v60 = vsel %vm1186_vm3, %v1205_v23, %v1206_v43  ;;  %v5045_v23 = vsel %vm1186_vm3, %v1206_v43, 0.0 }
 0x156   : > { %3772 = vmatmul.msk.f32.gmra.mxu1 %vm490_vm2, %v4446_v32  ;;  %6549 = vst [vmem:[#allocation44_spill] sm:$0xff] %v5032_v60 }
 0x157   : > { %6550 = vst [vmem:[#allocation45_spill] sm:$0xff] %v5045_v23 }
 0x158   : > { %v974_v9 = vpop.f32.mrf.mxu2  ;;  %v651_v13 = vpop.f32.mrf.mxu0 }
 0x159   : > { %v1022_v26 = vadd.f32 %v974_v9, %v845_v48 }
 0x15a   : > { %3841 = vmatmul.msk.f32.gmra.mxu3 %vm490_vm2, %v5017_v11 }
 0x15b   : > { %v5021_v63 = vadd.f32 %v1128_v29, %v1022_v26  ;;  %v847_v24 = vpop.f32.mrf.mxu1  ;;  %3740 = vmatmul.msk.f32.gmra.mxu0 %vm490_vm2, %v4989_v14 }
 0x15c   : > { %v848_v32 = vadd.f32 %v847_v24, %v651_v13 }
 0x15d   : > { %3807 = vmatmul.msk.f32.gmra.mxu2 %vm490_vm2, %v4491_v41  ;;  %v1131_v0 = vpop.f32.mrf.mxu3 }
 0x15e   : > { %3773 = vmatmul.msk.f32.gmra.mxu1 %vm490_vm2, %v4461_v35 }
 0x160   : > { %v977_v48 = vpop.f32.mrf.mxu2  ;;  %v654_v9 = vpop.f32.mrf.mxu0 }
 0x161   : > { %v1023_v29 = vadd.f32 %v977_v48, %v848_v32 }
 0x162   : > { %3842 = vmatmul.msk.f32.gmra.mxu3 %vm490_vm2, %v5032_v60 }
 0x163   : > { %v5036_v26 = vadd.f32 %v1131_v0, %v1023_v29  ;;  %v850_v14 = vpop.f32.mrf.mxu1  ;;  %3741 = vmatmul.msk.f32.gmra.mxu0 %vm490_vm2, %v5004_v20  ;;  %v1208_v29 = vrot.slane %v4536_v50, 1  ;;  %v1209_v20 = vrot.slane %v4551_v53, 1 }
 0x164   : > { %v851_v13 = vadd.f32 %v850_v14, %v654_v9 }
 0x165   : > { %3808 = vmatmul.msk.f32.gmra.mxu2 %vm490_vm2, %v4506_v44  ;;  %v1134_v35 = vpop.f32.mrf.mxu3  ;;  %v5060_v9 = vsel %vm1186_vm3, %v1208_v29, %v1209_v20  ;;  %v5073_v29 = vsel %vm1186_vm3, %v1209_v20, 0.0 }
 0x166   : > { %3774 = vmatmul.msk.f32.gmra.mxu1 %vm490_vm2, %v4476_v38  ;;  %6551 = vst [vmem:[#allocation46_spill] sm:$0xff] %v5060_v9 }
 0x167   : > { %6552 = vst [vmem:[#allocation47_spill] sm:$0xff] %v5073_v29 }
 0x168   : > { %v980_v24 = vpop.f32.mrf.mxu2  ;;  %v657_v48 = vpop.f32.mrf.mxu0 }
 0x169   : > { %v1024_v32 = vadd.f32 %v980_v24, %v851_v13 }
 0x16a   : > { %3843 = vmatmul.msk.f32.gmra.mxu3 %vm490_vm2, %v5045_v23 }
 0x16b   : > { %v5049_v0 = vadd.f32 %v1134_v35, %v1024_v32  ;;  %v853_v14 = vpop.f32.mrf.mxu1  ;;  %3742 = vmatmul.msk.f32.gmra.mxu0 %vm490_vm2, %v5017_v11 }
 0x16c   : > { %v854_v38 = vadd.f32 %v853_v14, %v657_v48 }
 0x16d   : > { %3809 = vmatmul.msk.f32.gmra.mxu2 %vm490_vm2, %v4521_v47  ;;  %v1137_v43 = vpop.f32.mrf.mxu3 }
 0x16e   : > { %3775 = vmatmul.msk.f32.gmra.mxu1 %vm490_vm2, %v4491_v41 }
 0x170   : > { %v983_v13 = vpop.f32.mrf.mxu2  ;;  %v660_v24 = vpop.f32.mrf.mxu0 }
 0x171   : > { %v1025_v35 = vadd.f32 %v983_v13, %v854_v38 }
 0x172   : > { %3844 = vmatmul.msk.f32.gmra.mxu3 %vm490_vm2, %v5060_v9 }
 0x173   : > { %v5064_v32 = vadd.f32 %v1137_v43, %v1025_v35  ;;  %v856_v11 = vpop.f32.mrf.mxu1  ;;  %3743 = vmatmul.msk.f32.gmra.mxu0 %vm490_vm2, %v5032_v60  ;;  %v1211_v35 = vrot.slane %v4566_v56, 1  ;;  %v1212_v60 = vrot.slane %v4581_v59, 1 }
 0x174   : > { %v857_v48 = vadd.f32 %v856_v11, %v660_v24 }
 0x175   : > { %3810 = vmatmul.msk.f32.gmra.mxu2 %vm490_vm2, %v4536_v50  ;;  %v1140_v41 = vpop.f32.mrf.mxu3  ;;  %v5088_v24 = vsel %vm1186_vm3, %v1211_v35, %v1212_v60  ;;  %v5101_v35 = vsel %vm1186_vm3, %v1212_v60, 0.0 }
 0x176   : > { %3776 = vmatmul.msk.f32.gmra.mxu1 %vm490_vm2, %v4506_v44  ;;  %6553 = vst [vmem:[#allocation48_spill] sm:$0xff] %v5088_v24 }
 0x178   : > { %v986_v14 = vpop.f32.mrf.mxu2  ;;  %v663_v13 = vpop.f32.mrf.mxu0 }
 0x179   : > { %v1026_v38 = vadd.f32 %v986_v14, %v857_v48 }
 0x17a   : > { %3845 = vmatmul.msk.f32.gmra.mxu3 %vm490_vm2, %v5073_v29 }
 0x17b   : > { %v5077_v43 = vadd.f32 %v1140_v41, %v1026_v38  ;;  %v859_v11 = vpop.f32.mrf.mxu1  ;;  %3744 = vmatmul.msk.f32.gmra.mxu0 %vm490_vm2, %v5045_v23 }
 0x17c   : > { %v860_v44 = vadd.f32 %v859_v11, %v663_v13 }
 0x17d   : > { %3811 = vmatmul.msk.f32.gmra.mxu2 %vm490_vm2, %v4551_v53  ;;  %v1143_v20 = vpop.f32.mrf.mxu3 }
 0x17e   : > { %3777 = vmatmul.msk.f32.gmra.mxu1 %vm490_vm2, %v4521_v47 }
 0x180   : > { %v989_v48 = vpop.f32.mrf.mxu2  ;;  %v666_v14 = vpop.f32.mrf.mxu0 }
 0x181   : > { %v1027_v41 = vadd.f32 %v989_v48, %v860_v44 }
 0x182   : > { %3846 = vmatmul.msk.f32.gmra.mxu3 %vm490_vm2, %v5088_v24 }
 0x183   : > { %v5092_v38 = vadd.f32 %v1143_v20, %v1027_v41  ;;  %v862_v23 = vpop.f32.mrf.mxu1  ;;  %3745 = vmatmul.msk.f32.gmra.mxu0 %vm490_vm2, %v5060_v9  ;;  %v1214_v41 = vrot.slane %v4596_v62, 1  ;;  %v1215_v9 = vrot.slane %v4611_v2, 1 }
 0x184   : > { %v863_v13 = vadd.f32 %v862_v23, %v666_v14 }
 0x185   : > { %3812 = vmatmul.msk.f32.gmra.mxu2 %vm490_vm2, %v4566_v56  ;;  %v1146_v47 = vpop.f32.mrf.mxu3  ;;  %v5116_v14 = vsel %vm1186_vm3, %v1214_v41, %v1215_v9  ;;  %v5129_v41 = vsel %vm1186_vm3, %v1215_v9, 0.0 }
 0x186   : > { %3778 = vmatmul.msk.f32.gmra.mxu1 %vm490_vm2, %v4536_v50 }
 0x188   : > { %v992_v11 = vpop.f32.mrf.mxu2  ;;  %v669_v48 = vpop.f32.mrf.mxu0 }
 0x189   : > { %v1028_v44 = vadd.f32 %v992_v11, %v863_v13 }
 0x18a   : > { %3847 = vmatmul.msk.f32.gmra.mxu3 %vm490_vm2, %v5101_v35 }
 0x18b   : > { %v5105_v20 = vadd.f32 %v1146_v47, %v1028_v44  ;;  %v865_v23 = vpop.f32.mrf.mxu1  ;;  %3746 = vmatmul.msk.f32.gmra.mxu0 %vm490_vm2, %v5073_v29 }
 0x18c   : > { %v866_v50 = vadd.f32 %v865_v23, %v669_v48 }
 0x18d   : > { %3813 = vmatmul.msk.f32.gmra.mxu2 %vm490_vm2, %v4581_v59  ;;  %v1149_v60 = vpop.f32.mrf.mxu3 }
 0x18e   : > { %3779 = vmatmul.msk.f32.gmra.mxu1 %vm490_vm2, %v4551_v53 }
 0x190   : > { %v995_v13 = vpop.f32.mrf.mxu2  ;;  %v1369_v11 = vpop.f32.mrf.mxu0 }
 0x191   : > { %v1029_v47 = vadd.f32 %v995_v13, %v866_v50 }
 0x192   : > { %3848 = vmatmul.msk.f32.gmra.mxu3 %vm490_vm2, %v5116_v14 }
 0x193   : > { %v5120_v44 = vadd.f32 %v1149_v60, %v1029_v47  ;;  %v1485_v29 = vpop.f32.mrf.mxu1  ;;  %3747 = vmatmul.msk.f32.gmra.mxu0 %vm490_vm2, %v5088_v24  ;;  %v1217_v47 = vrot.slane %v4628_v17, 1  ;;  %v1218_v24 = vrot.slane %v4645_v45, 1 }
 0x194   : > { %v1486_v48 = vadd.f32 %v1485_v29, %v1369_v11 }
 0x195   : > { %6554 = vst [vmem:[#allocation49_spill] sm:$0xff] %v5120_v44  ;;  %3814 = vmatmul.msk.f32.gmra.mxu2 %vm490_vm2, %v4596_v62  ;;  %v1763_v53 = vpop.f32.mrf.mxu3  ;;  %v5143_v29 = vsel %vm1186_vm3, %v1217_v47, %v1218_v24 }
 0x196   : > { %3780 = vmatmul.msk.f32.gmra.mxu1 %vm490_vm2, %v4566_v56 }
 0x198   : > { %v1603_v23 = vpop.f32.mrf.mxu2  ;;  %v1372_v13 = vpop.f32.mrf.mxu0 }
 0x199   : > { %v1699_v50 = vadd.f32 %v1603_v23, %v1486_v48 }
 0x19a   : > { %3849 = vmatmul.msk.f32.gmra.mxu3 %vm490_vm2, %v5129_v41 }
 0x19b   : > { %v1859_v60 = vadd.f32 %v1763_v53, %v1699_v50  ;;  %v1488_v44 = vpop.f32.mrf.mxu1  ;;  %3748 = vmatmul.msk.f32.gmra.mxu0 %vm490_vm2, %v5101_v35 }
 0x19c   : > { %v1489_v56 = vadd.f32 %v1488_v44, %v1372_v13  ;;  %v5155_v13 = vsel %vm1186_vm3, %v1218_v24, 0.0 }
 0x19d   : > { %3815 = vmatmul.msk.f32.gmra.mxu2 %vm490_vm2, %v4611_v2  ;;  %1923 = vrot.lane.b32.xlu0 %v1859_v60, %s4260_s8  ;;  %v1766_v9 = vpop.f32.mrf.mxu3 }
 0x19e   : > { %3781 = vmatmul.msk.f32.gmra.mxu1 %vm490_vm2, %v4581_v59 }
 0x1a0   : > { %v1606_v11 = vpop.f32.mrf.mxu2  ;;  %v1375_v53 = vpop.f32.mrf.mxu0 }
 0x1a1   : > { %v1700_v48 = vadd.f32 %v1606_v11, %v1489_v56  ;;  %v1220_v11 = vrot.slane %v4662_v5, 1 }
 0x1a2   : > { %3850 = vmatmul.msk.f32.gmra.mxu3 %vm490_vm2, %v5143_v29 }
 0x1a3   : > { %v1860_v23 = vadd.f32 %v1766_v9, %v1700_v48  ;;  %v1491_v50 = vpop.f32.mrf.mxu1  ;;  %3749 = vmatmul.msk.f32.gmra.mxu0 %vm490_vm2, %v5116_v14  ;;  %v1221_v48 = vrot.slane %v4679_v33, 1 }
 0x1a4   : > { %v1492_v59 = vadd.f32 %v1491_v50, %v1375_v53 }
 0x1a5   : > { %3816 = vmatmul.msk.f32.gmra.mxu2 %vm490_vm2, %v4628_v17  ;;  %1925 = vrot.lane.b32.xlu0 %v1860_v23, %s4260_s8  ;;  %v1769_v44 = vpop.f32.mrf.mxu3  ;;  %v5169_v53 = vsel %vm1186_vm3, %v1220_v11, %v1221_v48 }
 0x1a6   : > { %3782 = vmatmul.msk.f32.gmra.mxu1 %vm490_vm2, %v4596_v62 }
 0x1a8   : > { %v1609_v60 = vpop.f32.mrf.mxu2  ;;  %v1378_v56 = vpop.f32.mrf.mxu0 }
 0x1a9   : > { %v1701_v47 = vadd.f32 %v1609_v60, %v1492_v59 }
 0x1aa   : > { %3851 = vmatmul.msk.f32.gmra.mxu3 %vm490_vm2, %v5155_v13 }
 0x1ab   : > { %v1861_v9 = vadd.f32 %v1769_v44, %v1701_v47  ;;  %v1494_v23 = vpop.f32.mrf.mxu1  ;;  %3750 = vmatmul.msk.f32.gmra.mxu0 %vm490_vm2, %v5129_v41 }
 0x1ac   : > { %v1495_v62 = vadd.f32 %v1494_v23, %v1378_v56 }
 0x1ad   : > { %3817 = vmatmul.msk.f32.gmra.mxu2 %vm490_vm2, %v4645_v45  ;;  %1927 = vrot.lane.b32.xlu1 %v1861_v9, %s4260_s8  ;;  %v1772_v24 = vpop.f32.mrf.mxu3  ;;  %v5181_v9 = vsel %vm1186_vm3, %v1221_v48, 0.0 }
 0x1ae   : > { %3783 = vmatmul.msk.f32.gmra.mxu1 %vm490_vm2, %v4611_v2 }
 0x1b0   : > { %v1612_v50 = vpop.f32.mrf.mxu2  ;;  %v1381_v44 = vpop.f32.mrf.mxu0 }
 0x1b1   : > { %v1702_v59 = vadd.f32 %v1612_v50, %v1495_v62  ;;  %v1223_v50 = vrot.slane %v4696_v7, 1 }
 0x1b2   : > { %3852 = vmatmul.msk.f32.gmra.mxu3 %vm490_vm2, %v5169_v53 }
 0x1b3   : > { %v1862_v60 = vadd.f32 %v1772_v24, %v1702_v59  ;;  %v1497_v47 = vpop.f32.mrf.mxu1  ;;  %3751 = vmatmul.msk.f32.gmra.mxu0 %vm490_vm2, %v5143_v29  ;;  %v1224_v59 = vrot.slane %v4713_v57, 1 }
 0x1b4   : > { %v1498_v2 = vadd.f32 %v1497_v47, %v1381_v44 }
 0x1b5   : > { %3818 = vmatmul.msk.f32.gmra.mxu2 %vm490_vm2, %v4662_v5  ;;  %1929 = vrot.lane.b32.xlu1 %v1862_v60, %s4260_s8  ;;  %v1775_v56 = vpop.f32.mrf.mxu3  ;;  %v5195_v44 = vsel %vm1186_vm3, %v1223_v50, %v1224_v59 }
 0x1b6   : > { %3784 = vmatmul.msk.f32.gmra.mxu1 %vm490_vm2, %v4628_v17 }
 0x1b8   : > { %v1615_v11 = vpop.f32.mrf.mxu2  ;;  %v1384_v62 = vpop.f32.mrf.mxu0 }
 0x1b9   : > { %v1703_v23 = vadd.f32 %v1615_v11, %v1498_v2 }
 0x1ba   : > { %3853 = vmatmul.msk.f32.gmra.mxu3 %vm490_vm2, %v5181_v9 }
 0x1bb   : > { %v1863_v24 = vadd.f32 %v1775_v56, %v1703_v23  ;;  %v1500_v60 = vpop.f32.mrf.mxu1  ;;  %3752 = vmatmul.msk.f32.gmra.mxu0 %vm490_vm2, %v5155_v13 }
 0x1bc   : > { %v1501_v17 = vadd.f32 %v1500_v60, %v1384_v62 }
 0x1bd   : > { %3819 = vmatmul.msk.f32.gmra.mxu2 %vm490_vm2, %v4679_v33  ;;  %1931 = vrot.lane.b32.xlu2 %v1863_v24, %s4260_s8  ;;  %v1778_v48 = vpop.f32.mrf.mxu3  ;;  %v5207_v24 = vsel %vm1186_vm3, %v1224_v59, 0.0 }
 0x1be   : > { %3785 = vmatmul.msk.f32.gmra.mxu1 %vm490_vm2, %v4645_v45 }
 0x1c0   : > { %v1618_v47 = vpop.f32.mrf.mxu2  ;;  %v1387_v56 = vpop.f32.mrf.mxu0 }
 0x1c1   : > { %v1704_v2 = vadd.f32 %v1618_v47, %v1501_v17  ;;  %v1226_v47 = vrot.slane %v4730_v15, 1 }
 0x1c2   : > { %3854 = vmatmul.msk.f32.gmra.mxu3 %vm490_vm2, %v5195_v44 }
 0x1c3   : > { %v1864_v11 = vadd.f32 %v1778_v48, %v1704_v2  ;;  %v1503_v23 = vpop.f32.mrf.mxu1  ;;  %3753 = vmatmul.msk.f32.gmra.mxu0 %vm490_vm2, %v5169_v53  ;;  %v1227_v2 = vrot.slane %v4747_v1, 1 }
 0x1c4   : > { %v1504_v45 = vadd.f32 %v1503_v23, %v1387_v56 }
 0x1c5   : > { %3820 = vmatmul.msk.f32.gmra.mxu2 %vm490_vm2, %v4696_v7  ;;  %1933 = vrot.lane.b32.xlu2 %v1864_v11, %s4260_s8  ;;  %v1781_v62 = vpop.f32.mrf.mxu3  ;;  %v5221_v56 = vsel %vm1186_vm3, %v1226_v47, %v1227_v2 }
 0x1c6   : > { %3786 = vmatmul.msk.f32.gmra.mxu1 %vm490_vm2, %v4662_v5 }
 0x1c8   : > { %v1621_v50 = vpop.f32.mrf.mxu2  ;;  %v1390_v17 = vpop.f32.mrf.mxu0 }
 0x1c9   : > { %v1705_v60 = vadd.f32 %v1621_v50, %v1504_v45 }
 0x1ca   : > { %3855 = vmatmul.msk.f32.gmra.mxu3 %vm490_vm2, %v5207_v24 }
 0x1cb   : > { %v1865_v48 = vadd.f32 %v1781_v62, %v1705_v60  ;;  %v1506_v11 = vpop.f32.mrf.mxu1  ;;  %3754 = vmatmul.msk.f32.gmra.mxu0 %vm490_vm2, %v5181_v9 }
 0x1cc   : > { %v1507_v5 = vadd.f32 %v1506_v11, %v1390_v17 }
 0x1cd   : > { %3821 = vmatmul.msk.f32.gmra.mxu2 %vm490_vm2, %v4713_v57  ;;  %1935 = vrot.lane.b32.xlu0 %v1865_v48, %s4260_s8  ;;  %v1784_v59 = vpop.f32.mrf.mxu3  ;;  %v5233_v48 = vsel %vm1186_vm3, %v1227_v2, 0.0 }
 0x1ce   : > { %3787 = vmatmul.msk.f32.gmra.mxu1 %vm490_vm2, %v4679_v33 }
 0x1d0   : > { %v1624_v23 = vpop.f32.mrf.mxu2  ;;  %v1393_v62 = vpop.f32.mrf.mxu0 }
 0x1d1   : > { %v1706_v45 = vadd.f32 %v1624_v23, %v1507_v5  ;;  %v1229_v23 = vrot.slane %v4764_v55, 1 }
 0x1d2   : > { %3856 = vmatmul.msk.f32.gmra.mxu3 %vm490_vm2, %v5221_v56 }
 0x1d3   : > { %v1866_v50 = vadd.f32 %v1784_v59, %v1706_v45  ;;  %v1509_v60 = vpop.f32.mrf.mxu1  ;;  %3755 = vmatmul.msk.f32.gmra.mxu0 %vm490_vm2, %v5195_v44  ;;  %v1230_v45 = vrot.slane %v4781_v52, 1 }
 0x1d4   : > { %v1510_v33 = vadd.f32 %v1509_v60, %v1393_v62 }
 0x1d5   : > { %3822 = vmatmul.msk.f32.gmra.mxu2 %vm490_vm2, %v4730_v15  ;;  %1937 = vrot.lane.b32.xlu1 %v1866_v50, %s4260_s8  ;;  %v1787_v17 = vpop.f32.mrf.mxu3  ;;  %v5247_v62 = vsel %vm1186_vm3, %v1229_v23, %v1230_v45 }
 0x1d6   : > { %3788 = vmatmul.msk.f32.gmra.mxu1 %vm490_vm2, %v4696_v7 }
 0x1d8   : > { %v1627_v47 = vpop.f32.mrf.mxu2  ;;  %v1396_v5 = vpop.f32.mrf.mxu0 }
 0x1d9   : > { %v1707_v11 = vadd.f32 %v1627_v47, %v1510_v33 }
 0x1da   : > { %3857 = vmatmul.msk.f32.gmra.mxu3 %vm490_vm2, %v5233_v48 }
 0x1db   : > { %v1867_v59 = vadd.f32 %v1787_v17, %v1707_v11  ;;  %v1512_v50 = vpop.f32.mrf.mxu1  ;;  %3756 = vmatmul.msk.f32.gmra.mxu0 %vm490_vm2, %v5207_v24 }
 0x1dc   : > { %v1513_v7 = vadd.f32 %v1512_v50, %v1396_v5 }
 0x1dd   : > { %3823 = vmatmul.msk.f32.gmra.mxu2 %vm490_vm2, %v4747_v1  ;;  %1939 = vrot.lane.b32.xlu2 %v1867_v59, %s4260_s8  ;;  %v1790_v2 = vpop.f32.mrf.mxu3  ;;  %v5259_v59 = vsel %vm1186_vm3, %v1230_v45, 0.0 }
 0x1de   : > { %3789 = vmatmul.msk.f32.gmra.mxu1 %vm490_vm2, %v4713_v57  ;;  %6555 = vst [vmem:[#allocation50_spill] sm:$0xff] %v5259_v59 }
 0x1e0   : > { %v1630_v60 = vpop.f32.mrf.mxu2  ;;  %v1399_v17 = vpop.f32.mrf.mxu0 }
 0x1e1   : > { %v1708_v33 = vadd.f32 %v1630_v60, %v1513_v7  ;;  %v1232_v60 = vrot.slane %v4798_v46, 1 }
 0x1e2   : > { %3858 = vmatmul.msk.f32.gmra.mxu3 %vm490_vm2, %v5247_v62 }
 0x1e3   : > { %v1868_v47 = vadd.f32 %v1790_v2, %v1708_v33  ;;  %v1515_v11 = vpop.f32.mrf.mxu1  ;;  %3757 = vmatmul.msk.f32.gmra.mxu0 %vm490_vm2, %v5221_v56  ;;  %v1233_v33 = vrot.slane %v4815_v51, 1 }
 0x1e4   : > { %v1516_v57 = vadd.f32 %v1515_v11, %v1399_v17 }
 0x1e5   : > { %3824 = vmatmul.msk.f32.gmra.mxu2 %vm490_vm2, %v4764_v55  ;;  %1941 = vrot.lane.b32.xlu0 %v1868_v47, %s4260_s8  ;;  %v1793_v5 = vpop.f32.mrf.mxu3  ;;  %v5273_v17 = vsel %vm1186_vm3, %v1232_v60, %v1233_v33  ;;  %v4102_v60 = vld [vmem:[%s6420_s3 + $0x3c] sm:$0xf] }
 0x1e6   : > { %3790 = vmatmul.msk.f32.gmra.mxu1 %vm490_vm2, %v4730_v15  ;;  %4103 = vmatpush.msk.msrb.mxu3 %vm555_vm0, %v4102_v60 }
 0x1e8   : > { %v1633_v23 = vpop.f32.mrf.mxu2  ;;  %v1402_v7 = vpop.f32.mrf.mxu0 }
 0x1e9   : > { %v1709_v50 = vadd.f32 %v1633_v23, %v1516_v57 }
 0x1ea   : > { %3859 = vmatmul.msk.f32.gmra.mxu3 %vm490_vm2, %v5259_v59 }
 0x1eb   : > { %v1869_v2 = vadd.f32 %v1793_v5, %v1709_v50  ;;  %v1518_v47 = vpop.f32.mrf.mxu1  ;;  %3758 = vmatmul.msk.f32.gmra.mxu0 %vm490_vm2, %v5233_v48 }
 0x1ec   : > { %v1519_v15 = vadd.f32 %v1518_v47, %v1402_v7  ;;  %v5293_v47 = vsel %vm1186_vm3, %v1233_v33, 0.0  ;;  %v4000_v33 = vld [vmem:[%s6420_s3 + $0x30] sm:$0xf] }
 0x1ed   : > { %3825 = vmatmul.msk.f32.gmra.mxu2 %vm490_vm2, %v4781_v52  ;;  %1943 = vrot.lane.b32.xlu1 %v1869_v2, %s4260_s8  ;;  %v1796_v45 = vpop.f32.mrf.mxu3  ;;  %v4068_v2 = vld [vmem:[%s6420_s3 + $0x38] sm:$0xf] }
 0x1ee   : > { %3791 = vmatmul.msk.f32.gmra.mxu1 %vm490_vm2, %v4747_v1  ;;  %4069 = vmatpush.msk.msrb.mxu2 %vm555_vm0, %v4068_v2 }
 0x1ef   : > { %4035 = vmatpush.msk.msrb.mxu1 %vm555_vm0, %v4000_v33 }
 0x1f0   : > { %v1636_v11 = vpop.f32.mrf.mxu2  ;;  %v1405_v5 = vpop.f32.mrf.mxu0 }
 0x1f1   : > { %v1710_v57 = vadd.f32 %v1636_v11, %v1519_v15 }
 0x1f2   : > { %3860 = vmatmul.msk.f32.gmra.mxu3 %vm490_vm2, %v5273_v17 }
 0x1f3   : > { %v1870_v23 = vadd.f32 %v1796_v45, %v1710_v57  ;;  %v1521_v50 = vpop.f32.mrf.mxu1  ;;  %3759 = vmatmul.msk.f32.gmra.mxu0 %vm490_vm2, %v5247_v62 }
 0x1f4   : > { %v1522_v1 = vadd.f32 %v1521_v50, %v1405_v5  ;;  %v1731_v5 = vrot.slane %v4847_v61, 1 }
 0x1f5   : > { %3826 = vmatmul.msk.f32.gmra.mxu2 %vm490_vm2, %v4798_v46  ;;  %1945 = vrot.lane.b32.xlu2 %v1870_v23, %s4260_s8  ;;  %v1799_v7 = vpop.f32.mrf.mxu3  ;;  %v1732_v23 = vrot.slane %v4865_v3, 1 }
 0x1f6   : > { %3792 = vmatmul.msk.f32.gmra.mxu1 %vm490_vm2, %v4764_v55  ;;  %v4001_v55 = vld [vmem:[%s6420_s3 + $0x34] sm:$0xf] }
 0x1f7   : > { %4002 = vmatpush.msk.msrb.mxu0 %vm555_vm0, %v4001_v55  ;;  %v5315_v2 = vsel %vm1186_vm3, %v1731_v5, %v1732_v23  ;;  %v5327_v5 = vsel %vm1186_vm3, %v1732_v23, 0.0 }
 0x1f8   : > { %v1639_v15 = vpop.f32.mrf.mxu2  ;;  %v1408_v11 = vpop.f32.mrf.mxu0  ;;  %6556 = vst [vmem:[#allocation51_spill] sm:$0xff] %v5315_v2 }
 0x1f9   : > { %v1711_v45 = vadd.f32 %v1639_v15, %v1522_v1  ;;  %6557 = vst [vmem:[#allocation52_spill] sm:$0xff] %v5327_v5 }
 0x1fa   : > { %3861 = vmatmul.msk.f32.gmra.mxu3 %vm490_vm2, %v5293_v47 }
 0x1fb   : > { %v1871_v57 = vadd.f32 %v1799_v7, %v1711_v45  ;;  %v1524_v50 = vpop.f32.mrf.mxu1  ;;  %3760 = vmatmul.msk.f32.gmra.mxu0 %vm490_vm2, %v5259_v59 }
 0x1fc   : > { %v1525_v1 = vadd.f32 %v1524_v50, %v1408_v11 }
 0x1fd   : > { %3827 = vmatmul.msk.f32.gmra.mxu2 %vm490_vm2, %v4815_v51  ;;  %1947 = vrot.lane.b32.xlu0 %v1871_v57, %s4260_s8  ;;  %v1802_v7 = vpop.f32.mrf.mxu3 }
 0x1fe   : > { %3793 = vmatmul.msk.f32.gmra.mxu1 %vm490_vm2, %v4781_v52 }
 0x200   : > { %v1642_v60 = vpop.f32.mrf.mxu2  ;;  %v1411_v45 = vpop.f32.mrf.mxu0 }
 0x201   : > { %v1712_v15 = vadd.f32 %v1642_v60, %v1525_v1 }
 0x202   : > { %3862 = vmatmul.msk.f32.gmra.mxu3 %vm490_vm2, %v5315_v2  ;;  %v5585_v2 = vld [vmem:[%s4346_s16 + $0x78] sm:$0xff] }
 0x203   : > { %v1872_v59 = vadd.f32 %v1802_v7, %v1712_v15  ;;  %v1527_v11 = vpop.f32.mrf.mxu1  ;;  %3761 = vmatmul.msk.f32.gmra.mxu0 %vm490_vm2, %v5273_v17 }
 0x204   : > { %v1528_v52 = vadd.f32 %v1527_v11, %v1411_v45 }
 0x205   : > { %3828 = vmatmul.msk.f32.gmra.mxu2 %vm490_vm2, %v4847_v61  ;;  %1949 = vrot.lane.b32.xlu1 %v1872_v59, %s4260_s8  ;;  %v1805_v57 = vpop.f32.mrf.mxu3  ;;  %v5340_v61 = vld [vmem:[%s6421_s4] ss:$0 sm:$0xff] }
 0x206   : > { %3794 = vmatmul.msk.f32.gmra.mxu1 %vm490_vm2, %v4798_v46 }
 0x208   : > { %v1645_v50 = vpop.f32.mrf.mxu2  ;;  %v1414_v33 = vpop.f32.mrf.mxu0 }
 0x209   : > { %v1713_v55 = vadd.f32 %v1645_v50, %v1528_v52  ;;  %v5353_v52 = vld [vmem:[%s4346_s16 + $0x10] sm:$0xff]  ;;  %v5360_v50 = vld [vmem:[%s4346_s16] sm:$0xff] }
 0x20a   : > { %3863 = vmatmul.msk.f32.gmra.mxu3 %vm490_vm2, %v5327_v5  ;;  %v5568_v5 = vld [vmem:[%s4346_s16 + $0x70] sm:$0xff] }
 0x20b   : > { %v1873_v1 = vadd.f32 %v1805_v57, %v1713_v55  ;;  %v1530_v7 = vpop.f32.mrf.mxu1  ;;  %3762 = vmatmul.msk.f32.gmra.mxu0 %vm490_vm2, %v5293_v47 }
 0x20c   : > { %v1531_v46 = vadd.f32 %v1530_v7, %v1414_v33 }
 0x20d   : > { %3829 = vmatmul.msk.f32.gmra.mxu2 %vm490_vm2, %v4865_v3  ;;  %1951 = vrot.lane.b32.xlu2 %v1873_v1, %s4260_s8  ;;  %v1808_v59 = vpop.f32.mrf.mxu3 }
 0x20e   : > { %3795 = vmatmul.msk.f32.gmra.mxu1 %vm490_vm2, %v4815_v51 }
 0x20f   : > { %v1924_v23 = vpop.permute.xlu0 %1923 }
 0x210   : > { %v2019_v3 = vsel %vm490_vm2, %v4625_v16, %v1924_v23  ;;  %v1648_v60 = vpop.f32.mrf.mxu2  ;;  %v1417_v11 = vpop.f32.mrf.mxu0 }
 0x211   : > { %v2054_v15 = vadd.f32 %v5340_v61, %v2019_v3  ;;  %v1714_v45 = vadd.f32 %v1648_v60, %v1531_v46 }
 0x212   : > { %3968 = vmatmul.msk.f32.vlgmr.msra.gmra.mxu3 %vm490_vm2, %v5353_v52 }
 0x213   : > { %2087 = vst.msk [vmem:[%s5347_s28] sm:$0xff] %vm2086_vm4, %v2054_v15  ;;  %v1874_v51 = vadd.f32 %v1808_v59, %v1714_v45  ;;  %v1533_v57 = vpop.f32.mrf.mxu1  ;;  %3867 = vmatmul.msk.f32.vlgmr.msra.gmra.mxu0 %vm490_vm2, %v5360_v50  ;;  %v5376_v45 = vld [vmem:[%s4346_s16 + $0x18] sm:$0xff] }
 0x214   : > { %v1534_v16 = vadd.f32 %v1533_v57, %v1417_v11  ;;  %v5385_v11 = vld [vmem:[%s4346_s16 + $0x8] sm:$0xff] }
 0x215   : > { %3934 = vmatmul.msk.f32.vlgmr.msra.gmra.mxu2 %vm490_vm2, %v4396_v22  ;;  %1953 = vrot.lane.b32.xlu0 %v1874_v51, %s4260_s8  ;;  %v1811_v55 = vpop.f32.mrf.mxu3 }
 0x216   : > { %3900 = vmatmul.msk.f32.vlgmr.msra.gmra.mxu1 %vm490_vm2, %v4367_v12 }
 0x217   : > { %v1932_v33 = vpop.permute.xlu2 %1931  ;;  %v1926_v1 = vpop.permute.xlu0 %1925 }
 0x218   : > { %v2023_v7 = vsel %vm490_vm2, %v4693_v6, %v1932_v33  ;;  %v2020_v46 = vsel %vm490_vm2, %v4642_v42, %v1926_v1  ;;  %v1651_v59 = vpop.f32.mrf.mxu2  ;;  %v1420_v15 = vpop.f32.mrf.mxu0 }
 0x219   : > { %v2058_v23 = vadd.f32 %v5340_v61, %v2023_v7  ;;  %v2055_v3 = vadd.f32 %v5340_v61, %v2020_v46  ;;  %v1715_v60 = vadd.f32 %v1651_v59, %v1534_v16 }
 0x21a   : > { %3969 = vmatmul.msk.f32.gmra.mxu3 %vm490_vm2, %v5376_v45 }
 0x21b   : > { %2091 = vst.msk [vmem:[%s5347_s28 + $0x40] sm:$0xff] %vm2086_vm4, %v2058_v23  ;;  %v1875_v12 = vadd.f32 %v1811_v55, %v1715_v60  ;;  %v1536_v6 = vpop.f32.mrf.mxu1  ;;  %3868 = vmatmul.msk.f32.gmra.mxu0 %vm490_vm2, %v5385_v11 }
 0x21c   : > { %2088 = vst.msk [vmem:[%s5347_s28 + $0x8] sm:$0xff] %vm2086_vm4, %v2055_v3  ;;  %v1537_v42 = vadd.f32 %v1536_v6, %v1420_v15  ;;  %v5401_v3 = vld [vmem:[%s4346_s16 + $0x20] sm:$0xff] }
 0x21d   : > { %3935 = vmatmul.msk.f32.gmra.mxu2 %vm490_vm2, %v4411_v25  ;;  %1955 = vrot.lane.b32.xlu1 %v1875_v12, %s4260_s8  ;;  %v1814_v51 = vpop.f32.mrf.mxu3 }
 0x21e   : > { %3901 = vmatmul.msk.f32.gmra.mxu1 %vm490_vm2, %v4381_v18 }
 0x21f   : > { %v1934_v57 = vpop.permute.xlu2 %1933  ;;  %v1928_v16 = vpop.permute.xlu1 %1927 }
 0x220   : > { %v2024_v55 = vsel %vm490_vm2, %v4710_v54, %v1934_v57  ;;  %v2021_v33 = vsel %vm490_vm2, %v4659_v4, %v1928_v16  ;;  %v1654_v1 = vpop.f32.mrf.mxu2  ;;  %v1423_v23 = vpop.f32.mrf.mxu0  ;;  %v5420_v16 = vld [vmem:[%s4346_s16 + $0x28] sm:$0xff] }
 0x221   : > { %v2059_v7 = vadd.f32 %v5340_v61, %v2024_v55  ;;  %v2056_v46 = vadd.f32 %v5340_v61, %v2021_v33  ;;  %v1716_v59 = vadd.f32 %v1654_v1, %v1537_v42 }
 0x222   : > { %3970 = vmatmul.msk.f32.gmra.mxu3 %vm490_vm2, %v5401_v3 }
 0x223   : > { %2092 = vst.msk [vmem:[%s5347_s28 + $0x48] sm:$0xff] %vm2086_vm4, %v2059_v7  ;;  %v1876_v18 = vadd.f32 %v1814_v51, %v1716_v59  ;;  %v1539_v4 = vpop.f32.mrf.mxu1  ;;  %3869 = vmatmul.msk.f32.gmra.mxu0 %vm490_vm2, %v5353_v52  ;;  %v5434_v59 = vld [vmem:[%s4346_s16 + $0x30] sm:$0xff] }
 0x224   : > { %2089 = vst.msk [vmem:[%s5347_s28 + $0x20] sm:$0xff] %vm2086_vm4, %v2056_v46  ;;  %v1540_v54 = vadd.f32 %v1539_v4, %v1423_v23 }
 0x225   : > { %3936 = vmatmul.msk.f32.gmra.mxu2 %vm490_vm2, %v4426_v28  ;;  %1957 = vrot.lane.b32.xlu2 %v1876_v18, %s4260_s8  ;;  %v1817_v60 = vpop.f32.mrf.mxu3 }
 0x226   : > { %3902 = vmatmul.msk.f32.gmra.mxu1 %vm490_vm2, %v4396_v22 }
 0x227   : > { %v1930_v15 = vpop.permute.xlu1 %1929 }
 0x228   : > { %v2022_v12 = vsel %vm490_vm2, %v4676_v30, %v1930_v15  ;;  %v1657_v6 = vpop.f32.mrf.mxu2  ;;  %v1426_v57 = vpop.f32.mrf.mxu0 }
 0x229   : > { %v2057_v42 = vadd.f32 %v5340_v61, %v2022_v12  ;;  %v1717_v51 = vadd.f32 %v1657_v6, %v1540_v54 }
 0x22a   : > { %3971 = vmatmul.msk.f32.gmra.mxu3 %vm490_vm2, %v5420_v16 }
 0x22b   : > { %2090 = vst.msk [vmem:[%s5347_s28 + $0x28] sm:$0xff] %vm2086_vm4, %v2057_v42  ;;  %v1877_v55 = vadd.f32 %v1817_v60, %v1717_v51  ;;  %v1542_v33 = vpop.f32.mrf.mxu1  ;;  %3870 = vmatmul.msk.f32.gmra.mxu0 %vm490_vm2, %v5376_v45  ;;  %v6558_v60 = vld [vmem:[#allocation23_spill] sm:$0xff] }
 0x22c   : > { %v1543_v22 = vadd.f32 %v1542_v33, %v1426_v57  ;;  %v5449_v57 = vld [vmem:[%s4346_s16 + $0x38] sm:$0xff] }
 0x22d   : > { %3937 = vmatmul.msk.f32.gmra.mxu2 %vm490_vm2, %v4441_v31  ;;  %1959 = vrot.lane.b32.xlu0 %v1877_v55, %s4260_s8  ;;  %v1820_v30 = vpop.f32.mrf.mxu3 }
 0x22e   : > { %3903 = vmatmul.msk.f32.gmra.mxu1 %vm490_vm2, %v4411_v25 }
 0x230   : > { %v1660_v1 = vpop.f32.mrf.mxu2  ;;  %v1429_v46 = vpop.f32.mrf.mxu0 }
 0x231   : > { %v1718_v7 = vadd.f32 %v1660_v1, %v1543_v22 }
 0x232   : > { %3972 = vmatmul.msk.f32.gmra.mxu3 %vm490_vm2, %v5434_v59 }
 0x233   : > { %v1878_v23 = vadd.f32 %v1820_v30, %v1718_v7  ;;  %v1545_v18 = vpop.f32.mrf.mxu1  ;;  %3871 = vmatmul.msk.f32.gmra.mxu0 %vm490_vm2, %v5401_v3  ;;  %v6560_v7 = vld [vmem:[#allocation19_spill] sm:$0xff] }
 0x234   : > { %v1546_v25 = vadd.f32 %v1545_v18, %v1429_v46 }
 0x235   : > { %3938 = vmatmul.msk.f32.gmra.mxu2 %vm490_vm2, %v4456_v34  ;;  %1961 = vrot.lane.b32.xlu1 %v1878_v23, %s4260_s8  ;;  %v1823_v4 = vpop.f32.mrf.mxu3 }
 0x236   : > { %3904 = vmatmul.msk.f32.gmra.mxu1 %vm490_vm2, %v4426_v28  ;;  %v6559_v28 = vld [vmem:[#allocation2_spill] sm:$0xff] }
 0x237   : > { %v1940_v54 = vpop.permute.xlu2 %1939 }
 0x238   : > { %v2027_v15 = vsel %vm490_vm2, %v6558_v60, %v1940_v54  ;;  %v1663_v12 = vpop.f32.mrf.mxu2  ;;  %v1432_v51 = vpop.f32.mrf.mxu0  ;;  %v5466_v54 = vld [vmem:[%s4346_s16 + $0x40] sm:$0xff] }
 0x239   : > { %v2062_v6 = vadd.f32 %v5340_v61, %v2027_v15  ;;  %v1719_v42 = vadd.f32 %v1663_v12, %v1546_v25 }
 0x23a   : > { %3973 = vmatmul.msk.f32.gmra.mxu3 %vm490_vm2, %v5449_v57 }
 0x23b   : > { %2095 = vst.msk [vmem:[%s5347_s28 + $0x80] sm:$0xff] %vm2086_vm4, %v2062_v6  ;;  %v1879_v55 = vadd.f32 %v1823_v4, %v1719_v42  ;;  %v1548_v33 = vpop.f32.mrf.mxu1  ;;  %3872 = vmatmul.msk.f32.gmra.mxu0 %vm490_vm2, %v5420_v16 }
 0x23c   : > { %v1549_v22 = vadd.f32 %v1548_v33, %v1432_v51  ;;  %v6562_v51 = vld [vmem:[#allocation21_spill] sm:$0xff] }
 0x23d   : > { %3939 = vmatmul.msk.f32.gmra.mxu2 %vm490_vm2, %v6559_v28  ;;  %1963 = vrot.lane.b32.xlu2 %v1879_v55, %s4260_s8  ;;  %v1826_v30 = vpop.f32.mrf.mxu3 }
 0x23e   : > { %3905 = vmatmul.msk.f32.gmra.mxu1 %vm490_vm2, %v4441_v31  ;;  %v6561_v31 = vld [vmem:[#allocation3_spill] sm:$0xff] }
 0x23f   : > { %v1936_v1 = vpop.permute.xlu0 %1935 }
 0x240   : > { %v2025_v46 = vsel %vm490_vm2, %v6560_v7, %v1936_v1  ;;  %v1666_v23 = vpop.f32.mrf.mxu2  ;;  %v1435_v4 = vpop.f32.mrf.mxu0  ;;  %v5483_v7 = vld [vmem:[%s4346_s16 + $0x48] sm:$0xff] }
 0x241   : > { %v2060_v18 = vadd.f32 %v5340_v61, %v2025_v46  ;;  %v1720_v25 = vadd.f32 %v1666_v23, %v1549_v22 }
 0x242   : > { %3974 = vmatmul.msk.f32.gmra.mxu3 %vm490_vm2, %v5466_v54 }
 0x243   : > { %2093 = vst.msk [vmem:[%s5347_s28 + $0x60] sm:$0xff] %vm2086_vm4, %v2060_v18  ;;  %v1880_v60 = vadd.f32 %v1826_v30, %v1720_v25  ;;  %v1551_v15 = vpop.f32.mrf.mxu1  ;;  %3873 = vmatmul.msk.f32.gmra.mxu0 %vm490_vm2, %v5434_v59 }
 0x244   : > { %v1552_v12 = vadd.f32 %v1551_v15, %v1435_v4 }
 0x245   : > { %3940 = vmatmul.msk.f32.gmra.mxu2 %vm490_vm2, %v6561_v31  ;;  %1965 = vrot.lane.b32.xlu0 %v1880_v60, %s4260_s8  ;;  %v1829_v6 = vpop.f32.mrf.mxu3  ;;  %v6564_v60 = vld [vmem:[#allocation29_spill] sm:$0xff] }
 0x246   : > { %3906 = vmatmul.msk.f32.gmra.mxu1 %vm490_vm2, %v4456_v34  ;;  %v6563_v34 = vld [vmem:[#allocation4_spill] sm:$0xff] }
 0x247   : > { %v1938_v42 = vpop.permute.xlu1 %1937 }
 0x248   : > { %v2026_v55 = vsel %vm490_vm2, %v6562_v51, %v1938_v42  ;;  %v1669_v33 = vpop.f32.mrf.mxu2  ;;  %v1438_v1 = vpop.f32.mrf.mxu0 }
 0x249   : > { %v2061_v22 = vadd.f32 %v5340_v61, %v2026_v55  ;;  %v1721_v30 = vadd.f32 %v1669_v33, %v1552_v12  ;;  %v5500_v55 = vld [vmem:[%s4346_s16 + $0x50] sm:$0xff] }
 0x24a   : > { %3975 = vmatmul.msk.f32.gmra.mxu3 %vm490_vm2, %v5483_v7 }
 0x24b   : > { %2094 = vst.msk [vmem:[%s5347_s28 + $0x68] sm:$0xff] %vm2086_vm4, %v2061_v22  ;;  %v1881_v46 = vadd.f32 %v1829_v6, %v1721_v30  ;;  %v1554_v23 = vpop.f32.mrf.mxu1  ;;  %3874 = vmatmul.msk.f32.gmra.mxu0 %vm490_vm2, %v5449_v57 }
 0x24c   : > { %v1555_v18 = vadd.f32 %v1554_v23, %v1438_v1  ;;  %v6566_v23 = vld [vmem:[#allocation25_spill] sm:$0xff] }
 0x24d   : > { %3941 = vmatmul.msk.f32.gmra.mxu2 %vm490_vm2, %v6563_v34  ;;  %1967 = vrot.lane.b32.xlu1 %v1881_v46, %s4260_s8  ;;  %v1832_v25 = vpop.f32.mrf.mxu3 }
 0x24e   : > { %3907 = vmatmul.msk.f32.gmra.mxu1 %vm490_vm2, %v6559_v28  ;;  %v6565_v28 = vld [vmem:[#allocation5_spill] sm:$0xff] }
 0x24f   : > { %v1946_v4 = vpop.permute.xlu2 %1945 }
 0x250   : > { %v2030_v15 = vsel %vm490_vm2, %v6564_v60, %v1946_v4  ;;  %v1672_v12 = vpop.f32.mrf.mxu2  ;;  %v1441_v51 = vpop.f32.mrf.mxu0 }
 0x251   : > { %v2065_v6 = vadd.f32 %v5340_v61, %v2030_v15  ;;  %v1722_v42 = vadd.f32 %v1672_v12, %v1555_v18  ;;  %v5517_v12 = vld [vmem:[%s4346_s16 + $0x58] sm:$0xff] }
 0x252   : > { %3976 = vmatmul.msk.f32.gmra.mxu3 %vm490_vm2, %v5500_v55 }
 0x253   : > { %2098 = vst.msk [vmem:[%s5347_s28 + $0xa8] sm:$0xff] %vm2086_vm4, %v2065_v6  ;;  %v1882_v33 = vadd.f32 %v1832_v25, %v1722_v42  ;;  %v1557_v22 = vpop.f32.mrf.mxu1  ;;  %3875 = vmatmul.msk.f32.gmra.mxu0 %vm490_vm2, %v5466_v54 }
 0x254   : > { %v1558_v30 = vadd.f32 %v1557_v22, %v1441_v51 }
 0x255   : > { %3942 = vmatmul.msk.f32.gmra.mxu2 %vm490_vm2, %v6565_v28  ;;  %1969 = vrot.lane.b32.xlu2 %v1882_v33, %s4260_s8  ;;  %v1835_v1 = vpop.f32.mrf.mxu3 }
 0x256   : > { %3908 = vmatmul.msk.f32.gmra.mxu1 %vm490_vm2, %v6561_v31  ;;  %v6567_v31 = vld [vmem:[#allocation6_spill] sm:$0xff] }
 0x257   : > { %v1942_v46 = vpop.permute.xlu0 %1941 }
 0x258   : > { %v2028_v18 = vsel %vm490_vm2, %v6566_v23, %v1942_v46  ;;  %v1675_v25 = vpop.f32.mrf.mxu2  ;;  %v1444_v15 = vpop.f32.mrf.mxu0 }
 0x259   : > { %v2063_v4 = vadd.f32 %v5340_v61, %v2028_v18  ;;  %v1723_v60 = vadd.f32 %v1675_v25, %v1558_v30  ;;  %v6568_v30 = vld [vmem:[#allocation27_spill] sm:$0xff] }
 0x25a   : > { %3977 = vmatmul.msk.f32.gmra.mxu3 %vm490_vm2, %v5517_v12 }
 0x25b   : > { %2096 = vst.msk [vmem:[%s5347_s28 + $0x88] sm:$0xff] %vm2086_vm4, %v2063_v4  ;;  %v1883_v6 = vadd.f32 %v1835_v1, %v1723_v60  ;;  %v1560_v42 = vpop.f32.mrf.mxu1  ;;  %3876 = vmatmul.msk.f32.gmra.mxu0 %vm490_vm2, %v5483_v7  ;;  %v5534_v4 = vld [vmem:[%s4346_s16 + $0x60] sm:$0xff] }
 0x25c   : > { %v1561_v51 = vadd.f32 %v1560_v42, %v1444_v15 }
 0x25d   : > { %3943 = vmatmul.msk.f32.gmra.mxu2 %vm490_vm2, %v6567_v31  ;;  %1971 = vrot.lane.b32.xlu0 %v1883_v6, %s4260_s8  ;;  %v1838_v33 = vpop.f32.mrf.mxu3 }
 0x25e   : > { %3909 = vmatmul.msk.f32.gmra.mxu1 %vm490_vm2, %v6563_v34  ;;  %v6569_v34 = vld [vmem:[#allocation7_spill] sm:$0xff] }
 0x25f   : > { %v1944_v22 = vpop.permute.xlu1 %1943 }
 0x260   : > { %v2029_v46 = vsel %vm490_vm2, %v6568_v30, %v1944_v22  ;;  %v1678_v1 = vpop.f32.mrf.mxu2  ;;  %v1447_v25 = vpop.f32.mrf.mxu0  ;;  %v6570_v22 = vld [vmem:[#allocation33_spill] sm:$0xff] }
 0x261   : > { %v2064_v23 = vadd.f32 %v5340_v61, %v2029_v46  ;;  %v1724_v18 = vadd.f32 %v1678_v1, %v1561_v51 }
 0x262   : > { %3978 = vmatmul.msk.f32.gmra.mxu3 %vm490_vm2, %v5534_v4 }
 0x263   : > { %2097 = vst.msk [vmem:[%s5347_s28 + $0xa0] sm:$0xff] %vm2086_vm4, %v2064_v23  ;;  %v1884_v60 = vadd.f32 %v1838_v33, %v1724_v18  ;;  %v1563_v15 = vpop.f32.mrf.mxu1  ;;  %3877 = vmatmul.msk.f32.gmra.mxu0 %vm490_vm2, %v5500_v55  ;;  %v5551_v18 = vld [vmem:[%s4346_s16 + $0x68] sm:$0xff] }
 0x264   : > { %v1564_v6 = vadd.f32 %v1563_v15, %v1447_v25 }
 0x265   : > { %3944 = vmatmul.msk.f32.gmra.mxu2 %vm490_vm2, %v6569_v34  ;;  %1973 = vrot.lane.b32.xlu1 %v1884_v60, %s4260_s8  ;;  %v1841_v42 = vpop.f32.mrf.mxu3 }
 0x266   : > { %3910 = vmatmul.msk.f32.gmra.mxu1 %vm490_vm2, %v6565_v28  ;;  %v6571_v28 = vld [vmem:[#allocation8_spill] sm:$0xff] }
 0x267   : > { %v1952_v51 = vpop.permute.xlu2 %1951 }
 0x268   : > { %v2033_v30 = vsel %vm490_vm2, %v6570_v22, %v1952_v51  ;;  %v1681_v33 = vpop.f32.mrf.mxu2  ;;  %v1450_v23 = vpop.f32.mrf.mxu0  ;;  %v6572_v22 = vld [vmem:[#allocation30_spill] sm:$0xff] }
 0x269   : > { %v2068_v46 = vadd.f32 %v5340_v61, %v2033_v30  ;;  %v1725_v1 = vadd.f32 %v1681_v33, %v1564_v6 }
 0x26a   : > { %3979 = vmatmul.msk.f32.gmra.mxu3 %vm490_vm2, %v5551_v18 }
 0x26b   : > { %2101 = vst.msk [vmem:[%s5347_s28 + $0xe0] sm:$0xff] %vm2086_vm4, %v2068_v46  ;;  %v1885_v25 = vadd.f32 %v1841_v42, %v1725_v1  ;;  %v1566_v60 = vpop.f32.mrf.mxu1  ;;  %3878 = vmatmul.msk.f32.gmra.mxu0 %vm490_vm2, %v5517_v12 }
 0x26c   : > { %v1567_v15 = vadd.f32 %v1566_v60, %v1450_v23 }
 0x26d   : > { %3945 = vmatmul.msk.f32.gmra.mxu2 %vm490_vm2, %v6571_v28  ;;  %1975 = vrot.lane.b32.xlu2 %v1885_v25, %s4260_s8  ;;  %v1844_v6 = vpop.f32.mrf.mxu3 }
 0x26e   : > { %3911 = vmatmul.msk.f32.gmra.mxu1 %vm490_vm2, %v6567_v31  ;;  %v6573_v31 = vld [vmem:[#allocation9_spill] sm:$0xff] }
 0x26f   : > { %v1948_v51 = vpop.permute.xlu0 %1947 }
 0x270   : > { %v2031_v30 = vsel %vm490_vm2, %v6572_v22, %v1948_v51  ;;  %v1684_v42 = vpop.f32.mrf.mxu2  ;;  %v1453_v1 = vpop.f32.mrf.mxu0  ;;  %v6574_v22 = vld [vmem:[#allocation32_spill] sm:$0xff] }
 0x271   : > { %v2066_v33 = vadd.f32 %v5340_v61, %v2031_v30  ;;  %v1726_v46 = vadd.f32 %v1684_v42, %v1567_v15 }
 0x272   : > { %3980 = vmatmul.msk.f32.gmra.mxu3 %vm490_vm2, %v5568_v5 }
 0x273   : > { %2099 = vst.msk [vmem:[%s5347_s28 + $0xc0] sm:$0xff] %vm2086_vm4, %v2066_v33  ;;  %v1886_v23 = vadd.f32 %v1844_v6, %v1726_v46  ;;  %v1569_v25 = vpop.f32.mrf.mxu1  ;;  %3879 = vmatmul.msk.f32.gmra.mxu0 %vm490_vm2, %v5534_v4 }
 0x274   : > { %v1570_v60 = vadd.f32 %v1569_v25, %v1453_v1 }
 0x275   : > { %3946 = vmatmul.msk.f32.gmra.mxu2 %vm490_vm2, %v6573_v31  ;;  %1977 = vrot.lane.b32.xlu0 %v1886_v23, %s4260_s8  ;;  %v1847_v15 = vpop.f32.mrf.mxu3 }
 0x276   : > { %3912 = vmatmul.msk.f32.gmra.mxu1 %vm490_vm2, %v6569_v34  ;;  %v6575_v34 = vld [vmem:[#allocation10_spill] sm:$0xff] }
 0x277   : > { %v1950_v51 = vpop.permute.xlu1 %1949 }
 0x278   : > { %v2032_v30 = vsel %vm490_vm2, %v6574_v22, %v1950_v51  ;;  %v1687_v6 = vpop.f32.mrf.mxu2  ;;  %v1456_v46 = vpop.f32.mrf.mxu0 }
 0x279   : > { %v2067_v42 = vadd.f32 %v5340_v61, %v2032_v30  ;;  %v1727_v33 = vadd.f32 %v1687_v6, %v1570_v60 }
 0x27a   : > { %3981 = vmatmul.msk.f32.gmra.mxu3 %vm490_vm2, %v5585_v2 }
 0x27b   : > { %2100 = vst.msk [vmem:[%s5347_s28 + $0xc8] sm:$0xff] %vm2086_vm4, %v2067_v42  ;;  %v1887_v1 = vadd.f32 %v1847_v15, %v1727_v33  ;;  %v1572_v23 = vpop.f32.mrf.mxu1  ;;  %3880 = vmatmul.msk.f32.gmra.mxu0 %vm490_vm2, %v5551_v18  ;;  %v5602_v33 = vld [vmem:[%s4346_s16 + $0x80] sm:$0xff] }
 0x27c   : > { %v1573_v25 = vadd.f32 %v1572_v23, %v1456_v46 }
 0x27d   : > { %3947 = vmatmul.msk.f32.gmra.mxu2 %vm490_vm2, %v6575_v34  ;;  %1979 = vrot.lane.b32.xlu1 %v1887_v1, %s4260_s8  ;;  %v1850_v60 = vpop.f32.mrf.mxu3 }
 0x27e   : > { %3913 = vmatmul.msk.f32.gmra.mxu1 %vm490_vm2, %v6571_v28 }
 0x27f   : > { %v1958_v51 = vpop.permute.xlu2 %1957 }
 0x280   : > { %v2036_v22 = vsel %vm490_vm2, %v4924_v49, %v1958_v51  ;;  %v1690_v15 = vpop.f32.mrf.mxu2  ;;  %v1459_v42 = vpop.f32.mrf.mxu0  ;;  %v6576_v49 = vld [vmem:[#allocation11_spill] sm:$0xff] }
 0x281   : > { %v2071_v30 = vadd.f32 %v5340_v61, %v2036_v22  ;;  %v1728_v6 = vadd.f32 %v1690_v15, %v1573_v25 }
 0x282   : > { %3982 = vmatmul.msk.f32.gmra.mxu3 %vm490_vm2, %v5602_v33 }
 0x283   : > { %2104 = vst.msk [vmem:[%s5347_s28 + $0x108] sm:$0xff] %vm2086_vm4, %v2071_v30  ;;  %v1888_v46 = vadd.f32 %v1850_v60, %v1728_v6  ;;  %v1575_v1 = vpop.f32.mrf.mxu1  ;;  %3881 = vmatmul.msk.f32.gmra.mxu0 %vm490_vm2, %v5568_v5  ;;  %v5619_v6 = vld [vmem:[%s4346_s16 + $0x88] sm:$0xff] }
 0x284   : > { %v1576_v28 = vadd.f32 %v1575_v1, %v1459_v42 }
 0x285   : > { %3948 = vmatmul.msk.f32.gmra.mxu2 %vm490_vm2, %v6576_v49  ;;  %1981 = vrot.lane.b32.xlu2 %v1888_v46, %s4260_s8  ;;  %v1853_v23 = vpop.f32.mrf.mxu3 }
 0x286   : > { %3914 = vmatmul.msk.f32.gmra.mxu1 %vm490_vm2, %v6573_v31 }
 0x287   : > { %v1954_v25 = vpop.permute.xlu0 %1953 }
 0x288   : > { %v2034_v51 = vsel %vm490_vm2, %v4897_v37, %v1954_v25  ;;  %v1693_v60 = vpop.f32.mrf.mxu2  ;;  %v1462_v30 = vpop.f32.mrf.mxu0  ;;  %v6577_v37 = vld [vmem:[#allocation12_spill] sm:$0xff] }
 0x289   : > { %v2069_v22 = vadd.f32 %v5340_v61, %v2034_v51  ;;  %v1729_v15 = vadd.f32 %v1693_v60, %v1576_v28 }
 0x28a   : > { %3983 = vmatmul.msk.f32.gmra.mxu3 %vm490_vm2, %v5619_v6 }
 0x28b   : > { %2102 = vst.msk [vmem:[%s5347_s28 + $0xe8] sm:$0xff] %vm2086_vm4, %v2069_v22  ;;  %v1889_v42 = vadd.f32 %v1853_v23, %v1729_v15  ;;  %v1578_v46 = vpop.f32.mrf.mxu1  ;;  %3882 = vmatmul.msk.f32.gmra.mxu0 %vm490_vm2, %v5585_v2  ;;  %v5636_v15 = vld [vmem:[%s4346_s16 + $0x90] sm:$0xff] }
 0x28c   : > { %v1579_v31 = vadd.f32 %v1578_v46, %v1462_v30 }
 0x28d   : > { %3949 = vmatmul.msk.f32.gmra.mxu2 %vm490_vm2, %v6577_v37  ;;  %1983 = vrot.lane.b32.xlu0 %v1889_v42, %s4260_s8  ;;  %v1856_v1 = vpop.f32.mrf.mxu3 }
 0x28e   : > { %3915 = vmatmul.msk.f32.gmra.mxu1 %vm490_vm2, %v6575_v34 }
 0x28f   : > { %v1956_v28 = vpop.permute.xlu1 %1955 }
 0x290   : > { %v2035_v25 = vsel %vm490_vm2, %v4910_v39, %v1956_v28  ;;  %v1696_v23 = vpop.f32.mrf.mxu2  ;;  %v2143_v22 = vpop.f32.mrf.mxu0  ;;  %v6578_v39 = vld [vmem:[#allocation13_spill] sm:$0xff] }
 0x291   : > { %v2070_v51 = vadd.f32 %v5340_v61, %v2035_v25  ;;  %v1730_v60 = vadd.f32 %v1696_v23, %v1579_v31 }
 0x292   : > { %3984 = vmatmul.msk.f32.gmra.mxu3 %vm490_vm2, %v5636_v15 }
 0x293   : > { %2103 = vst.msk [vmem:[%s5347_s28 + $0x100] sm:$0xff] %vm2086_vm4, %v2070_v51  ;;  %v1890_v30 = vadd.f32 %v1856_v1, %v1730_v60  ;;  %v2259_v42 = vpop.f32.mrf.mxu1  ;;  %3883 = vmatmul.msk.f32.gmra.mxu0 %vm490_vm2, %v5602_v33  ;;  %v5653_v60 = vld [vmem:[%s4346_s16 + $0x98] sm:$0xff] }
 0x294   : > { %v2260_v34 = vadd.f32 %v2259_v42, %v2143_v22 }
 0x295   : > { %3950 = vmatmul.msk.f32.gmra.mxu2 %vm490_vm2, %v6578_v39  ;;  %1985 = vrot.lane.b32.xlu1 %v1890_v30, %s4260_s8  ;;  %v2543_v46 = vpop.f32.mrf.mxu3 }
 0x296   : > { %3916 = vmatmul.msk.f32.gmra.mxu1 %vm490_vm2, %v6576_v49 }
 0x297   : > { %v1964_v31 = vpop.permute.xlu2 %1963 }
 0x298   : > { %v2039_v28 = vsel %vm490_vm2, %v4965_v58, %v1964_v31  ;;  %v2389_v1 = vpop.f32.mrf.mxu2  ;;  %v2146_v51 = vpop.f32.mrf.mxu0  ;;  %v6580_v58 = vld [vmem:[#allocation14_spill] sm:$0xff] }
 0x299   : > { %v2074_v25 = vadd.f32 %v5340_v61, %v2039_v28  ;;  %v2485_v23 = vadd.f32 %v2389_v1, %v2260_v34 }
 0x29a   : > { %3985 = vmatmul.msk.f32.gmra.mxu3 %vm490_vm2, %v5653_v60 }
 0x29b   : > { %2107 = vst.msk [vmem:[%s5347_s28 + $0x140] sm:$0xff] %vm2086_vm4, %v2074_v25  ;;  %v5659_v22 = vadd.f32 %v2543_v46, %v2485_v23  ;;  %v2262_v49 = vpop.f32.mrf.mxu1  ;;  %3884 = vmatmul.msk.f32.gmra.mxu0 %vm490_vm2, %v5619_v6  ;;  %v5671_v23 = vld [vmem:[%s4346_s16 + $0xa0] sm:$0xff] }
 0x29c   : > { %v2263_v30 = vadd.f32 %v2262_v49, %v2146_v51 }
 0x29d   : > { %6579 = vst [vmem:[#allocation23_spill] sm:$0xff] %v5659_v22  ;;  %3951 = vmatmul.msk.f32.gmra.mxu2 %vm490_vm2, %v6580_v58  ;;  %v2546_v42 = vpop.f32.mrf.mxu3 }
 0x29e   : > { %3917 = vmatmul.msk.f32.gmra.mxu1 %vm490_vm2, %v6577_v37 }
 0x29f   : > { %v1960_v34 = vpop.permute.xlu0 %1959 }
 0x2a0   : > { %v2037_v31 = vsel %vm490_vm2, %v4937_v21, %v1960_v34  ;;  %v2392_v28 = vpop.f32.mrf.mxu2  ;;  %v2149_v25 = vpop.f32.mrf.mxu0  ;;  %v6582_v21 = vld [vmem:[#allocation15_spill] sm:$0xff] }
 0x2a1   : > { %v2072_v46 = vadd.f32 %v5340_v61, %v2037_v31  ;;  %v2486_v1 = vadd.f32 %v2392_v28, %v2263_v30 }
 0x2a2   : > { %3986 = vmatmul.msk.f32.gmra.mxu3 %vm490_vm2, %v5671_v23 }
 0x2a3   : > { %2105 = vst.msk [vmem:[%s5347_s28 + $0x120] sm:$0xff] %vm2086_vm4, %v2072_v46  ;;  %v5677_v51 = vadd.f32 %v2546_v42, %v2486_v1  ;;  %v2265_v37 = vpop.f32.mrf.mxu1  ;;  %3885 = vmatmul.msk.f32.gmra.mxu0 %vm490_vm2, %v5636_v15 }
 0x2a4   : > { %v2266_v49 = vadd.f32 %v2265_v37, %v2149_v25 }
 0x2a5   : > { %6581 = vst [vmem:[#allocation2_spill] sm:$0xff] %v5677_v51  ;;  %3952 = vmatmul.msk.f32.gmra.mxu2 %vm490_vm2, %v6582_v21  ;;  %v2549_v30 = vpop.f32.mrf.mxu3  ;;  %v5689_v51 = vld [vmem:[%s4346_s16 + $0xa8] sm:$0xff] }
 0x2a6   : > { %3918 = vmatmul.msk.f32.gmra.mxu1 %vm490_vm2, %v6578_v39 }
 0x2a7   : > { %v1962_v34 = vpop.permute.xlu1 %1961 }
 0x2a8   : > { %v2038_v31 = vsel %vm490_vm2, %v4952_v10, %v1962_v34  ;;  %v2395_v28 = vpop.f32.mrf.mxu2  ;;  %v2152_v1 = vpop.f32.mrf.mxu0  ;;  %v6584_v10 = vld [vmem:[#allocation16_spill] sm:$0xff] }
 0x2a9   : > { %v2073_v42 = vadd.f32 %v5340_v61, %v2038_v31  ;;  %v2487_v46 = vadd.f32 %v2395_v28, %v2266_v49 }
 0x2aa   : > { %3987 = vmatmul.msk.f32.gmra.mxu3 %vm490_vm2, %v5689_v51 }
 0x2ab   : > { %2106 = vst.msk [vmem:[%s5347_s28 + $0x128] sm:$0xff] %vm2086_vm4, %v2073_v42  ;;  %v5695_v25 = vadd.f32 %v2549_v30, %v2487_v46  ;;  %v2268_v39 = vpop.f32.mrf.mxu1  ;;  %3886 = vmatmul.msk.f32.gmra.mxu0 %vm490_vm2, %v5653_v60 }
 0x2ac   : > { %v2269_v37 = vadd.f32 %v2268_v39, %v2152_v1 }
 0x2ad   : > { %6583 = vst [vmem:[#allocation19_spill] sm:$0xff] %v5695_v25  ;;  %3953 = vmatmul.msk.f32.gmra.mxu2 %vm490_vm2, %v6584_v10  ;;  %v2552_v49 = vpop.f32.mrf.mxu3  ;;  %v5707_v25 = vld [vmem:[%s4346_s16 + $0xb0] sm:$0xff] }
 0x2ae   : > { %3919 = vmatmul.msk.f32.gmra.mxu1 %vm490_vm2, %v6580_v58 }
 0x2af   : > { %v1970_v34 = vpop.permute.xlu2 %1969 }
 0x2b0   : > { %v2042_v31 = vsel %vm490_vm2, %v5008_v19, %v1970_v34  ;;  %v2398_v28 = vpop.f32.mrf.mxu2  ;;  %v2155_v46 = vpop.f32.mrf.mxu0  ;;  %v6586_v19 = vld [vmem:[#allocation17_spill] sm:$0xff] }
 0x2b1   : > { %v2077_v30 = vadd.f32 %v5340_v61, %v2042_v31  ;;  %v2488_v42 = vadd.f32 %v2398_v28, %v2269_v37 }
 0x2b2   : > { %3988 = vmatmul.msk.f32.gmra.mxu3 %vm490_vm2, %v5707_v25 }
 0x2b3   : > { %2110 = vst.msk [vmem:[%s5347_s28 + $0x168] sm:$0xff] %vm2086_vm4, %v2077_v30  ;;  %v5713_v1 = vadd.f32 %v2552_v49, %v2488_v42  ;;  %v2271_v58 = vpop.f32.mrf.mxu1  ;;  %3887 = vmatmul.msk.f32.gmra.mxu0 %vm490_vm2, %v5671_v23 }
 0x2b4   : > { %v2272_v39 = vadd.f32 %v2271_v58, %v2155_v46 }
 0x2b5   : > { %6585 = vst [vmem:[#allocation3_spill] sm:$0xff] %v5713_v1  ;;  %3954 = vmatmul.msk.f32.gmra.mxu2 %vm490_vm2, %v6586_v19  ;;  %v2555_v37 = vpop.f32.mrf.mxu3  ;;  %v5725_v1 = vld [vmem:[%s4346_s16 + $0xb8] sm:$0xff] }
 0x2b6   : > { %3920 = vmatmul.msk.f32.gmra.mxu1 %vm490_vm2, %v6582_v21 }
 0x2b7   : > { %v1966_v34 = vpop.permute.xlu0 %1965 }
 0x2b8   : > { %v2040_v31 = vsel %vm490_vm2, %v4980_v8, %v1966_v34  ;;  %v2401_v28 = vpop.f32.mrf.mxu2  ;;  %v2158_v42 = vpop.f32.mrf.mxu0  ;;  %v6588_v8 = vld [vmem:[#allocation18_spill] sm:$0xff] }
 0x2b9   : > { %v2075_v49 = vadd.f32 %v5340_v61, %v2040_v31  ;;  %v2489_v30 = vadd.f32 %v2401_v28, %v2272_v39 }
 0x2ba   : > { %3989 = vmatmul.msk.f32.gmra.mxu3 %vm490_vm2, %v5725_v1 }
 0x2bb   : > { %2108 = vst.msk [vmem:[%s5347_s28 + $0x148] sm:$0xff] %vm2086_vm4, %v2075_v49  ;;  %v5731_v46 = vadd.f32 %v2555_v37, %v2489_v30  ;;  %v2274_v21 = vpop.f32.mrf.mxu1  ;;  %3888 = vmatmul.msk.f32.gmra.mxu0 %vm490_vm2, %v5689_v51 }
 0x2bc   : > { %v2275_v58 = vadd.f32 %v2274_v21, %v2158_v42 }
 0x2bd   : > { %6587 = vst [vmem:[#allocation21_spill] sm:$0xff] %v5731_v46  ;;  %3955 = vmatmul.msk.f32.gmra.mxu2 %vm490_vm2, %v6588_v8  ;;  %v2558_v39 = vpop.f32.mrf.mxu3  ;;  %v5743_v46 = vld [vmem:[%s4346_s16 + $0xc0] sm:$0xff] }
 0x2be   : > { %3921 = vmatmul.msk.f32.gmra.mxu1 %vm490_vm2, %v6584_v10 }
 0x2bf   : > { %v1968_v34 = vpop.permute.xlu1 %1967 }
 0x2c0   : > { %v2041_v31 = vsel %vm490_vm2, %v4993_v40, %v1968_v34  ;;  %v2404_v28 = vpop.f32.mrf.mxu2  ;;  %v2161_v30 = vpop.f32.mrf.mxu0  ;;  %v6590_v40 = vld [vmem:[#allocation20_spill] sm:$0xff] }
 0x2c1   : > { %v2076_v37 = vadd.f32 %v5340_v61, %v2041_v31  ;;  %v2490_v49 = vadd.f32 %v2404_v28, %v2275_v58 }
 0x2c2   : > { %3990 = vmatmul.msk.f32.gmra.mxu3 %vm490_vm2, %v5743_v46 }
 0x2c3   : > { %2109 = vst.msk [vmem:[%s5347_s28 + $0x160] sm:$0xff] %vm2086_vm4, %v2076_v37  ;;  %v5749_v42 = vadd.f32 %v2558_v39, %v2490_v49  ;;  %v2277_v10 = vpop.f32.mrf.mxu1  ;;  %3889 = vmatmul.msk.f32.gmra.mxu0 %vm490_vm2, %v5707_v25 }
 0x2c4   : > { %v2278_v21 = vadd.f32 %v2277_v10, %v2161_v30 }
 0x2c5   : > { %6589 = vst [vmem:[#allocation4_spill] sm:$0xff] %v5749_v42  ;;  %3956 = vmatmul.msk.f32.gmra.mxu2 %vm490_vm2, %v6590_v40  ;;  %v2561_v58 = vpop.f32.mrf.mxu3  ;;  %v5761_v42 = vld [vmem:[%s4346_s16 + $0xc8] sm:$0xff] }
 0x2c6   : > { %3922 = vmatmul.msk.f32.gmra.mxu1 %vm490_vm2, %v6586_v19 }
 0x2c7   : > { %v1976_v34 = vpop.permute.xlu2 %1975 }
 0x2c8   : > { %v2045_v31 = vsel %vm490_vm2, %v5049_v0, %v1976_v34  ;;  %v2407_v28 = vpop.f32.mrf.mxu2  ;;  %v2164_v49 = vpop.f32.mrf.mxu0  ;;  %v6592_v0 = vld [vmem:[#allocation22_spill] sm:$0xff] }
 0x2c9   : > { %v2080_v39 = vadd.f32 %v5340_v61, %v2045_v31  ;;  %v2491_v37 = vadd.f32 %v2407_v28, %v2278_v21 }
 0x2ca   : > { %3991 = vmatmul.msk.f32.gmra.mxu3 %vm490_vm2, %v5761_v42 }
 0x2cb   : > { %2113 = vst.msk [vmem:[%s5347_s28 + $0x1a0] sm:$0xff] %vm2086_vm4, %v2080_v39  ;;  %v5767_v30 = vadd.f32 %v2561_v58, %v2491_v37  ;;  %v2280_v19 = vpop.f32.mrf.mxu1  ;;  %3890 = vmatmul.msk.f32.gmra.mxu0 %vm490_vm2, %v5725_v1 }
 0x2cc   : > { %v2281_v10 = vadd.f32 %v2280_v19, %v2164_v49 }
 0x2cd   : > { %6591 = vst [vmem:[#allocation29_spill] sm:$0xff] %v5767_v30  ;;  %3957 = vmatmul.msk.f32.gmra.mxu2 %vm490_vm2, %v6592_v0  ;;  %v2564_v21 = vpop.f32.mrf.mxu3  ;;  %v5779_v30 = vld [vmem:[%s4346_s16 + $0xd0] sm:$0xff] }
 0x2ce   : > { %3923 = vmatmul.msk.f32.gmra.mxu1 %vm490_vm2, %v6588_v8 }
 0x2cf   : > { %v1972_v34 = vpop.permute.xlu0 %1971 }
 0x2d0   : > { %v2043_v31 = vsel %vm490_vm2, %v5021_v63, %v1972_v34  ;;  %v2410_v28 = vpop.f32.mrf.mxu2  ;;  %v2167_v37 = vpop.f32.mrf.mxu0  ;;  %v6594_v63 = vld [vmem:[#allocation24_spill] sm:$0xff] }
 0x2d1   : > { %v2078_v58 = vadd.f32 %v5340_v61, %v2043_v31  ;;  %v2492_v39 = vadd.f32 %v2410_v28, %v2281_v10 }
 0x2d2   : > { %3992 = vmatmul.msk.f32.gmra.mxu3 %vm490_vm2, %v5779_v30 }
 0x2d3   : > { %2111 = vst.msk [vmem:[%s5347_s28 + $0x180] sm:$0xff] %vm2086_vm4, %v2078_v58  ;;  %v5785_v49 = vadd.f32 %v2564_v21, %v2492_v39  ;;  %v2283_v8 = vpop.f32.mrf.mxu1  ;;  %3891 = vmatmul.msk.f32.gmra.mxu0 %vm490_vm2, %v5743_v46 }
 0x2d4   : > { %v2284_v19 = vadd.f32 %v2283_v8, %v2167_v37 }
 0x2d5   : > { %6593 = vst [vmem:[#allocation5_spill] sm:$0xff] %v5785_v49  ;;  %3958 = vmatmul.msk.f32.gmra.mxu2 %vm490_vm2, %v6594_v63  ;;  %v2567_v10 = vpop.f32.mrf.mxu3  ;;  %v5797_v49 = vld [vmem:[%s4346_s16 + $0xd8] sm:$0xff] }
 0x2d6   : > { %3924 = vmatmul.msk.f32.gmra.mxu1 %vm490_vm2, %v6590_v40 }
 0x2d7   : > { %v1974_v34 = vpop.permute.xlu1 %1973 }
 0x2d8   : > { %v2044_v31 = vsel %vm490_vm2, %v5036_v26, %v1974_v34  ;;  %v2413_v28 = vpop.f32.mrf.mxu2  ;;  %v2170_v39 = vpop.f32.mrf.mxu0  ;;  %v6596_v26 = vld [vmem:[#allocation26_spill] sm:$0xff] }
 0x2d9   : > { %v2079_v21 = vadd.f32 %v5340_v61, %v2044_v31  ;;  %v2493_v58 = vadd.f32 %v2413_v28, %v2284_v19 }
 0x2da   : > { %3993 = vmatmul.msk.f32.gmra.mxu3 %vm490_vm2, %v5797_v49 }
 0x2db   : > { %2112 = vst.msk [vmem:[%s5347_s28 + $0x188] sm:$0xff] %vm2086_vm4, %v2079_v21  ;;  %v5803_v37 = vadd.f32 %v2567_v10, %v2493_v58  ;;  %v2286_v40 = vpop.f32.mrf.mxu1  ;;  %3892 = vmatmul.msk.f32.gmra.mxu0 %vm490_vm2, %v5761_v42 }
 0x2dc   : > { %v2287_v8 = vadd.f32 %v2286_v40, %v2170_v39 }
 0x2dd   : > { %6595 = vst [vmem:[#allocation25_spill] sm:$0xff] %v5803_v37  ;;  %3959 = vmatmul.msk.f32.gmra.mxu2 %vm490_vm2, %v6596_v26  ;;  %v2570_v19 = vpop.f32.mrf.mxu3  ;;  %v5815_v37 = vld [vmem:[%s4346_s16 + $0xe0] sm:$0xff] }
 0x2de   : > { %3925 = vmatmul.msk.f32.gmra.mxu1 %vm490_vm2, %v6592_v0 }
 0x2df   : > { %v1982_v34 = vpop.permute.xlu2 %1981 }
 0x2e0   : > { %v2048_v31 = vsel %vm490_vm2, %v5092_v38, %v1982_v34  ;;  %v2416_v28 = vpop.f32.mrf.mxu2  ;;  %v2173_v58 = vpop.f32.mrf.mxu0  ;;  %v6598_v38 = vld [vmem:[#allocation28_spill] sm:$0xff] }
 0x2e1   : > { %v2083_v10 = vadd.f32 %v5340_v61, %v2048_v31  ;;  %v2494_v21 = vadd.f32 %v2416_v28, %v2287_v8 }
 0x2e2   : > { %3994 = vmatmul.msk.f32.gmra.mxu3 %vm490_vm2, %v5815_v37 }
 0x2e3   : > { %2116 = vst.msk [vmem:[%s5347_s28 + $0x1c8] sm:$0xff] %vm2086_vm4, %v2083_v10  ;;  %v5821_v39 = vadd.f32 %v2570_v19, %v2494_v21  ;;  %v2289_v0 = vpop.f32.mrf.mxu1  ;;  %3893 = vmatmul.msk.f32.gmra.mxu0 %vm490_vm2, %v5779_v30 }
 0x2e4   : > { %v2290_v40 = vadd.f32 %v2289_v0, %v2173_v58 }
 0x2e5   : > { %6597 = vst [vmem:[#allocation6_spill] sm:$0xff] %v5821_v39  ;;  %3960 = vmatmul.msk.f32.gmra.mxu2 %vm490_vm2, %v6598_v38  ;;  %v2573_v8 = vpop.f32.mrf.mxu3  ;;  %v5833_v39 = vld [vmem:[%s4346_s16 + $0xe8] sm:$0xff] }
 0x2e6   : > { %3926 = vmatmul.msk.f32.gmra.mxu1 %vm490_vm2, %v6594_v63 }
 0x2e7   : > { %v1978_v34 = vpop.permute.xlu0 %1977 }
 0x2e8   : > { %v2046_v31 = vsel %vm490_vm2, %v5064_v32, %v1978_v34  ;;  %v2419_v28 = vpop.f32.mrf.mxu2  ;;  %v2176_v21 = vpop.f32.mrf.mxu0 }
 0x2e9   : > { %v2081_v19 = vadd.f32 %v5340_v61, %v2046_v31  ;;  %v2495_v10 = vadd.f32 %v2419_v28, %v2290_v40 }
 0x2ea   : > { %3995 = vmatmul.msk.f32.gmra.mxu3 %vm490_vm2, %v5833_v39 }
 0x2eb   : > { %2114 = vst.msk [vmem:[%s5347_s28 + $0x1a8] sm:$0xff] %vm2086_vm4, %v2081_v19  ;;  %v5839_v58 = vadd.f32 %v2573_v8, %v2495_v10  ;;  %v2292_v63 = vpop.f32.mrf.mxu1  ;;  %3894 = vmatmul.msk.f32.gmra.mxu0 %vm490_vm2, %v5797_v49  ;;  %v5851_v10 = vld [vmem:[%s4346_s16 + $0xf0] sm:$0xff] }
 0x2ec   : > { %v2293_v32 = vadd.f32 %v2292_v63, %v2176_v21  ;;  %6600 = vst [vmem:[#allocation7_spill] sm:$0xff] %v5851_v10 }
 0x2ed   : > { %6599 = vst [vmem:[#allocation27_spill] sm:$0xff] %v5839_v58  ;;  %3961 = vmatmul.msk.f32.gmra.mxu2 %vm490_vm2, %v4839_v27  ;;  %v2576_v0 = vpop.f32.mrf.mxu3 }
 0x2ee   : > { %3927 = vmatmul.msk.f32.gmra.mxu1 %vm490_vm2, %v6596_v26 }
 0x2ef   : > { %v1980_v40 = vpop.permute.xlu1 %1979 }
 0x2f0   : > { %v2047_v34 = vsel %vm490_vm2, %v5077_v43, %v1980_v40  ;;  %v2422_v31 = vpop.f32.mrf.mxu2  ;;  %v2179_v19 = vpop.f32.mrf.mxu0  ;;  %v6602_v43 = vld [vmem:[#allocation31_spill] sm:$0xff] }
 0x2f1   : > { %v2082_v8 = vadd.f32 %v5340_v61, %v2047_v34  ;;  %v2496_v28 = vadd.f32 %v2422_v31, %v2293_v32  ;;  %v5871_v31 = vld [vmem:[%s4346_s16 + $0xf8] sm:$0xff] }
 0x2f2   : > { %3996 = vmatmul.msk.f32.gmra.mxu3 %vm490_vm2, %v5851_v10 }
 0x2f3   : > { %2115 = vst.msk [vmem:[%s5347_s28 + $0x1c0] sm:$0xff] %vm2086_vm4, %v2082_v8  ;;  %v5857_v21 = vadd.f32 %v2576_v0, %v2496_v28  ;;  %v2295_v26 = vpop.f32.mrf.mxu1  ;;  %3895 = vmatmul.msk.f32.gmra.mxu0 %vm490_vm2, %v5815_v37  ;;  %v5875_v8 = vld [vmem:[%s325_s6] sm:$0xff] }
 0x2f4   : > { %v2296_v63 = vadd.f32 %v2295_v26, %v2179_v19  ;;  %6603 = vst [vmem:[#allocation8_spill] sm:$0xff] %v5875_v8 }
 0x2f5   : > { %6601 = vst [vmem:[#allocation33_spill] sm:$0xff] %v5857_v21  ;;  %3962 = vmatmul.msk.f32.gmra.mxu2 %vm490_vm2, %v6602_v43  ;;  %v2579_v32 = vpop.f32.mrf.mxu3 }
 0x2f6   : > { %3928 = vmatmul.msk.f32.gmra.mxu1 %vm490_vm2, %v6598_v38 }
 0x2f8   : > { %v2425_v40 = vpop.f32.mrf.mxu2  ;;  %v2182_v34 = vpop.f32.mrf.mxu0 }
 0x2f9   : > { %v2497_v0 = vadd.f32 %v2425_v40, %v2296_v63  ;;  %v2357_v63 = vrot.slane %v5875_v8, 7 }
 0x2fa   : > { %3997 = vmatmul.msk.f32.gmra.mxu3 %vm490_vm2, %v5871_v31 }
 0x2fb   : > { %v5877_v28 = vadd.f32 %v2579_v32, %v2497_v0  ;;  %v2298_v19 = vpop.f32.mrf.mxu1  ;;  %3896 = vmatmul.msk.f32.gmra.mxu0 %vm490_vm2, %v5833_v39  ;;  %v2361_v22 = vsel %vm406_vm1, 0.0, %v2357_v63 }
 0x2fc   : > { %v2299_v38 = vadd.f32 %v2298_v19, %v2182_v34  ;;  %v5892_v34 = vld [vmem:[%s325_s6 + $0x8] sm:$0xff] }
 0x2fd   : > { %6604 = vst [vmem:[#allocation30_spill] sm:$0xff] %v5877_v28  ;;  %3963 = vmatmul.msk.f32.gmra.mxu2 %vm490_vm2, %v4875_v36  ;;  %v2582_v26 = vpop.f32.mrf.mxu3 }
 0x2fe   : > { %3929 = vmatmul.msk.f32.gmra.mxu1 %vm490_vm2, %v4839_v27 }
 0x2ff   : > { %v1984_v40 = vpop.permute.xlu0 %1983 }
 0x300   : > { %v2049_v32 = vsel %vm490_vm2, %v5105_v20, %v1984_v40  ;;  %v2428_v0 = vpop.f32.mrf.mxu2  ;;  %v2185_v28 = vpop.f32.mrf.mxu0  ;;  %v2358_v40 = vrot.slane %v5892_v34, 7 }
 0x301   : > { %v2084_v21 = vadd.f32 %v5340_v61, %v2049_v32  ;;  %v2498_v58 = vadd.f32 %v2428_v0, %v2299_v38  ;;  %v6606_v0 = vld [vmem:[#allocation49_spill] sm:$0xff] }
 0x302   : > { %3998 = vmatmul.msk.f32.gmra.mxu3 %vm490_vm2, %v5875_v8 }
 0x303   : > { %2117 = vst.msk [vmem:[%s5347_s28 + $0x1e0] sm:$0xff] %vm2086_vm4, %v2084_v21  ;;  %v5896_v19 = vadd.f32 %v2582_v26, %v2498_v58  ;;  %v2301_v27 = vpop.f32.mrf.mxu1  ;;  %3897 = vmatmul.msk.f32.gmra.mxu0 %vm490_vm2, %v5851_v10  ;;  %v2359_v10 = vsel %vm406_vm1, %v2357_v63, %v2358_v40  ;;  %v6607_v40 = vld [vmem:[#allocation36_spill] sm:$0xff] }
 0x304   : > { %v2302_v20 = vadd.f32 %v2301_v27, %v2185_v28 }
 0x305   : > { %6605 = vst [vmem:[#allocation9_spill] sm:$0xff] %v5896_v19  ;;  %3964 = vmatmul.msk.f32.gmra.mxu2 %vm490_vm2, %v2361_v22  ;;  %v2585_v38 = vpop.f32.mrf.mxu3 }
 0x306   : > { %3930 = vmatmul.msk.f32.gmra.mxu1 %vm490_vm2, %v6602_v43 }
 0x307   : > { %v1986_v32 = vpop.permute.xlu1 %1985 }
 0x308   : > { %v2050_v21 = vsel %vm490_vm2, %v6606_v0, %v1986_v32  ;;  %v2431_v58 = vpop.f32.mrf.mxu2  ;;  %v2188_v8 = vpop.f32.mrf.mxu0 }
 0x309   : > { %v2085_v26 = vadd.f32 %v5340_v61, %v2050_v21  ;;  %v2499_v19 = vadd.f32 %v2431_v58, %v2302_v20  ;;  %v6609_v58 = vld [vmem:[#allocation37_spill] sm:$0xff] }
 0x30a   : > { %3999 = vmatmul.msk.f32.gmra.mxu3 %vm490_vm2, %v5892_v34 }
 0x30b   : > { %2118 = vst.msk [vmem:[%s5347_s28 + $0x1e8] sm:$0xff] %vm2086_vm4, %v2085_v26  ;;  %v5912_v22 = vadd.f32 %v2585_v38, %v2499_v19  ;;  %v2304_v28 = vpop.f32.mrf.mxu1  ;;  %3898 = vmatmul.msk.f32.gmra.mxu0 %vm490_vm2, %v5871_v31  ;;  %v6608_v38 = vld [vmem:[#allocation34_spill] sm:$0xff] }
 0x30c   : > { %v2305_v43 = vadd.f32 %v2304_v28, %v2188_v8 }
 0x30d   : > { %3965 = vmatmul.msk.f32.gmra.mxu2 %vm490_vm2, %v2359_v10  ;;  %v2588_v27 = vpop.f32.mrf.mxu3 }
 0x30e   : > { %3931 = vmatmul.msk.f32.gmra.mxu1 %vm490_vm2, %v4875_v36 }
 0x310   : > { %v2434_v61 = vpop.f32.mrf.mxu2  ;;  %v2191_v20 = vpop.f32.mrf.mxu0 }
 0x311   : > { %v2500_v63 = vadd.f32 %v2434_v61, %v2305_v43  ;;  %v6610_v43 = vld [vmem:[#allocation35_spill] sm:$0xff] }
 0x312   : > { %4104 = vmatmul.msk.f32.vlgmr.msrb.gmra.mxu3 %vm490_vm2, %v6607_v40 }
 0x313   : > { %v5921_v32 = vadd.f32 %v2588_v27, %v2500_v63  ;;  %v2307_v19 = vpop.f32.mrf.mxu1  ;;  %4003 = vmatmul.msk.f32.vlgmr.msrb.gmra.mxu0 %vm490_vm2, %v6608_v38 }
 0x314   : > { %v2308_v10 = vadd.f32 %v2307_v19, %v2191_v20  ;;  %v6611_v20 = vld [vmem:[#allocation38_spill] sm:$0xff] }
 0x315   : > { %4070 = vmatmul.msk.f32.vlgmr.msrb.gmra.mxu2 %vm490_vm2, %v5353_v52  ;;  %v2591_v8 = vpop.f32.mrf.mxu3 }
 0x316   : > { %4036 = vmatmul.msk.f32.vlgmr.msrb.gmra.mxu1 %vm490_vm2, %v5360_v50 }
 0x318   : > { %v2437_v36 = vpop.f32.mrf.mxu2  ;;  %v2194_v21 = vpop.f32.mrf.mxu0 }
 0x319   : > { %v2501_v0 = vadd.f32 %v2437_v36, %v2308_v10 }
 0x31a   : > { %4105 = vmatmul.msk.f32.gmra.mxu3 %vm490_vm2, %v6609_v58 }
 0x31b   : > { %v5931_v26 = vadd.f32 %v2591_v8, %v2501_v0  ;;  %v2310_v28 = vpop.f32.mrf.mxu1  ;;  %4004 = vmatmul.msk.f32.gmra.mxu0 %vm490_vm2, %v6610_v43  ;;  %v4232_v8 = vld [vmem:[%s4346_s16 + $0x10] sm:$0xff] }
 0x31c   : > { %v2311_v52 = vadd.f32 %v2310_v28, %v2194_v21  ;;  %v6612_v21 = vld [vmem:[#allocation39_spill] sm:$0xff] }
 0x31d   : > { %4071 = vmatmul.msk.f32.gmra.mxu2 %vm490_vm2, %v5376_v45  ;;  %v2594_v27 = vpop.f32.mrf.mxu3 }
 0x31e   : > { %4037 = vmatmul.msk.f32.gmra.mxu1 %vm490_vm2, %v5385_v11 }
 0x320   : > { %v2440_v50 = vpop.f32.mrf.mxu2  ;;  %v2197_v63 = vpop.f32.mrf.mxu0 }
 0x321   : > { %v2502_v61 = vadd.f32 %v2440_v50, %v2311_v52  ;;  %v4233_v52 = vld [vmem:[%s4346_s16 + $0x18] sm:$0xff] }
 0x322   : > { %4106 = vmatmul.msk.f32.gmra.mxu3 %vm490_vm2, %v6611_v20 }
 0x323   : > { %v5941_v19 = vadd.f32 %v2594_v27, %v2502_v61  ;;  %v2313_v38 = vpop.f32.mrf.mxu1  ;;  %4005 = vmatmul.msk.f32.gmra.mxu0 %vm490_vm2, %v6607_v40 }
 0x324   : > { %v2314_v45 = vadd.f32 %v2313_v38, %v2197_v63  ;;  %v6613_v63 = vld [vmem:[#allocation40_spill] sm:$0xff] }
 0x325   : > { %4072 = vmatmul.msk.f32.gmra.mxu2 %vm490_vm2, %v5401_v3  ;;  %v2597_v10 = vpop.f32.mrf.mxu3 }
 0x326   : > { %4038 = vmatmul.msk.f32.gmra.mxu1 %vm490_vm2, %v4232_v8  ;;  %v4234_v8 = vld [vmem:[%s4346_s16 + $0x20] sm:$0xff] }
 0x328   : > { %v2443_v11 = vpop.f32.mrf.mxu2  ;;  %v2200_v0 = vpop.f32.mrf.mxu0 }
 0x329   : > { %v2503_v36 = vadd.f32 %v2443_v11, %v2314_v45 }
 0x32a   : > { %4107 = vmatmul.msk.f32.gmra.mxu3 %vm490_vm2, %v6612_v21 }
 0x32b   : > { %v5951_v28 = vadd.f32 %v2597_v10, %v2503_v36  ;;  %v2316_v43 = vpop.f32.mrf.mxu1  ;;  %4006 = vmatmul.msk.f32.gmra.mxu0 %vm490_vm2, %v6609_v58 }
 0x32c   : > { %v2317_v3 = vadd.f32 %v2316_v43, %v2200_v0  ;;  %v6614_v43 = vld [vmem:[#allocation41_spill] sm:$0xff] }
 0x32d   : > { %4073 = vmatmul.msk.f32.gmra.mxu2 %vm490_vm2, %v5420_v16  ;;  %v2600_v40 = vpop.f32.mrf.mxu3 }
 0x32e   : > { %4039 = vmatmul.msk.f32.gmra.mxu1 %vm490_vm2, %v4233_v52 }
 0x330   : > { %v2446_v27 = vpop.f32.mrf.mxu2  ;;  %v2203_v61 = vpop.f32.mrf.mxu0 }
 0x331   : > { %v2504_v50 = vadd.f32 %v2446_v27, %v2317_v3 }
 0x332   : > { %4108 = vmatmul.msk.f32.gmra.mxu3 %vm490_vm2, %v6613_v63 }
 0x333   : > { %v5961_v38 = vadd.f32 %v2600_v40, %v2504_v50  ;;  %v2319_v45 = vpop.f32.mrf.mxu1  ;;  %4007 = vmatmul.msk.f32.gmra.mxu0 %vm490_vm2, %v6611_v20 }
 0x334   : > { %v2320_v58 = vadd.f32 %v2319_v45, %v2203_v61  ;;  %v6615_v45 = vld [vmem:[#allocation42_spill] sm:$0xff] }
 0x335   : > { %4074 = vmatmul.msk.f32.gmra.mxu2 %vm490_vm2, %v5434_v59  ;;  %v2603_v10 = vpop.f32.mrf.mxu3 }
 0x336   : > { %4040 = vmatmul.msk.f32.gmra.mxu1 %vm490_vm2, %v4234_v8 }
 0x338   : > { %v2449_v11 = vpop.f32.mrf.mxu2  ;;  %v2206_v0 = vpop.f32.mrf.mxu0 }
 0x339   : > { %v2505_v36 = vadd.f32 %v2449_v11, %v2320_v58 }
 0x33a   : > { %4109 = vmatmul.msk.f32.gmra.mxu3 %vm490_vm2, %v6614_v43 }
 0x33b   : > { %v5971_v3 = vadd.f32 %v2603_v10, %v2505_v36  ;;  %v2322_v40 = vpop.f32.mrf.mxu1  ;;  %4008 = vmatmul.msk.f32.gmra.mxu0 %vm490_vm2, %v6612_v21 }
 0x33c   : > { %v2323_v20 = vadd.f32 %v2322_v40, %v2206_v0  ;;  %v6616_v0 = vld [vmem:[#allocation43_spill] sm:$0xff] }
 0x33d   : > { %4075 = vmatmul.msk.f32.gmra.mxu2 %vm490_vm2, %v5449_v57  ;;  %v2606_v52 = vpop.f32.mrf.mxu3 }
 0x33e   : > { %4041 = vmatmul.msk.f32.gmra.mxu1 %vm490_vm2, %v5420_v16 }
 0x340   : > { %v2452_v27 = vpop.f32.mrf.mxu2  ;;  %v2209_v61 = vpop.f32.mrf.mxu0 }
 0x341   : > { %v2506_v50 = vadd.f32 %v2452_v27, %v2323_v20 }
 0x342   : > { %4110 = vmatmul.msk.f32.gmra.mxu3 %vm490_vm2, %v6615_v45 }
 0x343   : > { %v5981_v58 = vadd.f32 %v2606_v52, %v2506_v50  ;;  %v2325_v10 = vpop.f32.mrf.mxu1  ;;  %4009 = vmatmul.msk.f32.gmra.mxu0 %vm490_vm2, %v6613_v63 }
 0x344   : > { %v2326_v21 = vadd.f32 %v2325_v10, %v2209_v61  ;;  %v6617_v61 = vld [vmem:[#allocation44_spill] sm:$0xff] }
 0x345   : > { %4076 = vmatmul.msk.f32.gmra.mxu2 %vm490_vm2, %v5466_v54  ;;  %v2609_v8 = vpop.f32.mrf.mxu3 }
 0x346   : > { %4042 = vmatmul.msk.f32.gmra.mxu1 %vm490_vm2, %v5434_v59 }
 0x348   : > { %v2455_v16 = vpop.f32.mrf.mxu2  ;;  %v2212_v36 = vpop.f32.mrf.mxu0 }
 0x349   : > { %v2507_v11 = vadd.f32 %v2455_v16, %v2326_v21 }
 0x34a   : > { %4111 = vmatmul.msk.f32.gmra.mxu3 %vm490_vm2, %v6616_v0 }
 0x34b   : > { %v5991_v40 = vadd.f32 %v2609_v8, %v2507_v11  ;;  %v2328_v20 = vpop.f32.mrf.mxu1  ;;  %4010 = vmatmul.msk.f32.gmra.mxu0 %vm490_vm2, %v6614_v43 }
 0x34c   : > { %v2329_v63 = vadd.f32 %v2328_v20, %v2212_v36  ;;  %v6618_v36 = vld [vmem:[#allocation45_spill] sm:$0xff] }
 0x34d   : > { %4077 = vmatmul.msk.f32.gmra.mxu2 %vm490_vm2, %v5483_v7  ;;  %v2612_v52 = vpop.f32.mrf.mxu3 }
 0x34e   : > { %4043 = vmatmul.msk.f32.gmra.mxu1 %vm490_vm2, %v5449_v57 }
 0x350   : > { %v2458_v59 = vpop.f32.mrf.mxu2  ;;  %v2215_v50 = vpop.f32.mrf.mxu0 }
 0x351   : > { %v2508_v27 = vadd.f32 %v2458_v59, %v2329_v63 }
 0x352   : > { %4112 = vmatmul.msk.f32.gmra.mxu3 %vm490_vm2, %v6617_v61 }
 0x353   : > { %v6001_v10 = vadd.f32 %v2612_v52, %v2508_v27  ;;  %v2331_v21 = vpop.f32.mrf.mxu1  ;;  %4011 = vmatmul.msk.f32.gmra.mxu0 %vm490_vm2, %v6615_v45 }
 0x354   : > { %v2332_v43 = vadd.f32 %v2331_v21, %v2215_v50  ;;  %v6619_v50 = vld [vmem:[#allocation46_spill] sm:$0xff] }
 0x355   : > { %4078 = vmatmul.msk.f32.gmra.mxu2 %vm490_vm2, %v5500_v55  ;;  %v2615_v8 = vpop.f32.mrf.mxu3 }
 0x356   : > { %4044 = vmatmul.msk.f32.gmra.mxu1 %vm490_vm2, %v5466_v54 }
 0x358   : > { %v2461_v57 = vpop.f32.mrf.mxu2  ;;  %v2218_v11 = vpop.f32.mrf.mxu0 }
 0x359   : > { %v2509_v16 = vadd.f32 %v2461_v57, %v2332_v43 }
 0x35a   : > { %4113 = vmatmul.msk.f32.gmra.mxu3 %vm490_vm2, %v6618_v36 }
 0x35b   : > { %v6011_v20 = vadd.f32 %v2615_v8, %v2509_v16  ;;  %v2334_v63 = vpop.f32.mrf.mxu1  ;;  %4012 = vmatmul.msk.f32.gmra.mxu0 %vm490_vm2, %v6616_v0 }
 0x35c   : > { %v2335_v45 = vadd.f32 %v2334_v63, %v2218_v11  ;;  %v6620_v11 = vld [vmem:[#allocation47_spill] sm:$0xff] }
 0x35d   : > { %4079 = vmatmul.msk.f32.gmra.mxu2 %vm490_vm2, %v5517_v12  ;;  %v2618_v52 = vpop.f32.mrf.mxu3 }
 0x35e   : > { %4045 = vmatmul.msk.f32.gmra.mxu1 %vm490_vm2, %v5483_v7 }
 0x360   : > { %v2464_v54 = vpop.f32.mrf.mxu2  ;;  %v2221_v27 = vpop.f32.mrf.mxu0 }
 0x361   : > { %v2510_v59 = vadd.f32 %v2464_v54, %v2335_v45 }
 0x362   : > { %4114 = vmatmul.msk.f32.gmra.mxu3 %vm490_vm2, %v6619_v50 }
 0x363   : > { %v6021_v21 = vadd.f32 %v2618_v52, %v2510_v59  ;;  %v2337_v43 = vpop.f32.mrf.mxu1  ;;  %4013 = vmatmul.msk.f32.gmra.mxu0 %vm490_vm2, %v6617_v61 }
 0x364   : > { %v2338_v0 = vadd.f32 %v2337_v43, %v2221_v27  ;;  %v6621_v27 = vld [vmem:[#allocation48_spill] sm:$0xff] }
 0x365   : > { %4080 = vmatmul.msk.f32.gmra.mxu2 %vm490_vm2, %v5534_v4  ;;  %v2621_v8 = vpop.f32.mrf.mxu3 }
 0x366   : > { %4046 = vmatmul.msk.f32.gmra.mxu1 %vm490_vm2, %v5500_v55 }
 0x368   : > { %v2467_v7 = vpop.f32.mrf.mxu2  ;;  %v2224_v16 = vpop.f32.mrf.mxu0 }
 0x369   : > { %v2511_v57 = vadd.f32 %v2467_v7, %v2338_v0 }
 0x36a   : > { %4115 = vmatmul.msk.f32.gmra.mxu3 %vm490_vm2, %v6620_v11 }
 0x36b   : > { %v6031_v63 = vadd.f32 %v2621_v8, %v2511_v57  ;;  %v2340_v45 = vpop.f32.mrf.mxu1  ;;  %4014 = vmatmul.msk.f32.gmra.mxu0 %vm490_vm2, %v6618_v36 }
 0x36c   : > { %v2341_v61 = vadd.f32 %v2340_v45, %v2224_v16 }
 0x36d   : > { %4081 = vmatmul.msk.f32.gmra.mxu2 %vm490_vm2, %v5551_v18  ;;  %v2624_v52 = vpop.f32.mrf.mxu3 }
 0x36e   : > { %4047 = vmatmul.msk.f32.gmra.mxu1 %vm490_vm2, %v5517_v12 }
 0x370   : > { %v2470_v55 = vpop.f32.mrf.mxu2  ;;  %v2227_v59 = vpop.f32.mrf.mxu0 }
 0x371   : > { %v2512_v54 = vadd.f32 %v2470_v55, %v2341_v61 }
 0x372   : > { %4116 = vmatmul.msk.f32.gmra.mxu3 %vm490_vm2, %v6621_v27 }
 0x373   : > { %v6041_v43 = vadd.f32 %v2624_v52, %v2512_v54  ;;  %v2343_v0 = vpop.f32.mrf.mxu1  ;;  %4015 = vmatmul.msk.f32.gmra.mxu0 %vm490_vm2, %v6619_v50 }
 0x374   : > { %v2344_v36 = vadd.f32 %v2343_v0, %v2227_v59 }
 0x375   : > { %4082 = vmatmul.msk.f32.gmra.mxu2 %vm490_vm2, %v5568_v5  ;;  %v2627_v8 = vpop.f32.mrf.mxu3 }
 0x376   : > { %4048 = vmatmul.msk.f32.gmra.mxu1 %vm490_vm2, %v5534_v4 }
 0x378   : > { %v2473_v12 = vpop.f32.mrf.mxu2  ;;  %v2230_v57 = vpop.f32.mrf.mxu0 }
 0x379   : > { %v2513_v7 = vadd.f32 %v2473_v12, %v2344_v36 }
 0x37a   : > { %4117 = vmatmul.msk.f32.gmra.mxu3 %vm490_vm2, %v5101_v35 }
 0x37b   : > { %v6051_v16 = vadd.f32 %v2627_v8, %v2513_v7  ;;  %v2346_v45 = vpop.f32.mrf.mxu1  ;;  %4016 = vmatmul.msk.f32.gmra.mxu0 %vm490_vm2, %v6620_v11 }
 0x37c   : > { %v2347_v50 = vadd.f32 %v2346_v45, %v2230_v57 }
 0x37d   : > { %4083 = vmatmul.msk.f32.gmra.mxu2 %vm490_vm2, %v5585_v2  ;;  %v2630_v61 = vpop.f32.mrf.mxu3 }
 0x37e   : > { %4049 = vmatmul.msk.f32.gmra.mxu1 %vm490_vm2, %v5551_v18 }
 0x380   : > { %v2476_v4 = vpop.f32.mrf.mxu2  ;;  %v2233_v55 = vpop.f32.mrf.mxu0 }
 0x381   : > { %v2514_v52 = vadd.f32 %v2476_v4, %v2347_v50 }
 0x382   : > { %4118 = vmatmul.msk.f32.gmra.mxu3 %vm490_vm2, %v5116_v14 }
 0x383   : > { %v6061_v54 = vadd.f32 %v2630_v61, %v2514_v52  ;;  %v2349_v59 = vpop.f32.mrf.mxu1  ;;  %4017 = vmatmul.msk.f32.gmra.mxu0 %vm490_vm2, %v6621_v27 }
 0x384   : > { %v2350_v11 = vadd.f32 %v2349_v59, %v2233_v55 }
 0x385   : > { %4084 = vmatmul.msk.f32.gmra.mxu2 %vm490_vm2, %v5602_v33  ;;  %v2633_v0 = vpop.f32.mrf.mxu3 }
 0x386   : > { %4050 = vmatmul.msk.f32.gmra.mxu1 %vm490_vm2, %v5568_v5 }
 0x388   : > { %v2479_v18 = vpop.f32.mrf.mxu2  ;;  %v2236_v8 = vpop.f32.mrf.mxu0 }
 0x389   : > { %v2515_v36 = vadd.f32 %v2479_v18, %v2350_v11 }
 0x38a   : > { %4119 = vmatmul.msk.f32.gmra.mxu3 %vm490_vm2, %v5129_v41 }
 0x38b   : > { %v6071_v12 = vadd.f32 %v2633_v0, %v2515_v36  ;;  %v2352_v7 = vpop.f32.mrf.mxu1  ;;  %4018 = vmatmul.msk.f32.gmra.mxu0 %vm490_vm2, %v5101_v35 }
 0x38c   : > { %v2353_v27 = vadd.f32 %v2352_v7, %v2236_v8 }
 0x38d   : > { %4085 = vmatmul.msk.f32.gmra.mxu2 %vm490_vm2, %v5619_v6  ;;  %v2636_v57 = vpop.f32.mrf.mxu3 }
 0x38e   : > { %4051 = vmatmul.msk.f32.gmra.mxu1 %vm490_vm2, %v5585_v2 }
 0x390   : > { %v2482_v5 = vpop.f32.mrf.mxu2  ;;  %v2695_v50 = vpop.f32.mrf.mxu0 }
 0x391   : > { %v2516_v45 = vadd.f32 %v2482_v5, %v2353_v27 }
 0x392   : > { %4120 = vmatmul.msk.f32.gmra.mxu3 %vm490_vm2, %v5143_v29 }
 0x393   : > { %v6081_v61 = vadd.f32 %v2636_v57, %v2516_v45  ;;  %v2811_v4 = vpop.f32.mrf.mxu1  ;;  %4019 = vmatmul.msk.f32.gmra.mxu0 %vm490_vm2, %v5116_v14 }
 0x394   : > { %v2812_v35 = vadd.f32 %v2811_v4, %v2695_v50 }
 0x395   : > { %4086 = vmatmul.msk.f32.gmra.mxu2 %vm490_vm2, %v5636_v15  ;;  %v3089_v52 = vpop.f32.mrf.mxu3 }
 0x396   : > { %4052 = vmatmul.msk.f32.gmra.mxu1 %vm490_vm2, %v5602_v33 }
 0x398   : > { %v2929_v2 = vpop.f32.mrf.mxu2  ;;  %v2698_v59 = vpop.f32.mrf.mxu0 }
 0x399   : > { %v3025_v55 = vadd.f32 %v2929_v2, %v2812_v35 }
 0x39a   : > { %4121 = vmatmul.msk.f32.gmra.mxu3 %vm490_vm2, %v5155_v13 }
 0x39b   : > { %v3185_v11 = vadd.f32 %v3089_v52, %v3025_v55  ;;  %v2814_v0 = vpop.f32.mrf.mxu1  ;;  %4020 = vmatmul.msk.f32.gmra.mxu0 %vm490_vm2, %v5129_v41 }
 0x39c   : > { %v2815_v14 = vadd.f32 %v2814_v0, %v2698_v59 }
 0x39d   : > { %4087 = vmatmul.msk.f32.gmra.mxu2 %vm490_vm2, %v5653_v60  ;;  %3249 = vrot.lane.b32.xlu2 %v3185_v11, %s4260_s8  ;;  %v3092_v18 = vpop.f32.mrf.mxu3 }
 0x39e   : > { %4053 = vmatmul.msk.f32.gmra.mxu1 %vm490_vm2, %v5619_v6 }
 0x3a0   : > { %v2932_v33 = vpop.f32.mrf.mxu2  ;;  %v2701_v8 = vpop.f32.mrf.mxu0 }
 0x3a1   : > { %v3026_v36 = vadd.f32 %v2932_v33, %v2815_v14 }
 0x3a2   : > { %4122 = vmatmul.msk.f32.gmra.mxu3 %vm490_vm2, %v5169_v53 }
 0x3a3   : > { %v3186_v7 = vadd.f32 %v3092_v18, %v3026_v36  ;;  %v2817_v27 = vpop.f32.mrf.mxu1  ;;  %4021 = vmatmul.msk.f32.gmra.mxu0 %vm490_vm2, %v5143_v29 }
 0x3a4   : > { %v2818_v41 = vadd.f32 %v2817_v27, %v2701_v8 }
 0x3a5   : > { %4088 = vmatmul.msk.f32.gmra.mxu2 %vm490_vm2, %v5671_v23  ;;  %3251 = vrot.lane.b32.xlu0 %v3186_v7, %s4260_s8  ;;  %v3095_v57 = vpop.f32.mrf.mxu3 }
 0x3a6   : > { %4054 = vmatmul.msk.f32.gmra.mxu1 %vm490_vm2, %v5636_v15 }
 0x3a8   : > { %v2935_v6 = vpop.f32.mrf.mxu2  ;;  %v2704_v45 = vpop.f32.mrf.mxu0 }
 0x3a9   : > { %v3027_v5 = vadd.f32 %v2935_v6, %v2818_v41 }
 0x3aa   : > { %4123 = vmatmul.msk.f32.gmra.mxu3 %vm490_vm2, %v5181_v9 }
 0x3ab   : > { %v3187_v50 = vadd.f32 %v3095_v57, %v3027_v5  ;;  %v2820_v4 = vpop.f32.mrf.mxu1  ;;  %4022 = vmatmul.msk.f32.gmra.mxu0 %vm490_vm2, %v5155_v13 }
 0x3ac   : > { %v2821_v29 = vadd.f32 %v2820_v4, %v2704_v45 }
 0x3ad   : > { %4089 = vmatmul.msk.f32.gmra.mxu2 %vm490_vm2, %v5689_v51  ;;  %3253 = vrot.lane.b32.xlu1 %v3187_v50, %s4260_s8  ;;  %v3098_v35 = vpop.f32.mrf.mxu3 }
 0x3ae   : > { %4055 = vmatmul.msk.f32.gmra.mxu1 %vm490_vm2, %v5653_v60 }
 0x3b0   : > { %v2938_v15 = vpop.f32.mrf.mxu2  ;;  %v2707_v2 = vpop.f32.mrf.mxu0 }
 0x3b1   : > { %v3028_v52 = vadd.f32 %v2938_v15, %v2821_v29 }
 0x3b2   : > { %4124 = vmatmul.msk.f32.gmra.mxu3 %vm490_vm2, %v5195_v44 }
 0x3b3   : > { %v3188_v55 = vadd.f32 %v3098_v35, %v3028_v52  ;;  %v2823_v59 = vpop.f32.mrf.mxu1  ;;  %4023 = vmatmul.msk.f32.gmra.mxu0 %vm490_vm2, %v5169_v53 }
 0x3b4   : > { %v2824_v13 = vadd.f32 %v2823_v59, %v2707_v2 }
 0x3b5   : > { %4090 = vmatmul.msk.f32.gmra.mxu2 %vm490_vm2, %v5707_v25  ;;  %3255 = vrot.lane.b32.xlu2 %v3188_v55, %s4260_s8  ;;  %v3101_v11 = vpop.f32.mrf.mxu3 }
 0x3b6   : > { %4056 = vmatmul.msk.f32.gmra.mxu1 %vm490_vm2, %v5671_v23 }
 0x3b8   : > { %v2941_v60 = vpop.f32.mrf.mxu2  ;;  %v2710_v14 = vpop.f32.mrf.mxu0 }
 0x3b9   : > { %v3029_v0 = vadd.f32 %v2941_v60, %v2824_v13  ;;  %v6622_v13 = vld [vmem:[#allocation50_spill] sm:$0xff] }
 0x3ba   : > { %4125 = vmatmul.msk.f32.gmra.mxu3 %vm490_vm2, %v5207_v24 }
 0x3bb   : > { %v3189_v18 = vadd.f32 %v3101_v11, %v3029_v0  ;;  %v2826_v33 = vpop.f32.mrf.mxu1  ;;  %4024 = vmatmul.msk.f32.gmra.mxu0 %vm490_vm2, %v5181_v9 }
 0x3bc   : > { %v2827_v53 = vadd.f32 %v2826_v33, %v2710_v14 }
 0x3bd   : > { %4091 = vmatmul.msk.f32.gmra.mxu2 %vm490_vm2, %v5725_v1  ;;  %3257 = vrot.lane.b32.xlu0 %v3189_v18, %s4260_s8  ;;  %v3104_v36 = vpop.f32.mrf.mxu3 }
 0x3be   : > { %4057 = vmatmul.msk.f32.gmra.mxu1 %vm490_vm2, %v5689_v51 }
 0x3c0   : > { %v2944_v23 = vpop.f32.mrf.mxu2  ;;  %v2713_v7 = vpop.f32.mrf.mxu0 }
 0x3c1   : > { %v3030_v8 = vadd.f32 %v2944_v23, %v2827_v53 }
 0x3c2   : > { %4126 = vmatmul.msk.f32.gmra.mxu3 %vm490_vm2, %v5221_v56 }
 0x3c3   : > { %v3190_v27 = vadd.f32 %v3104_v36, %v3030_v8  ;;  %v2829_v41 = vpop.f32.mrf.mxu1  ;;  %4025 = vmatmul.msk.f32.gmra.mxu0 %vm490_vm2, %v5195_v44 }
 0x3c4   : > { %v2830_v9 = vadd.f32 %v2829_v41, %v2713_v7 }
 0x3c5   : > { %4092 = vmatmul.msk.f32.gmra.mxu2 %vm490_vm2, %v5743_v46  ;;  %3259 = vrot.lane.b32.xlu1 %v3190_v27, %s4260_s8  ;;  %v3107_v57 = vpop.f32.mrf.mxu3 }
 0x3c6   : > { %4058 = vmatmul.msk.f32.gmra.mxu1 %vm490_vm2, %v5707_v25 }
 0x3c8   : > { %v2947_v51 = vpop.f32.mrf.mxu2  ;;  %v2716_v5 = vpop.f32.mrf.mxu0 }
 0x3c9   : > { %v3031_v6 = vadd.f32 %v2947_v51, %v2830_v9  ;;  %v6623_v51 = vld [vmem:[#allocation51_spill] sm:$0xff] }
 0x3ca   : > { %4127 = vmatmul.msk.f32.gmra.mxu3 %vm490_vm2, %v5233_v48 }
 0x3cb   : > { %v3191_v45 = vadd.f32 %v3107_v57, %v3031_v6  ;;  %v2832_v50 = vpop.f32.mrf.mxu1  ;;  %4026 = vmatmul.msk.f32.gmra.mxu0 %vm490_vm2, %v5207_v24 }
 0x3cc   : > { %v2833_v44 = vadd.f32 %v2832_v50, %v2716_v5 }
 0x3cd   : > { %4093 = vmatmul.msk.f32.gmra.mxu2 %vm490_vm2, %v5761_v42  ;;  %3261 = vrot.lane.b32.xlu2 %v3191_v45, %s4260_s8  ;;  %v3110_v4 = vpop.f32.mrf.mxu3  ;;  %v6624_v45 = vld [vmem:[#allocation7_spill] sm:$0xff] }
 0x3ce   : > { %4059 = vmatmul.msk.f32.gmra.mxu1 %vm490_vm2, %v5725_v1 }
 0x3d0   : > { %v2950_v25 = vpop.f32.mrf.mxu2  ;;  %v2719_v35 = vpop.f32.mrf.mxu0 }
 0x3d1   : > { %v3032_v29 = vadd.f32 %v2950_v25, %v2833_v44 }
 0x3d2   : > { %4128 = vmatmul.msk.f32.gmra.mxu3 %vm490_vm2, %v5247_v62 }
 0x3d3   : > { %v3192_v15 = vadd.f32 %v3110_v4, %v3032_v29  ;;  %v2835_v52 = vpop.f32.mrf.mxu1  ;;  %4027 = vmatmul.msk.f32.gmra.mxu0 %vm490_vm2, %v5221_v56  ;;  %v6625_v4 = vld [vmem:[#allocation23_spill] sm:$0xff] }
 0x3d4   : > { %v2836_v24 = vadd.f32 %v2835_v52, %v2719_v35  ;;  %v6202_v35 = vld [vmem:[%s6421_s4] ss:$0 sm:$0xff] }
 0x3d5   : > { %4094 = vmatmul.msk.f32.gmra.mxu2 %vm490_vm2, %v5779_v30  ;;  %3263 = vrot.lane.b32.xlu0 %v3192_v15, %s4260_s8  ;;  %v3113_v2 = vpop.f32.mrf.mxu3 }
 0x3d6   : > { %4060 = vmatmul.msk.f32.gmra.mxu1 %vm490_vm2, %v5743_v46 }
 0x3d8   : > { %v2953_v1 = vpop.f32.mrf.mxu2  ;;  %v2722_v59 = vpop.f32.mrf.mxu0 }
 0x3d9   : > { %v3033_v55 = vadd.f32 %v2953_v1, %v2836_v24  ;;  %v6626_v24 = vld [vmem:[#allocation52_spill] sm:$0xff] }
 0x3da   : > { %4129 = vmatmul.msk.f32.gmra.mxu3 %vm490_vm2, %v6622_v13 }
 0x3db   : > { %v3193_v11 = vadd.f32 %v3113_v2, %v3033_v55  ;;  %v2838_v60 = vpop.f32.mrf.mxu1  ;;  %4028 = vmatmul.msk.f32.gmra.mxu0 %vm490_vm2, %v5233_v48  ;;  %v3058_v55 = vrot.slane %v5892_v34, 1 }
 0x3dc   : > { %v2839_v56 = vadd.f32 %v2838_v60, %v2722_v59 }
 0x3dd   : > { %4095 = vmatmul.msk.f32.gmra.mxu2 %vm490_vm2, %v5797_v49  ;;  %3265 = vrot.lane.b32.xlu1 %v3193_v11, %s4260_s8  ;;  %v3116_v0 = vpop.f32.mrf.mxu3 }
 0x3de   : > { %4061 = vmatmul.msk.f32.gmra.mxu1 %vm490_vm2, %v5761_v42 }
 0x3e0   : > { %v2956_v46 = vpop.f32.mrf.mxu2  ;;  %v2725_v18 = vpop.f32.mrf.mxu0 }
 0x3e1   : > { %v3034_v14 = vadd.f32 %v2956_v46, %v2839_v56 }
 0x3e2   : > { %4130 = vmatmul.msk.f32.gmra.mxu3 %vm490_vm2, %v5273_v17 }
 0x3e3   : > { %v3194_v33 = vadd.f32 %v3116_v0, %v3034_v14  ;;  %v2841_v53 = vpop.f32.mrf.mxu1  ;;  %4029 = vmatmul.msk.f32.gmra.mxu0 %vm490_vm2, %v5247_v62 }
 0x3e4   : > { %v2842_v48 = vadd.f32 %v2841_v53, %v2725_v18 }
 0x3e5   : > { %4096 = vmatmul.msk.f32.gmra.mxu2 %vm490_vm2, %v5815_v37  ;;  %3267 = vrot.lane.b32.xlu2 %v3194_v33, %s4260_s8  ;;  %v3119_v36 = vpop.f32.mrf.mxu3 }
 0x3e6   : > { %4062 = vmatmul.msk.f32.gmra.mxu1 %vm490_vm2, %v5779_v30 }
 0x3e8   : > { %v2959_v42 = vpop.f32.mrf.mxu2  ;;  %v2728_v8 = vpop.f32.mrf.mxu0 }
 0x3e9   : > { %v3035_v23 = vadd.f32 %v2959_v42, %v2842_v48 }
 0x3ea   : > { %4131 = vmatmul.msk.f32.gmra.mxu3 %vm490_vm2, %v5293_v47 }
 0x3eb   : > { %v3195_v7 = vadd.f32 %v3119_v36, %v3035_v23  ;;  %v2844_v27 = vpop.f32.mrf.mxu1  ;;  %4030 = vmatmul.msk.f32.gmra.mxu0 %vm490_vm2, %v6622_v13 }
 0x3ec   : > { %v2845_v62 = vadd.f32 %v2844_v27, %v2728_v8 }
 0x3ed   : > { %4097 = vmatmul.msk.f32.gmra.mxu2 %vm490_vm2, %v5833_v39  ;;  %3269 = vrot.lane.b32.xlu0 %v3195_v7, %s4260_s8  ;;  %v3122_v41 = vpop.f32.mrf.mxu3 }
 0x3ee   : > { %4063 = vmatmul.msk.f32.gmra.mxu1 %vm490_vm2, %v5797_v49 }
 0x3f0   : > { %v2962_v30 = vpop.f32.mrf.mxu2  ;;  %v2731_v57 = vpop.f32.mrf.mxu0 }
 0x3f1   : > { %v3036_v9 = vadd.f32 %v2962_v30, %v2845_v62  ;;  %v6628_v62 = vld [vmem:[#allocation3_spill] sm:$0xff] }
 0x3f2   : > { %4132 = vmatmul.msk.f32.gmra.mxu3 %vm490_vm2, %v6623_v51 }
 0x3f3   : > { %v3196_v6 = vadd.f32 %v3122_v41, %v3036_v9  ;;  %v2847_v5 = vpop.f32.mrf.mxu1  ;;  %4031 = vmatmul.msk.f32.gmra.mxu0 %vm490_vm2, %v5273_v17 }
 0x3f4   : > { %v2848_v50 = vadd.f32 %v2847_v5, %v2731_v57 }
 0x3f5   : > { %4098 = vmatmul.msk.f32.gmra.mxu2 %vm490_vm2, %v6624_v45  ;;  %3271 = vrot.lane.b32.xlu1 %v3196_v6, %s4260_s8  ;;  %v3125_v44 = vpop.f32.mrf.mxu3 }
 0x3f6   : > { %4064 = vmatmul.msk.f32.gmra.mxu1 %vm490_vm2, %v5815_v37  ;;  %v6627_v37 = vld [vmem:[#allocation8_spill] sm:$0xff] }
 0x3f7   : > { %v3250_v49 = vpop.permute.xlu2 %3249  ;;  %v3057_v1 = vrot.slane %v6627_v37, 1 }
 0x3f8   : > { %v3345_v25 = vsel %vm490_vm2, %v6625_v4, %v3250_v49  ;;  %v2965_v29 = vpop.f32.mrf.mxu2  ;;  %v2734_v52 = vpop.f32.mrf.mxu0 }
 0x3f9   : > { %v3377_v17 = vadd.f32 %v6202_v35, %v3345_v25  ;;  %v3037_v15 = vadd.f32 %v2965_v29, %v2848_v50  ;;  %v3059_v60 = vsel %vm1186_vm3, %v3057_v1, %v3058_v55 }
 0x3fa   : > { %4133 = vmatmul.msk.f32.gmra.mxu3 %vm490_vm2, %v6626_v24 }
 0x3fb   : > { %4136 = vst.msk [vmem:[%s5347_s28 + $0x10] sm:$0xff] %vm2086_vm4, %v3377_v17  ;;  %v3197_v2 = vadd.f32 %v3125_v44, %v3037_v15  ;;  %v2850_v59 = vpop.f32.mrf.mxu1  ;;  %4032 = vmatmul.msk.f32.gmra.mxu0 %vm490_vm2, %v5293_v47  ;;  %v6629_v44 = vld [vmem:[#allocation2_spill] sm:$0xff] }
 0x3fc   : > { %v2851_v13 = vadd.f32 %v2850_v59, %v2734_v52 }
 0x3fd   : > { %4099 = vmatmul.msk.f32.gmra.mxu2 %vm490_vm2, %v5871_v31  ;;  %3273 = vrot.lane.b32.xlu2 %v3197_v2, %s4260_s8  ;;  %v3128_v11 = vpop.f32.mrf.mxu3 }
 0x3fe   : > { %4065 = vmatmul.msk.f32.gmra.mxu1 %vm490_vm2, %v5833_v39  ;;  %v3061_v39 = vsel %vm1186_vm3, %v3058_v55, 0.0 }
 0x400   : > { %v2968_v56 = vpop.f32.mrf.mxu2  ;;  %v2737_v46 = vpop.f32.mrf.mxu0 }
 0x401   : > { %v3038_v0 = vadd.f32 %v2968_v56, %v2851_v13 }
 0x402   : > { %4134 = vmatmul.msk.f32.gmra.mxu3 %vm490_vm2, %v3059_v60 }
 0x403   : > { %v3198_v14 = vadd.f32 %v3128_v11, %v3038_v0  ;;  %v2853_v18 = vpop.f32.mrf.mxu1  ;;  %4033 = vmatmul.msk.f32.gmra.mxu0 %vm490_vm2, %v6623_v51 }
 0x404   : > { %v2854_v47 = vadd.f32 %v2853_v18, %v2737_v46  ;;  %v6631_v18 = vld [vmem:[#allocation29_spill] sm:$0xff] }
 0x405   : > { %4100 = vmatmul.msk.f32.gmra.mxu2 %vm490_vm2, %v6627_v37  ;;  %3275 = vrot.lane.b32.xlu0 %v3198_v14, %s4260_s8  ;;  %v3131_v33 = vpop.f32.mrf.mxu3  ;;  %v6630_v37 = vld [vmem:[#allocation19_spill] sm:$0xff] }
 0x406   : > { %4066 = vmatmul.msk.f32.gmra.mxu1 %vm490_vm2, %v6624_v45 }
 0x408   : > { %v2971_v53 = vpop.f32.mrf.mxu2  ;;  %v2740_v36 = vpop.f32.mrf.mxu0 }
 0x409   : > { %v3039_v48 = vadd.f32 %v2971_v53, %v2854_v47 }
 0x40a   : > { %4135 = vmatmul.msk.f32.gmra.mxu3 %vm490_vm2, %v3061_v39 }
 0x40b   : > { %v3199_v42 = vadd.f32 %v3131_v33, %v3039_v48  ;;  %v2856_v23 = vpop.f32.mrf.mxu1  ;;  %4034 = vmatmul.msk.f32.gmra.mxu0 %vm490_vm2, %v6626_v24 }
 0x40c   : > { %v2857_v8 = vadd.f32 %v2856_v23, %v2740_v36 }
 0x40d   : > { %4101 = vmatmul.msk.f32.gmra.mxu2 %vm490_vm2, %v5892_v34  ;;  %3277 = vrot.lane.b32.xlu1 %v3199_v42, %s4260_s8  ;;  %v3134_v7 = vpop.f32.mrf.mxu3 }
 0x40e   : > { %4067 = vmatmul.msk.f32.gmra.mxu1 %vm490_vm2, %v5871_v31 }
 0x40f   : > { %v3256_v27 = vpop.permute.xlu2 %3255 }
 0x410   : > { %v3348_v41 = vsel %vm490_vm2, %v6628_v62, %v3256_v27  ;;  %v2974_v30 = vpop.f32.mrf.mxu2  ;;  %v2743_v51 = vpop.f32.mrf.mxu0  ;;  %v6632_v27 = vld [vmem:[#allocation21_spill] sm:$0xff] }
 0x411   : > { %v3380_v9 = vadd.f32 %v6202_v35, %v3348_v41  ;;  %v3040_v57 = vadd.f32 %v2974_v30, %v2857_v8 }
 0x413   : > { %4139 = vst.msk [vmem:[%s5347_s28 + $0x38] sm:$0xff] %vm2086_vm4, %v3380_v9  ;;  %v3200_v34 = vadd.f32 %v3134_v7, %v3040_v57  ;;  %v2859_v6 = vpop.f32.mrf.mxu1 }
 0x414   : > { %v2860_v5 = vadd.f32 %v2859_v6, %v2743_v51 }
 0x415   : > { %3279 = vrot.lane.b32.xlu2 %v3200_v34, %s4260_s8  ;;  %v3137_v45 = vpop.f32.mrf.mxu3 }
 0x417   : > { %v3252_v50 = vpop.permute.xlu0 %3251 }
 0x418   : > { %v3346_v31 = vsel %vm490_vm2, %v6629_v44, %v3252_v50  ;;  %v2977_v49 = vpop.f32.mrf.mxu2  ;;  %v2746_v29 = vpop.f32.mrf.mxu0  ;;  %v6633_v50 = vld [vmem:[#allocation4_spill] sm:$0xff] }
 0x419   : > { %v3378_v4 = vadd.f32 %v6202_v35, %v3346_v31  ;;  %v3041_v25 = vadd.f32 %v2977_v49, %v2860_v5 }
 0x41b   : > { %4137 = vst.msk [vmem:[%s5347_s28 + $0x18] sm:$0xff] %vm2086_vm4, %v3378_v4  ;;  %v3201_v17 = vadd.f32 %v3137_v45, %v3041_v25  ;;  %v2862_v15 = vpop.f32.mrf.mxu1 }
 0x41c   : > { %v2863_v52 = vadd.f32 %v2862_v15, %v2746_v29 }
 0x41d   : > { %3281 = vrot.lane.b32.xlu0 %v3201_v17, %s4260_s8  ;;  %v3140_v24 = vpop.f32.mrf.mxu3 }
 0x41f   : > { %v3254_v2 = vpop.permute.xlu1 %3253 }
 0x420   : > { %v3347_v1 = vsel %vm490_vm2, %v6630_v37, %v3254_v2  ;;  %v2980_v55 = vpop.f32.mrf.mxu2  ;;  %v2749_v11 = vpop.f32.mrf.mxu0  ;;  %v6634_v2 = vld [vmem:[#allocation6_spill] sm:$0xff] }
 0x421   : > { %v3379_v59 = vadd.f32 %v6202_v35, %v3347_v1  ;;  %v3042_v13 = vadd.f32 %v2980_v55, %v2863_v52 }
 0x423   : > { %4138 = vst.msk [vmem:[%s5347_s28 + $0x30] sm:$0xff] %vm2086_vm4, %v3379_v59  ;;  %v3202_v60 = vadd.f32 %v3140_v24, %v3042_v13  ;;  %v2865_v56 = vpop.f32.mrf.mxu1 }
 0x424   : > { %v2866_v0 = vadd.f32 %v2865_v56, %v2749_v11 }
 0x425   : > { %3283 = vrot.lane.b32.xlu1 %v3202_v60, %s4260_s8  ;;  %v3143_v46 = vpop.f32.mrf.mxu3 }
 0x427   : > { %v3262_v14 = vpop.permute.xlu2 %3261 }
 0x428   : > { %v3351_v47 = vsel %vm490_vm2, %v6631_v18, %v3262_v14  ;;  %v2983_v33 = vpop.f32.mrf.mxu2  ;;  %v2752_v48 = vpop.f32.mrf.mxu0  ;;  %v6635_v14 = vld [vmem:[#allocation5_spill] sm:$0xff] }
 0x429   : > { %v3383_v39 = vadd.f32 %v6202_v35, %v3351_v47  ;;  %v3043_v53 = vadd.f32 %v2983_v33, %v2866_v0 }
 0x42b   : > { %4142 = vst.msk [vmem:[%s5347_s28 + $0x70] sm:$0xff] %vm2086_vm4, %v3383_v39  ;;  %v3203_v36 = vadd.f32 %v3143_v46, %v3043_v53  ;;  %v2868_v42 = vpop.f32.mrf.mxu1 }
 0x42c   : > { %v2869_v23 = vadd.f32 %v2868_v42, %v2752_v48 }
 0x42d   : > { %3285 = vrot.lane.b32.xlu2 %v3203_v36, %s4260_s8  ;;  %v3146_v8 = vpop.f32.mrf.mxu3 }
 0x42f   : > { %v3258_v7 = vpop.permute.xlu0 %3257 }
 0x430   : > { %v3349_v62 = vsel %vm490_vm2, %v6632_v27, %v3258_v7  ;;  %v2986_v41 = vpop.f32.mrf.mxu2  ;;  %v2755_v57 = vpop.f32.mrf.mxu0  ;;  %v6636_v7 = vld [vmem:[#allocation25_spill] sm:$0xff] }
 0x431   : > { %v3381_v30 = vadd.f32 %v6202_v35, %v3349_v62  ;;  %v3044_v9 = vadd.f32 %v2986_v41, %v2869_v23 }
 0x433   : > { %4140 = vst.msk [vmem:[%s5347_s28 + $0x50] sm:$0xff] %vm2086_vm4, %v3381_v30  ;;  %v3204_v51 = vadd.f32 %v3146_v8, %v3044_v9  ;;  %v2871_v34 = vpop.f32.mrf.mxu1 }
 0x434   : > { %v2872_v6 = vadd.f32 %v2871_v34, %v2755_v57 }
 0x435   : > { %3287 = vrot.lane.b32.xlu0 %v3204_v51, %s4260_s8  ;;  %v3149_v5 = vpop.f32.mrf.mxu3 }
 0x437   : > { %v3260_v45 = vpop.permute.xlu1 %3259 }
 0x438   : > { %v3350_v44 = vsel %vm490_vm2, %v6633_v50, %v3260_v45  ;;  %v2989_v31 = vpop.f32.mrf.mxu2  ;;  %v2758_v25 = vpop.f32.mrf.mxu0  ;;  %v6637_v45 = vld [vmem:[#allocation30_spill] sm:$0xff] }
 0x439   : > { %v3382_v49 = vadd.f32 %v6202_v35, %v3350_v44  ;;  %v3045_v4 = vadd.f32 %v2989_v31, %v2872_v6 }
 0x43b   : > { %4141 = vst.msk [vmem:[%s5347_s28 + $0x58] sm:$0xff] %vm2086_vm4, %v3382_v49  ;;  %v3205_v29 = vadd.f32 %v3149_v5, %v3045_v4  ;;  %v2874_v17 = vpop.f32.mrf.mxu1 }
 0x43c   : > { %v2875_v15 = vadd.f32 %v2874_v17, %v2758_v25 }
 0x43d   : > { %3289 = vrot.lane.b32.xlu1 %v3205_v29, %s4260_s8  ;;  %v3152_v52 = vpop.f32.mrf.mxu3 }
 0x43f   : > { %v3268_v24 = vpop.permute.xlu2 %3267 }
 0x440   : > { %v3354_v37 = vsel %vm490_vm2, %v6634_v2, %v3268_v24  ;;  %v2992_v1 = vpop.f32.mrf.mxu2  ;;  %v2761_v13 = vpop.f32.mrf.mxu0  ;;  %v6638_v24 = vld [vmem:[#allocation27_spill] sm:$0xff] }
 0x441   : > { %v3386_v55 = vadd.f32 %v6202_v35, %v3354_v37  ;;  %v3046_v59 = vadd.f32 %v2992_v1, %v2875_v15 }
 0x443   : > { %4145 = vst.msk [vmem:[%s5347_s28 + $0x98] sm:$0xff] %vm2086_vm4, %v3386_v55  ;;  %v3206_v11 = vadd.f32 %v3152_v52, %v3046_v59  ;;  %v2877_v60 = vpop.f32.mrf.mxu1 }
 0x444   : > { %v2878_v56 = vadd.f32 %v2877_v60, %v2761_v13 }
 0x445   : > { %3291 = vrot.lane.b32.xlu2 %v3206_v11, %s4260_s8  ;;  %v3155_v0 = vpop.f32.mrf.mxu3 }
 0x447   : > { %v3264_v46 = vpop.permute.xlu0 %3263 }
 0x448   : > { %v3352_v18 = vsel %vm490_vm2, %v6635_v14, %v3264_v46  ;;  %v2995_v47 = vpop.f32.mrf.mxu2  ;;  %v2764_v53 = vpop.f32.mrf.mxu0  ;;  %v6639_v46 = vld [vmem:[#allocation33_spill] sm:$0xff] }
 0x449   : > { %v3384_v33 = vadd.f32 %v6202_v35, %v3352_v18  ;;  %v3047_v39 = vadd.f32 %v2995_v47, %v2878_v56 }
 0x44b   : > { %4143 = vst.msk [vmem:[%s5347_s28 + $0x78] sm:$0xff] %vm2086_vm4, %v3384_v33  ;;  %v3207_v48 = vadd.f32 %v3155_v0, %v3047_v39  ;;  %v2880_v36 = vpop.f32.mrf.mxu1 }
 0x44c   : > { %v2881_v42 = vadd.f32 %v2880_v36, %v2764_v53 }
 0x44d   : > { %3293 = vrot.lane.b32.xlu0 %v3207_v48, %s4260_s8  ;;  %v3158_v23 = vpop.f32.mrf.mxu3 }
 0x44f   : > { %v3266_v8 = vpop.permute.xlu1 %3265 }
 0x450   : > { %v3353_v27 = vsel %vm490_vm2, %v6636_v7, %v3266_v8  ;;  %v2998_v62 = vpop.f32.mrf.mxu2  ;;  %v2767_v9 = vpop.f32.mrf.mxu0 }
 0x451   : > { %v3385_v41 = vadd.f32 %v6202_v35, %v3353_v27  ;;  %v3048_v30 = vadd.f32 %v2998_v62, %v2881_v42 }
 0x453   : > { %4144 = vst.msk [vmem:[%s5347_s28 + $0x90] sm:$0xff] %vm2086_vm4, %v3385_v41  ;;  %v3208_v57 = vadd.f32 %v3158_v23, %v3048_v30  ;;  %v2883_v51 = vpop.f32.mrf.mxu1 }
 0x454   : > { %v2884_v34 = vadd.f32 %v2883_v51, %v2767_v9 }
 0x455   : > { %3295 = vrot.lane.b32.xlu1 %v3208_v57, %s4260_s8  ;;  %v3161_v6 = vpop.f32.mrf.mxu3 }
 0x457   : > { %v3274_v5 = vpop.permute.xlu2 %3273 }
 0x458   : > { %v3357_v50 = vsel %vm490_vm2, %v6637_v45, %v3274_v5  ;;  %v3001_v44 = vpop.f32.mrf.mxu2  ;;  %v2770_v4 = vpop.f32.mrf.mxu0 }
 0x459   : > { %v3389_v31 = vadd.f32 %v6202_v35, %v3357_v50  ;;  %v3049_v49 = vadd.f32 %v3001_v44, %v2884_v34 }
 0x45b   : > { %4148 = vst.msk [vmem:[%s5347_s28 + $0xd0] sm:$0xff] %vm2086_vm4, %v3389_v31  ;;  %v3209_v25 = vadd.f32 %v3161_v6, %v3049_v49  ;;  %v2886_v29 = vpop.f32.mrf.mxu1  ;;  %v6640_v6 = vld [vmem:[#allocation9_spill] sm:$0xff] }
 0x45c   : > { %v2887_v17 = vadd.f32 %v2886_v29, %v2770_v4 }
 0x45d   : > { %3297 = vrot.lane.b32.xlu2 %v3209_v25, %s4260_s8  ;;  %v3164_v15 = vpop.f32.mrf.mxu3 }
 0x45f   : > { %v3270_v52 = vpop.permute.xlu0 %3269 }
 0x460   : > { %v3355_v2 = vsel %vm490_vm2, %v6638_v24, %v3270_v52  ;;  %v3004_v37 = vpop.f32.mrf.mxu2  ;;  %v2773_v59 = vpop.f32.mrf.mxu0 }
 0x461   : > { %v3387_v1 = vadd.f32 %v6202_v35, %v3355_v2  ;;  %v3050_v55 = vadd.f32 %v3004_v37, %v2887_v17 }
 0x463   : > { %4146 = vst.msk [vmem:[%s5347_s28 + $0xb0] sm:$0xff] %vm2086_vm4, %v3387_v1  ;;  %v3210_v13 = vadd.f32 %v3164_v15, %v3050_v55  ;;  %v2889_v11 = vpop.f32.mrf.mxu1 }
 0x464   : > { %v2890_v60 = vadd.f32 %v2889_v11, %v2773_v59 }
 0x465   : > { %3299 = vrot.lane.b32.xlu0 %v3210_v13, %s4260_s8  ;;  %v3167_v56 = vpop.f32.mrf.mxu3 }
 0x467   : > { %v3272_v0 = vpop.permute.xlu1 %3271 }
 0x468   : > { %v3356_v14 = vsel %vm490_vm2, %v6639_v46, %v3272_v0  ;;  %v3007_v18 = vpop.f32.mrf.mxu2  ;;  %v2776_v39 = vpop.f32.mrf.mxu0 }
 0x469   : > { %v3388_v47 = vadd.f32 %v6202_v35, %v3356_v14  ;;  %v3051_v33 = vadd.f32 %v3007_v18, %v2890_v60 }
 0x46b   : > { %4147 = vst.msk [vmem:[%s5347_s28 + $0xb8] sm:$0xff] %vm2086_vm4, %v3388_v47  ;;  %v3211_v53 = vadd.f32 %v3167_v56, %v3051_v33  ;;  %v2892_v48 = vpop.f32.mrf.mxu1 }
 0x46c   : > { %v2893_v36 = vadd.f32 %v2892_v48, %v2776_v39 }
 0x46d   : > { %3301 = vrot.lane.b32.xlu1 %v3211_v53, %s4260_s8  ;;  %v3170_v42 = vpop.f32.mrf.mxu3 }
 0x46f   : > { %v3280_v23 = vpop.permute.xlu2 %3279 }
 0x470   : > { %v3360_v8 = vsel %vm490_vm2, %v5921_v32, %v3280_v23  ;;  %v3010_v7 = vpop.f32.mrf.mxu2  ;;  %v2779_v41 = vpop.f32.mrf.mxu0 }
 0x471   : > { %v3392_v27 = vadd.f32 %v6202_v35, %v3360_v8  ;;  %v3052_v62 = vadd.f32 %v3010_v7, %v2893_v36 }
 0x473   : > { %4151 = vst.msk [vmem:[%s5347_s28 + $0xf8] sm:$0xff] %vm2086_vm4, %v3392_v27  ;;  %v3212_v30 = vadd.f32 %v3170_v42, %v3052_v62  ;;  %v2895_v9 = vpop.f32.mrf.mxu1 }
 0x474   : > { %v2896_v57 = vadd.f32 %v2895_v9, %v2779_v41 }
 0x475   : > { %3303 = vrot.lane.b32.xlu2 %v3212_v30, %s4260_s8  ;;  %v3173_v51 = vpop.f32.mrf.mxu3 }
 0x477   : > { %v3276_v34 = vpop.permute.xlu0 %3275 }
 0x478   : > { %v3358_v5 = vsel %vm490_vm2, %v6640_v6, %v3276_v34  ;;  %v3013_v45 = vpop.f32.mrf.mxu2  ;;  %v2782_v44 = vpop.f32.mrf.mxu0 }
 0x479   : > { %v3390_v32 = vadd.f32 %v6202_v35, %v3358_v5  ;;  %v3053_v50 = vadd.f32 %v3013_v45, %v2896_v57 }
 0x47b   : > { %4149 = vst.msk [vmem:[%s5347_s28 + $0xd8] sm:$0xff] %vm2086_vm4, %v3390_v32  ;;  %v3213_v31 = vadd.f32 %v3173_v51, %v3053_v50  ;;  %v2898_v49 = vpop.f32.mrf.mxu1 }
 0x47c   : > { %v2899_v4 = vadd.f32 %v2898_v49, %v2782_v44 }
 0x47d   : > { %3305 = vrot.lane.b32.xlu0 %v3213_v31, %s4260_s8  ;;  %v3176_v25 = vpop.f32.mrf.mxu3 }
 0x47f   : > { %v3278_v29 = vpop.permute.xlu1 %3277 }
 0x480   : > { %v3359_v17 = vsel %vm490_vm2, %v5912_v22, %v3278_v29  ;;  %v3016_v15 = vpop.f32.mrf.mxu2  ;;  %v2785_v2 = vpop.f32.mrf.mxu0 }
 0x481   : > { %v3391_v52 = vadd.f32 %v6202_v35, %v3359_v17  ;;  %v3054_v24 = vadd.f32 %v3016_v15, %v2899_v4 }
 0x483   : > { %4150 = vst.msk [vmem:[%s5347_s28 + $0xf0] sm:$0xff] %vm2086_vm4, %v3391_v52  ;;  %v3214_v37 = vadd.f32 %v3176_v25, %v3054_v24  ;;  %v2901_v1 = vpop.f32.mrf.mxu1 }
 0x484   : > { %v2902_v55 = vadd.f32 %v2901_v1, %v2785_v2 }
 0x485   : > { %3307 = vrot.lane.b32.xlu1 %v3214_v37, %s4260_s8  ;;  %v3179_v59 = vpop.f32.mrf.mxu3 }
 0x487   : > { %v3286_v13 = vpop.permute.xlu2 %3285 }
 0x488   : > { %v3363_v11 = vsel %vm490_vm2, %v5951_v28, %v3286_v13  ;;  %v3019_v22 = vpop.f32.mrf.mxu2  ;;  %v2788_v0 = vpop.f32.mrf.mxu0 }
 0x489   : > { %v3395_v60 = vadd.f32 %v6202_v35, %v3363_v11  ;;  %v3055_v56 = vadd.f32 %v3019_v22, %v2902_v55 }
 0x48b   : > { %4154 = vst.msk [vmem:[%s5347_s28 + $0x130] sm:$0xff] %vm2086_vm4, %v3395_v60  ;;  %v3215_v46 = vadd.f32 %v3179_v59, %v3055_v56  ;;  %v2904_v14 = vpop.f32.mrf.mxu1 }
 0x48c   : > { %v2905_v18 = vadd.f32 %v2904_v14, %v2788_v0 }
 0x48d   : > { %3309 = vrot.lane.b32.xlu2 %v3215_v46, %s4260_s8  ;;  %v3182_v39 = vpop.f32.mrf.mxu3 }
 0x48f   : > { %v3282_v47 = vpop.permute.xlu0 %3281 }
 0x490   : > { %v3361_v33 = vsel %vm490_vm2, %v5931_v26, %v3282_v47  ;;  %v3022_v28 = vpop.f32.mrf.mxu2 }
 0x491   : > { %v3393_v53 = vadd.f32 %v6202_v35, %v3361_v33  ;;  %v3056_v48 = vadd.f32 %v3022_v28, %v2905_v18 }
 0x493   : > { %4152 = vst.msk [vmem:[%s5347_s28 + $0x110] sm:$0xff] %vm2086_vm4, %v3393_v53  ;;  %v3216_v36 = vadd.f32 %v3182_v39, %v3056_v48 }
 0x495   : > { %3311 = vrot.lane.b32.xlu0 %v3216_v36, %s4260_s8 }
 0x497   : > { %v3284_v42 = vpop.permute.xlu1 %3283 }
 0x498   : > { %v3362_v23 = vsel %vm490_vm2, %v5941_v19, %v3284_v42 }
 0x499   : > { %v3394_v8 = vadd.f32 %v6202_v35, %v3362_v23 }
 0x49b   : > { %4153 = vst.msk [vmem:[%s5347_s28 + $0x118] sm:$0xff] %vm2086_vm4, %v3394_v8 }
 0x49f   : > { %v3292_v26 = vpop.permute.xlu2 %3291 }
 0x4a0   : > { %v3366_v7 = vsel %vm490_vm2, %v5981_v58, %v3292_v26 }
 0x4a1   : > { %v3398_v27 = vadd.f32 %v6202_v35, %v3366_v7 }
 0x4a3   : > { %4157 = vst.msk [vmem:[%s5347_s28 + $0x158] sm:$0xff] %vm2086_vm4, %v3398_v27 }
 0x4a7   : > { %v3288_v62 = vpop.permute.xlu0 %3287 }
 0x4a8   : > { %v3364_v41 = vsel %vm490_vm2, %v5961_v38, %v3288_v62 }
 0x4a9   : > { %v3396_v19 = vadd.f32 %v6202_v35, %v3364_v41 }
 0x4ab   : > { %4155 = vst.msk [vmem:[%s5347_s28 + $0x138] sm:$0xff] %vm2086_vm4, %v3396_v19 }
 0x4af   : > { %v3290_v30 = vpop.permute.xlu1 %3289 }
 0x4b0   : > { %v3365_v9 = vsel %vm490_vm2, %v5971_v3, %v3290_v30 }
 0x4b1   : > { %v3397_v58 = vadd.f32 %v6202_v35, %v3365_v9 }
 0x4b3   : > { %4156 = vst.msk [vmem:[%s5347_s28 + $0x150] sm:$0xff] %vm2086_vm4, %v3397_v58 }
 0x4b7   : > { %v3298_v57 = vpop.permute.xlu2 %3297 }
 0x4b8   : > { %v3369_v51 = vsel %vm490_vm2, %v6011_v20, %v3298_v57 }
 0x4b9   : > { %v3401_v38 = vadd.f32 %v6202_v35, %v3369_v51 }
 0x4bb   : > { %4160 = vst.msk [vmem:[%s5347_s28 + $0x190] sm:$0xff] %vm2086_vm4, %v3401_v38 }
 0x4bf   : > { %v3294_v34 = vpop.permute.xlu0 %3293 }
 0x4c0   : > { %v3367_v6 = vsel %vm490_vm2, %v5991_v40, %v3294_v34 }
 0x4c1   : > { %v3399_v3 = vadd.f32 %v6202_v35, %v3367_v6 }
 0x4c3   : > { %4158 = vst.msk [vmem:[%s5347_s28 + $0x170] sm:$0xff] %vm2086_vm4, %v3399_v3 }
 0x4c7   : > { %v3296_v5 = vpop.permute.xlu1 %3295 }
 0x4c8   : > { %v3368_v45 = vsel %vm490_vm2, %v6001_v10, %v3296_v5 }
 0x4c9   : > { %v3400_v20 = vadd.f32 %v6202_v35, %v3368_v45 }
 0x4cb   : > { %4159 = vst.msk [vmem:[%s5347_s28 + $0x178] sm:$0xff] %vm2086_vm4, %v3400_v20 }
 0x4cf   : > { %v3304_v32 = vpop.permute.xlu2 %3303 }
 0x4d0   : > { %v3372_v50 = vsel %vm490_vm2, %v6041_v43, %v3304_v32 }
 0x4d1   : > { %v3404_v40 = vadd.f32 %v6202_v35, %v3372_v50 }
 0x4d3   : > { %4163 = vst.msk [vmem:[%s5347_s28 + $0x1b8] sm:$0xff] %vm2086_vm4, %v3404_v40 }
 0x4d7   : > { %v3300_v44 = vpop.permute.xlu0 %3299 }
 0x4d8   : > { %v3370_v31 = vsel %vm490_vm2, %v6021_v21, %v3300_v44 }
 0x4d9   : > { %v3402_v10 = vadd.f32 %v6202_v35, %v3370_v31 }
 0x4db   : > { %4161 = vst.msk [vmem:[%s5347_s28 + $0x198] sm:$0xff] %vm2086_vm4, %v3402_v10 }
 0x4df   : > { %v3302_v49 = vpop.permute.xlu1 %3301 }
 0x4e0   : > { %v3371_v4 = vsel %vm490_vm2, %v6031_v63, %v3302_v49 }
 0x4e1   : > { %v3403_v43 = vadd.f32 %v6202_v35, %v3371_v4 }
 0x4e3   : > { %4162 = vst.msk [vmem:[%s5347_s28 + $0x1b0] sm:$0xff] %vm2086_vm4, %v3403_v43 }
 0x4e7   : > { %v3310_v25 = vpop.permute.xlu2 %3309 }
 0x4e8   : > { %v3375_v29 = vsel %vm490_vm2, %v6071_v12, %v3310_v25 }
 0x4e9   : > { %v3407_v21 = vadd.f32 %v6202_v35, %v3375_v29 }
 0x4eb   : > { %4166 = vst.msk [vmem:[%s5347_s28 + $0x1f0] sm:$0xff] %vm2086_vm4, %v3407_v21 }
 0x4ef   : > { %v3306_v17 = vpop.permute.xlu0 %3305 }
 0x4f0   : > { %v3373_v15 = vsel %vm490_vm2, %v6051_v16, %v3306_v17 }
 0x4f1   : > { %v3405_v52 = vadd.f32 %v6202_v35, %v3373_v15 }
 0x4f3   : > { %4164 = vst.msk [vmem:[%s5347_s28 + $0x1d0] sm:$0xff] %vm2086_vm4, %v3405_v52 }
 0x4f7   : > { %v3308_v63 = vpop.permute.xlu1 %3307 }
 0x4f8   : > { %v3374_v24 = vsel %vm490_vm2, %v6061_v54, %v3308_v63 }
 0x4f9   : > { %v3406_v2 = vadd.f32 %v6202_v35, %v3374_v24 }
 0x4fb   : > { %4165 = vst.msk [vmem:[%s5347_s28 + $0x1d8] sm:$0xff] %vm2086_vm4, %v3406_v2 }
 0x507   : > { %v3312_v12 = vpop.permute.xlu0 %3311 }
 0x508   : > { %v3376_v37 = vsel %vm490_vm2, %v6081_v61, %v3312_v12 }
 0x509   : > { %v3408_v1 = vadd.f32 %v6202_v35, %v3376_v37 }
 0x50b   : > { %4167 = vst.msk [vmem:[%s5347_s28 + $0x1f8] sm:$0xff] %vm2086_vm4, %v3408_v1 }
 0x50c PF: > { %s15_s20 = sadd.s32 1, %s4258_s20   ;;  %s6641_s18 = smov %s4254_s19 }
 0x50d   : > { %p12_p5 = scmp.ge.s32.totalorder %s15_s20, 4   ;;  %s6642_s19 = smov %s6644_s21 }
 0x50f   :  { %14 = sbr.rel (!%p12_p5) target bundleno = 2 (0x2), region = 92 }

</bundles_post_ra>
